<compile_context>
chip_gen: v7x
topology: tpu7x:2x2x1
jax: 0.10.0
libtpu: 0.0.40
codegen_flags: <defaults>
</compile_context>

<pallas_src>
import functools

import jax
import jax.numpy as jnp
from jax.experimental import pallas as pl
from jax.experimental.pallas import tpu as pltpu

# ---- NbitActive constants (num_bits=8, num_int=3) ----
QMIN = -(2.0 ** (3 - 1))                       # -4.0
QMAX = QMIN + 2.0 ** 3 - 1.0 / 2.0 ** (8 - 3)  # 3.96875
SCALE = 1.0 / 2.0 ** (8 - 3)                   # 0.03125
INV_SCALE = 2.0 ** (8 - 3)                     # 32.0
QMAX_SCALED = QMAX * INV_SCALE                 # 127.0


def _quantize(x):
    # x - fmod(x, scale) == trunc(x/scale)*scale (scale is a power of two so the
    # multiplies are exact), then clamp to [qmin, qmax].  Used only on the raw
    # network input (which can be negative) in the wrapper.
    q = jnp.trunc(x * INV_SCALE) * SCALE
    return jnp.clip(q, QMIN, QMAX)


# ----------------------------------------------------------------------------
# Fused network kernel: B images per grid step, batch folded onto the lane axis.
#   layer1: 3x3 conv as a single K=28 im2col matmul (weights x32, bias folded)
#   layer2: quantize(unscaled int) -> 1x1 conv + bias(x32) + ReLU
#   layer3: quantize(unscaled int) -> 1x1 conv (weights /32) + bias + ReLU
#   tail  : per-image global spatial max (== MaxPool2d(k=32,s=2) on 32x32)
# All matmuls are (Cout, K) x (K, B*HW): spatial*batch sits on the lane axis.
# ----------------------------------------------------------------------------
def _net_kernel(xcol_ref, w1_ref, w2_ref, b2_ref, w3_ref, b3_ref, o_ref, *, B, HW):
    x = xcol_ref[0]                                                      # (28, B*HW) bf16
    # Layer 1 (weights & bias pre-scaled by 32, bias folded into row 27) -> 32*true
    y = jnp.dot(w1_ref[...], x, preferred_element_type=jnp.float32)      # (c1, B*HW)
    y = jnp.maximum(y, 0.0)
    # Quantize for layer 2: min(trunc(y), 127) == 32 * NbitActive(true) (y >= 0).
    q = jnp.minimum(jnp.trunc(y), QMAX_SCALED).astype(jnp.bfloat16)
    # Layer 2 (weights unscaled, bias pre-scaled by 32) -> 32*true
    y = jnp.dot(w2_ref[...], q, preferred_element_type=jnp.float32)      # (c2, B*HW)
    y = jnp.maximum(y + b2_ref[...], 0.0)
    q = jnp.minimum(jnp.trunc(y), QMAX_SCALED).astype(jnp.bfloat16)
    # Layer 3 (weights pre-scaled by 1/32) -> true scale
    y = jnp.dot(w3_ref[...], q, preferred_element_type=jnp.float32)      # (c3, B*HW)
    y = jnp.maximum(y + b3_ref[...], 0.0)
    # MaxPool2d(k=32, s=2, p=0) on a 32x32 map == per-image global spatial max.
    # Static, lane-aligned 1024-wide segments -> B cross-lane reductions.
    segs = [jnp.max(y[:, b * HW:(b + 1) * HW], axis=1, keepdims=True) for b in range(B)]
    o_ref[0] = segs[0] if B == 1 else jnp.concatenate(segs, axis=1)      # (c3, B)


def _im2col_q(x_nchw):
    """quantize -> zero-pad -> 3x3 im2col; rows ordered (kh, kw, ci).

    Output dtype is bf16 (exact for the 8-bit-quantized activations);
    quantize(0)=0 so quantizing before the zero padding is valid.
    """
    N, C, H, W = x_nchw.shape
    xq = _quantize(x_nchw).astype(jnp.bfloat16)
    xp = jnp.pad(xq, ((0, 0), (0, 0), (1, 1), (1, 1)))
    taps = [xp[:, :, kh:kh + H, kw:kw + W].reshape(N, C, H * W)
            for kh in range(3) for kw in range(3)]
    return jnp.concatenate(taps, axis=1)          # (N, 9*C, HW)


def _pick_batch_tile(N, target=32):
    if N <= 1:
        return 1
    # ceil(N/2) keeps the grid length >= 2 (v7x: 2 TensorCores), capped at `target`.
    return int(min(target, -(-N // 2)))


def net_forward(x_nchw, params, *, batch_tile=None):
    N, C, H, W = x_nchw.shape
    # MaxPool2d(kernel=32, stride=2, pad=0) on the network's 32x32 feature map
    # is a global spatial max, folded into the fused kernel tail.
    assert H == 32 and W == 32, "fused kernel assumes a 32x32 input (pool k=32 -> 1x1)"
    HW = H * W

    B = _pick_batch_tile(N) if batch_tile is None else int(batch_tile)
    S = -(-N // B)                    # grid steps
    Npad = S * B
    if Npad != N:                     # pad the batch; padded rows are sliced off below
        x_nchw = jnp.pad(x_nchw, ((0, Npad - N), (0, 0), (0, 0), (0, 0)))

    # im2col + constant-1 row (folds the layer-1 bias into the matmul: K 27->28),
    # then fold B images onto the lane axis: (S, 28, B*HW).
    K1 = 9 * C + 1
    xcol = _im2col_q(x_nchw)                                             # (Npad, 27, HW)
    xcol = jnp.concatenate([xcol, jnp.ones((Npad, 1, HW), jnp.bfloat16)], axis=1)
    xcol = xcol.reshape(S, B, K1, HW).transpose(0, 2, 1, 3).reshape(S, K1, B * HW)

    # Pre-scaled transposed bf16 weights (power-of-two scalings are bit-exact).
    w1t = jnp.transpose(params["w1"], (3, 0, 1, 2)).reshape(-1, 9 * C)   # (c1, 27)
    w1f = jnp.concatenate([w1t * INV_SCALE,
                           params["b1"].reshape(-1, 1) * INV_SCALE],
                          axis=1).astype(jnp.bfloat16)                   # (c1, 28)
    w2t = params["w2"].T.astype(jnp.bfloat16)                            # (c2, c1)
    b2s = (params["b2"] * INV_SCALE).reshape(-1, 1).astype(jnp.float32)  # (c2, 1)
    w3t = (params["w3"].T * SCALE).astype(jnp.bfloat16)                  # (c3, c2)
    b3 = params["b3"].reshape(-1, 1).astype(jnp.float32)                 # (c3, 1)
    c1, c2, c3 = w1f.shape[0], w2t.shape[0], w3t.shape[0]

    kernel = functools.partial(_net_kernel, B=B, HW=HW)

    out = pl.pallas_call(
        kernel,
        out_shape=jax.ShapeDtypeStruct((S, c3, B), jnp.float32),
        grid=(S,),
        in_specs=[
            pl.BlockSpec((1, K1, B * HW), lambda s: (s, 0, 0)),
            pl.BlockSpec((c1, K1), lambda s: (0, 0)),
            pl.BlockSpec((c2, c1), lambda s: (0, 0)),
            pl.BlockSpec((c2, 1), lambda s: (0, 0)),
            pl.BlockSpec((c3, c2), lambda s: (0, 0)),
            pl.BlockSpec((c3, 1), lambda s: (0, 0)),
        ],
        out_specs=pl.BlockSpec((1, c3, B), lambda s: (s, 0, 0)),
        compiler_params=pltpu.CompilerParams(
            dimension_semantics=("parallel",),
            vmem_limit_bytes=48 * 1024 * 1024,   # headroom for B<=32; < v7x's 64 MiB VMEM
        ),
    )(xcol, w1f, w2t, b2s, w3t, b3)

    # (S, c3, B) -> (Npad, c3), drop padded rows.  Matches PyTorch's
    # x.view(N, -1) of the (N, 20, 1, 1) pool output.
    return out.transpose(0, 2, 1).reshape(Npad, c3)[:N]


# Pure-JAX reference (same math, no Pallas) for a sanity check.
def ref_forward(x_nchw, params):
    hi = jax.lax.Precision.HIGHEST
    x = jnp.transpose(x_nchw, (0, 2, 3, 1))
    x = _quantize(x)
    x = jax.lax.conv_general_dilated(
        x, params["w1"], (1, 1), ((1, 1), (1, 1)),
        dimension_numbers=("NHWC", "HWIO", "NHWC"), precision=hi)
    x = jnp.maximum(x + params["b1"].reshape(1, 1, 1, -1), 0.0)
    x = _quantize(x)
    x = jnp.maximum(jnp.einsum("nhwc,cd->nhwd", x, params["w2"], precision=hi)
                    + params["b2"].reshape(1, 1, 1, -1), 0.0)
    x = _quantize(x)
    x = jnp.maximum(jnp.einsum("nhwc,cd->nhwd", x, params["w3"], precision=hi)
                    + params["b3"].reshape(1, 1, 1, -1), 0.0)
    x = jax.lax.reduce_window(x, -jnp.inf, jax.lax.max,
                              (1, 32, 32, 1), (1, 2, 2, 1), "VALID")
    x = jnp.transpose(x, (0, 3, 1, 2)).reshape(x.shape[0], -1)
    return x


if __name__ == "__main__":
    key = jax.random.PRNGKey(0)
    ks = jax.random.split(key, 7)

    def bf16_snap(a):
        # The kernel feeds the MXU bf16 weights/biases; snap the stored f32
        # values to bf16-representable ones so kernel and f32 reference agree
        # tightly.  (Production f32 weights => ~1e-3 relative deviation from
        # the bf16 MXU path; inherent, not a bug.)
        return a.astype(jnp.bfloat16).astype(jnp.float32)

    # Deterministic synthetic parameters (HWIO for the 3x3 conv, (Cin, Cout) for 1x1s).
    params = {
        "w1": bf16_snap(jax.random.normal(ks[0], (3, 3, 3, 60), jnp.float32) * 0.2),
        "b1": bf16_snap(jax.random.normal(ks[1], (60,), jnp.float32) * 0.1),
        "w2": bf16_snap(jax.random.normal(ks[2], (60, 33), jnp.float32) * 0.1),
        "b2": bf16_snap(jax.random.normal(ks[3], (33,), jnp.float32) * 0.1),
        "w3": bf16_snap(jax.random.normal(ks[4], (33, 20), jnp.float32) * 0.1),
        "b3": bf16_snap(jax.random.normal(ks[5], (20,), jnp.float32) * 0.1),
    }
    # Input in PyTorch NCHW; spatial 32 so MaxPool(k=32, s=2) yields 1x1.
    # N=5 exercises the multi-step grid (S=2) and the batch-tile padding path.
    x = jax.random.normal(ks[6], (5, 3, 32, 32), jnp.float32) * 2.0

    out = jax.block_until_ready(jax.jit(net_forward)(x, params))
    ref = jax.block_until_ready(jax.jit(ref_forward)(x, params))

    assert out.shape == (5, 20), out.shape
    assert jnp.allclose(out, ref, rtol=2e-2, atol=2e-2), (out, ref)
    print("KERNEL_OK")
</pallas_src>

<mosaic_0001>
module attributes {stable_mosaic.version = 11 : i64} {
  func.func @_net_kernel(%arg0: i32, %arg1: memref<1x28x3072xbf16, #tpu.memory_space<vmem>>, %arg2: memref<60x28xbf16, #tpu.memory_space<vmem>>, %arg3: memref<33x60xbf16, #tpu.memory_space<vmem>>, %arg4: memref<33x1xf32, #tpu.memory_space<vmem>>, %arg5: memref<20x33xbf16, #tpu.memory_space<vmem>>, %arg6: memref<20x1xf32, #tpu.memory_space<vmem>>, %arg7: memref<1x20x3xf32, #tpu.memory_space<vmem>>) attributes {dimension_semantics = [#tpu.dimension_semantics<parallel>], iteration_bounds = array<i64: 2>, scalar_prefetch = 0 : i64, scratch_operands = 0 : i64, tpu.core_type = #tpu.core_type<tc>, window_params = [{transform_indices = @transform_0, window_bounds = array<i64: 1, 28, 3072>}, {pipeline_mode = #tpu.pipeline_mode<synchronous>, transform_indices = @transform_1, window_bounds = array<i64: 60, 28>}, {pipeline_mode = #tpu.pipeline_mode<synchronous>, transform_indices = @transform_2, window_bounds = array<i64: 33, 60>}, {pipeline_mode = #tpu.pipeline_mode<synchronous>, transform_indices = @transform_3, window_bounds = array<i64: 33, 1>}, {pipeline_mode = #tpu.pipeline_mode<synchronous>, transform_indices = @transform_4, window_bounds = array<i64: 20, 33>}, {pipeline_mode = #tpu.pipeline_mode<synchronous>, transform_indices = @transform_5, window_bounds = array<i64: 20, 1>}, {transform_indices = @transform_6, window_bounds = array<i64: 1, 20, 3>}]} {
    %c0 = arith.constant 0 : index
    %c0_0 = arith.constant 0 : index
    %c0_1 = arith.constant 0 : index
    %0 = vector.load %arg1[%c0, %c0_0, %c0_1] : memref<1x28x3072xbf16, #tpu.memory_space<vmem>>, vector<1x28x3072xbf16>
    %1 = vector.shape_cast %0 : vector<1x28x3072xbf16> to vector<28x3072xbf16>
    %c0_2 = arith.constant 0 : index
    %c0_3 = arith.constant 0 : index
    %2 = vector.load %arg2[%c0_2, %c0_3] : memref<60x28xbf16, #tpu.memory_space<vmem>>, vector<60x28xbf16>
    %cst = arith.constant dense<0.000000e+00> : vector<60x3072xf32>
    %3 = tpu.matmul %2, %1, %cst {dimension_numbers = #tpu.dot_dimension_numbers<[1], [0], [0], [1], [0, 0, 1, 1], [], []>} : vector<60x28xbf16>, vector<28x3072xbf16>, vector<60x3072xf32> -> vector<60x3072xf32>
    %cst_4 = arith.constant 0.000000e+00 : f32
    %4 = vector.broadcast %cst_4 : f32 to vector<60x3072xf32>
    %5 = arith.maximumf %3, %4 : vector<60x3072xf32>
    %cst_5 = arith.constant 0.000000e+00 : f32
    %6 = vector.broadcast %cst_5 : f32 to vector<60x3072xf32>
    %7 = arith.cmpf olt, %5, %6 : vector<60x3072xf32>
    %8 = math.ceil %5 : vector<60x3072xf32>
    %9 = math.floor %5 : vector<60x3072xf32>
    %10 = arith.select %7, %8, %9 : vector<60x3072xi1>, vector<60x3072xf32>
    %cst_6 = arith.constant 1.270000e+02 : f32
    %11 = vector.broadcast %cst_6 : f32 to vector<60x3072xf32>
    %12 = arith.minimumf %10, %11 : vector<60x3072xf32>
    %13 = arith.truncf %12 : vector<60x3072xf32> to vector<60x3072xbf16>
    %c0_7 = arith.constant 0 : index
    %c0_8 = arith.constant 0 : index
    %14 = vector.load %arg3[%c0_7, %c0_8] : memref<33x60xbf16, #tpu.memory_space<vmem>>, vector<33x60xbf16>
    %cst_9 = arith.constant dense<0.000000e+00> : vector<33x3072xf32>
    %15 = tpu.matmul %14, %13, %cst_9 {dimension_numbers = #tpu.dot_dimension_numbers<[1], [0], [0], [1], [0, 0, 1, 1], [], []>} : vector<33x60xbf16>, vector<60x3072xbf16>, vector<33x3072xf32> -> vector<33x3072xf32>
    %c0_10 = arith.constant 0 : index
    %c0_11 = arith.constant 0 : index
    %16 = vector.load %arg4[%c0_10, %c0_11] : memref<33x1xf32, #tpu.memory_space<vmem>>, vector<33x1xf32>
    %17 = vector.broadcast %16 : vector<33x1xf32> to vector<33x3072xf32>
    %18 = arith.addf %15, %17 : vector<33x3072xf32>
    %cst_12 = arith.constant 0.000000e+00 : f32
    %19 = vector.broadcast %cst_12 : f32 to vector<33x3072xf32>
    %20 = arith.maximumf %18, %19 : vector<33x3072xf32>
    %cst_13 = arith.constant 0.000000e+00 : f32
    %21 = vector.broadcast %cst_13 : f32 to vector<33x3072xf32>
    %22 = arith.cmpf olt, %20, %21 : vector<33x3072xf32>
    %23 = math.ceil %20 : vector<33x3072xf32>
    %24 = math.floor %20 : vector<33x3072xf32>
    %25 = arith.select %22, %23, %24 : vector<33x3072xi1>, vector<33x3072xf32>
    %cst_14 = arith.constant 1.270000e+02 : f32
    %26 = vector.broadcast %cst_14 : f32 to vector<33x3072xf32>
    %27 = arith.minimumf %25, %26 : vector<33x3072xf32>
    %28 = arith.truncf %27 : vector<33x3072xf32> to vector<33x3072xbf16>
    %c0_15 = arith.constant 0 : index
    %c0_16 = arith.constant 0 : index
    %29 = vector.load %arg5[%c0_15, %c0_16] : memref<20x33xbf16, #tpu.memory_space<vmem>>, vector<20x33xbf16>
    %cst_17 = arith.constant dense<0.000000e+00> : vector<20x3072xf32>
    %30 = tpu.matmul %29, %28, %cst_17 {dimension_numbers = #tpu.dot_dimension_numbers<[1], [0], [0], [1], [0, 0, 1, 1], [], []>} : vector<20x33xbf16>, vector<33x3072xbf16>, vector<20x3072xf32> -> vector<20x3072xf32>
    %c0_18 = arith.constant 0 : index
    %c0_19 = arith.constant 0 : index
    %31 = vector.load %arg6[%c0_18, %c0_19] : memref<20x1xf32, #tpu.memory_space<vmem>>, vector<20x1xf32>
    %32 = vector.broadcast %31 : vector<20x1xf32> to vector<20x3072xf32>
    %33 = arith.addf %30, %32 : vector<20x3072xf32>
    %cst_20 = arith.constant 0.000000e+00 : f32
    %34 = vector.broadcast %cst_20 : f32 to vector<20x3072xf32>
    %35 = arith.maximumf %33, %34 : vector<20x3072xf32>
    %36 = vector.extract_strided_slice %35 {offsets = [0, 0], sizes = [20, 1024], strides = [1, 1]} : vector<20x3072xf32> to vector<20x1024xf32>
    %cst_21 = arith.constant dense<0xFF800000> : vector<20xf32>
    %37 = vector.multi_reduction <maximumf>, %36, %cst_21 [1] : vector<20x1024xf32> to vector<20xf32>
    %38 = vector.shape_cast %37 : vector<20xf32> to vector<20x1xf32>
    %39 = vector.extract_strided_slice %35 {offsets = [0, 1024], sizes = [20, 1024], strides = [1, 1]} : vector<20x3072xf32> to vector<20x1024xf32>
    %cst_22 = arith.constant dense<0xFF800000> : vector<20xf32>
    %40 = vector.multi_reduction <maximumf>, %39, %cst_22 [1] : vector<20x1024xf32> to vector<20xf32>
    %41 = vector.shape_cast %40 : vector<20xf32> to vector<20x1xf32>
    %42 = vector.extract_strided_slice %35 {offsets = [0, 2048], sizes = [20, 1024], strides = [1, 1]} : vector<20x3072xf32> to vector<20x1024xf32>
    %cst_23 = arith.constant dense<0xFF800000> : vector<20xf32>
    %43 = vector.multi_reduction <maximumf>, %42, %cst_23 [1] : vector<20x1024xf32> to vector<20xf32>
    %44 = vector.shape_cast %43 : vector<20xf32> to vector<20x1xf32>
    %45 = tpu.concatenate %38, %41, %44 in 1 : vector<20x1xf32>, vector<20x1xf32>, vector<20x1xf32> -> vector<20x3xf32>
    %c0_24 = arith.constant 0 : index
    %c0_25 = arith.constant 0 : index
    %c0_26 = arith.constant 0 : index
    %46 = vector.load %arg7[%c0_24, %c0_25, %c0_26] : memref<1x20x3xf32, #tpu.memory_space<vmem>>, vector<1x20x3xf32>
    %47 = vector.shape_cast %46 : vector<1x20x3xf32> to vector<20x3xf32>
    %48 = vector.shape_cast %45 : vector<20x3xf32> to vector<1x20x3xf32>
    tpu.vector_store %arg7[%c0_24, %c0_25, %c0_26], %48 {strides = array<i32>} : memref<1x20x3xf32, #tpu.memory_space<vmem>>, vector<1x20x3xf32>,
    return
  }
  func.func @transform_0(%arg0: i32) -> (i32, i32, i32) {
    %c0_i32 = arith.constant 0 : i32
    %c0_i32_0 = arith.constant 0 : i32
    %c0_i32_1 = arith.constant 0 : i32
    return %arg0, %c0_i32, %c0_i32_0 : i32, i32, i32
  }
  func.func @transform_1(%arg0: i32) -> (i32, i32) {
    %c0_i32 = arith.constant 0 : i32
    %c0_i32_0 = arith.constant 0 : i32
    %c0_i32_1 = arith.constant 0 : i32
    return %c0_i32, %c0_i32_0 : i32, i32
  }
  func.func @transform_2(%arg0: i32) -> (i32, i32) {
    %c0_i32 = arith.constant 0 : i32
    %c0_i32_0 = arith.constant 0 : i32
    %c0_i32_1 = arith.constant 0 : i32
    return %c0_i32, %c0_i32_0 : i32, i32
  }
  func.func @transform_3(%arg0: i32) -> (i32, i32) {
    %c0_i32 = arith.constant 0 : i32
    %c0_i32_0 = arith.constant 0 : i32
    %c0_i32_1 = arith.constant 0 : i32
    return %c0_i32, %c0_i32_0 : i32, i32
  }
  func.func @transform_4(%arg0: i32) -> (i32, i32) {
    %c0_i32 = arith.constant 0 : i32
    %c0_i32_0 = arith.constant 0 : i32
    %c0_i32_1 = arith.constant 0 : i32
    return %c0_i32, %c0_i32_0 : i32, i32
  }
  func.func @transform_5(%arg0: i32) -> (i32, i32) {
    %c0_i32 = arith.constant 0 : i32
    %c0_i32_0 = arith.constant 0 : i32
    %c0_i32_1 = arith.constant 0 : i32
    return %c0_i32, %c0_i32_0 : i32, i32
  }
  func.func @transform_6(%arg0: i32) -> (i32, i32, i32) {
    %c0_i32 = arith.constant 0 : i32
    %c0_i32_0 = arith.constant 0 : i32
    %c0_i32_1 = arith.constant 0 : i32
    return %arg0, %c0_i32, %c0_i32_0 : i32, i32, i32
  }
}

</mosaic_0001>

<bundles_post_ra>
// kernel: net_forward.1
= control target key start
LH: loop header
LB: loop body
LE: loop exit
PB: predicated region body
PF: predicated region fallthrough
CT: control target
= control target key end

     0   :  { %s5650_s21 = smov 0   ;;  %s8499_s0 = inlined_call_operand.vmem [shape: bf16[2,28,3072], index: 0, kind: input, shape index: {}]   ;;  %s8500_s1 = inlined_call_operand.vmem [shape: bf16[60,28], index: 1, kind: input, shape index: {}]   ;;  %s8501_s2 = inlined_call_operand.vmem [shape: bf16[33,60], index: 2, kind: input, shape index: {}]   ;;  %s8502_s3 = inlined_call_operand.vmem [shape: f32[33,1], index: 3, kind: input, shape index: {}]   ;;  %s8503_s4 = inlined_call_operand.vmem [shape: bf16[20,33], index: 4, kind: input, shape index: {}]   ;;  %s8504_s5 = inlined_call_operand.vmem [shape: f32[20,1], index: 5, kind: input, shape index: {}]   ;;  %s8505_s6 = inlined_call_operand.vmem [shape: f32[2,20,3], index: 6, kind: output, shape index: {}]  }
   0x1 LB: > { %s5378_s22 = sadd.s32 4294967295, %s5612_s21   ;;  %p5382_p0 = scmp.ge.s32.totalorder %s5612_s21, 1  ;;  %s5612_s21 = sphi %s5650_s21, %s16_s21  }
   0x2   : > { %p212_p1 = scmp.lt.s32.totalorder %s5612_s21, 3 }
   0x4   : > { %p213_p2 = pnand %p5382_p0, %p212_p1 }
   0x6   : > { %216 = sbr.rel (%p213_p2) target bundleno = 1203 (0x4b3), region = 44 }
   0xd   : > { %p242_p3 = scmp.lt.s32.totalorder %s5378_s22, 1  ;;  %v8506_v0 = vmov 0   ;;  %vm558_vm0 = vcmask 1045504   ;;  %v5691_v27 = vld [vmem:[%s8500_s1] sm:$0xff]   ;;  %vm545_vm1 = vcmask 228352   ;;  %v5711_v44 = vld [vmem:[%s8500_s1 + $0x8] sm:$0xff]  }
   0xe   : > { %663 = vmatprep.mubr.bf16.mxu0 %v8506_v0  ;;  %736 = vmatprep.mubr.bf16.mxu1 %v8506_v0  ;;  %v5723_v45 = vld [vmem:[%s8500_s1 + $0x10] sm:$0xff]   ;;  %v5734_v46 = vld [vmem:[%s8500_s1 + $0x18] sm:$0x3f]  }
   0xf   : > { %s8674_s22 = smov (!%p242_p3, %s5378_s22), 1  ;;  %5587 = vset.pattern.permute.xlu0 %v8506_v0  ;;  %5588 = vset.pattern.permute.xlu1 %v8506_v0 }
  0x10   : > { %s5576_s23 = smul.u32 384, %s8674_s22 }
  0x11   : > { %s5577_s9 = smul.u32 24, %s8674_s22 }
  0x12   : > { %s5668_s26 = scalar_lea.vmem %s8499_s0, %s5576_s23 }
  0x13   : > { %v253_v1 = vld [vmem:[%s5668_s26] sm:$0xff]  ;;  %v254_v3 = vld [vmem:[%s5668_s26 + $0x8] sm:$0xff]  ;;  %v255_v15 = vld [vmem:[%s5668_s26 + $0x10] sm:$0xff]  ;;  %s251_s12 = scalar_lea.vmem %s8505_s6, %s5577_s9 }
  0x14   : > { %v265_v2 = vld [vmem:[%s5668_s26 + $0x60] sm:$0xff]  ;;  %v266_v5 = vld [vmem:[%s5668_s26 + $0x68] sm:$0xff]  ;;  %v267_v18 = vld [vmem:[%s5668_s26 + $0x70] sm:$0xff] }
  0x15   : > { %v5390_v4 = vcombine.high %v253_v1, %v265_v2  ;;  %v5389_v6 = vcombine.low %v253_v1, %v265_v2  ;;  %v277_v7 = vld [vmem:[%s5668_s26 + $0xc0] sm:$0xff]  ;;  %v5392_v9 = vcombine.high %v254_v3, %v266_v5  ;;  %v5391_v10 = vcombine.low %v254_v3, %v266_v5  ;;  %v278_v12 = vld [vmem:[%s5668_s26 + $0xc8] sm:$0xff]  ;;  %v256_v19 = vld [vmem:[%s5668_s26 + $0x18] sm:$0xff] }
  0x16   : > { %v289_v8 = vld [vmem:[%s5668_s26 + $0x120] sm:$0x33]  ;;  %v290_v13 = vld [vmem:[%s5668_s26 + $0x128] sm:$0x33]  ;;  %v268_v20 = vld [vmem:[%s5668_s26 + $0x78] sm:$0xff]  ;;  %v5394_v22 = vcombine.high %v255_v15, %v267_v18  ;;  %v5393_v30 = vcombine.low %v255_v15, %v267_v18 }
  0x17   : > { %v5414_v11 = vcombine.high %v277_v7, %v289_v8  ;;  %v5413_v14 = vcombine.low %v277_v7, %v289_v8  ;;  %631 = vmatprep.subr.bf16.mxu0 %v5390_v4  ;;  %v5416_v16 = vcombine.high %v278_v12, %v290_v13  ;;  %v5415_v17 = vcombine.low %v278_v12, %v290_v13  ;;  %v279_v25 = vld [vmem:[%s5668_s26 + $0xd0] sm:$0xff]  ;;  %v280_v28 = vld [vmem:[%s5668_s26 + $0xd8] sm:$0xff]  ;;  %v257_v35 = vld [vmem:[%s5668_s26 + $0x20] sm:$0xff] }
  0x18   : > { %704 = vmatprep.subr.bf16.mxu1 %v5392_v9  ;;  %632 = vmatpush1.bf16.msra.mxu0 %v5389_v6  ;;  %v5396_v24 = vcombine.high %v256_v19, %v268_v20  ;;  %v291_v26 = vld [vmem:[%s5668_s26 + $0x130] sm:$0x33]  ;;  %v292_v29 = vld [vmem:[%s5668_s26 + $0x138] sm:$0x33]  ;;  %v5395_v31 = vcombine.low %v256_v19, %v268_v20  ;;  %v269_v36 = vld [vmem:[%s5668_s26 + $0x80] sm:$0xff] }
  0x19   : > { %705 = vmatpush1.bf16.msra.mxu1 %v5391_v10  ;;  %5437 = vmatprep.subr.msk.bf16.mxu0 %vm558_vm0, %v5414_v11  ;;  %v560_v21 = vsel %vm558_vm0, %v5413_v14, 0  ;;  %v566_v23 = vsel %vm558_vm0, %v5415_v17, 0  ;;  %v5417_v32 = vcombine.low %v279_v25, %v291_v26  ;;  %v5418_v33 = vcombine.high %v279_v25, %v291_v26  ;;  %v258_v38 = vld [vmem:[%s5668_s26 + $0x28] sm:$0xff]  ;;  %v281_v47 = vld [vmem:[%s5668_s26 + $0xe0] sm:$0xff]  ;;  %v259_v56 = vld [vmem:[%s5668_s26 + $0x30] sm:$0xff] }
  0x1a   : > { %5442 = vmatprep.subr.msk.bf16.mxu1 %vm558_vm0, %v5416_v16  ;;  %v5419_v34 = vcombine.low %v280_v28, %v292_v29  ;;  %v5420_v37 = vcombine.high %v280_v28, %v292_v29  ;;  %v270_v39 = vld [vmem:[%s5668_s26 + $0x88] sm:$0xff]  ;;  %v5398_v41 = vcombine.high %v257_v35, %v269_v36  ;;  %v293_v48 = vld [vmem:[%s5668_s26 + $0x140] sm:$0x33]  ;;  %v5397_v51 = vcombine.low %v257_v35, %v269_v36  ;;  %v271_v57 = vld [vmem:[%s5668_s26 + $0x90] sm:$0xff] }
  0x1b   : > { %v572_v40 = vsel %vm558_vm0, %v5417_v32, 0  ;;  %v5400_v43 = vcombine.high %v258_v38, %v270_v39  ;;  %v282_v49 = vld [vmem:[%s5668_s26 + $0xe8] sm:$0xff]  ;;  %v5399_v52 = vcombine.low %v258_v38, %v270_v39  ;;  %v5421_v53 = vcombine.low %v281_v47, %v293_v48  ;;  %v260_v59 = vld [vmem:[%s5668_s26 + $0x38] sm:$0xff]  ;;  %v283_v2 = vld [vmem:[%s5668_s26 + $0xf0] sm:$0xff] }
  0x1c   : > { %634 = vmatpush1.bf16.msra.mxu0 %v560_v21  ;;  %v578_v42 = vsel %vm558_vm0, %v5419_v34, 0  ;;  %v294_v50 = vld [vmem:[%s5668_s26 + $0x148] sm:$0x33]  ;;  %v5422_v54 = vcombine.high %v281_v47, %v293_v48  ;;  %v272_v60 = vld [vmem:[%s5668_s26 + $0x98] sm:$0xff]  ;;  %v5402_v62 = vcombine.high %v259_v56, %v271_v57  ;;  %v295_v3 = vld [vmem:[%s5668_s26 + $0x150] sm:$0x33]  ;;  %v5401_v6 = vcombine.low %v259_v56, %v271_v57 }
  0x1d   : > { %707 = vmatpush1.bf16.msra.mxu1 %v566_v23  ;;  %777 = vmatprep.subr.bf16.mxu0 %v5394_v22  ;;  %v5423_v55 = vcombine.low %v282_v49, %v294_v50  ;;  %v5424_v58 = vcombine.high %v282_v49, %v294_v50  ;;  %v584_v61 = vsel %vm558_vm0, %v5421_v53, 0  ;;  %v5404_v1 = vcombine.high %v260_v59, %v272_v60  ;;  %v284_v4 = vld [vmem:[%s5668_s26 + $0xf8] sm:$0xff]  ;;  %v261_v11 = vld [vmem:[%s5668_s26 + $0x40] sm:$0xff]  ;;  %v262_v14 = vld [vmem:[%s5668_s26 + $0x48] sm:$0xff] }
  0x1e   : > { %850 = vmatprep.subr.bf16.mxu1 %v5396_v24  ;;  %v296_v5 = vld [vmem:[%s5668_s26 + $0x158] sm:$0x33]  ;;  %v5403_v7 = vcombine.low %v260_v59, %v272_v60  ;;  %v5425_v8 = vcombine.low %v283_v2, %v295_v3  ;;  %v5426_v9 = vcombine.high %v283_v2, %v295_v3  ;;  %v273_v12 = vld [vmem:[%s5668_s26 + $0xa0] sm:$0xff]  ;;  %v274_v15 = vld [vmem:[%s5668_s26 + $0xa8] sm:$0xff] }
  0x1f   : > { %5438 = vmatmul.mubr.msk.bf16.vlgmr.msra.gmra.mrb[0].mxu0 %vm545_vm1, %v5691_v27  ;;  %v590_v63 = vsel %vm558_vm0, %v5423_v55, 0  ;;  %v5427_v10 = vcombine.low %v284_v4, %v296_v5  ;;  %v5428_v13 = vcombine.high %v284_v4, %v296_v5  ;;  %v5406_v17 = vcombine.high %v261_v11, %v273_v12  ;;  %v285_v20 = vld [vmem:[%s5668_s26 + $0x100] sm:$0xff]  ;;  %v286_v22 = vld [vmem:[%s5668_s26 + $0x108] sm:$0xff]  ;;  %v276_v34 = vld [vmem:[%s5668_s26 + $0xb8] sm:$0xff] }
  0x20   : > { %5443 = vmatmul.mubr.msk.bf16.vlgmr.msra.gmra.mrb[0].mxu1 %vm545_vm1, %v5691_v27  ;;  %778 = vmatpush1.bf16.msra.mxu0 %v5393_v30  ;;  %v596_v16 = vsel %vm558_vm0, %v5425_v8, 0  ;;  %v5408_v19 = vcombine.high %v262_v14, %v274_v15  ;;  %v297_v21 = vld [vmem:[%s5668_s26 + $0x160] sm:$0x33]  ;;  %v298_v23 = vld [vmem:[%s5668_s26 + $0x168] sm:$0x33]  ;;  %v5405_v24 = vcombine.low %v261_v11, %v273_v12  ;;  %v5407_v25 = vcombine.low %v262_v14, %v274_v15  ;;  %v263_v30 = vld [vmem:[%s5668_s26 + $0x50] sm:$0xff] }
  0x21   : > { %851 = vmatpush1.bf16.msra.mxu1 %v5395_v31  ;;  %673 = vmatprep.mubr.bf16.mxu0 %v8506_v0  ;;  %v602_v18 = vsel %vm558_vm0, %v5427_v10, 0  ;;  %v5429_v26 = vcombine.low %v285_v20, %v297_v21  ;;  %v5430_v28 = vcombine.high %v285_v20, %v297_v21  ;;  %v5431_v29 = vcombine.low %v286_v22, %v298_v23  ;;  %v275_v31 = vld [vmem:[%s5668_s26 + $0xb0] sm:$0xff] }
  0x22   : > { %746 = vmatprep.mubr.bf16.mxu1 %v8506_v0  ;;  %5447 = vmatprep.subr.msk.bf16.mxu0 %vm558_vm0, %v5418_v33  ;;  %v5432_v32 = vcombine.high %v286_v22, %v298_v23  ;;  %v264_v33 = vld [vmem:[%s5668_s26 + $0x58] sm:$0xff]  ;;  %v5410_v36 = vcombine.high %v263_v30, %v275_v31  ;;  %v287_v39 = vld [vmem:[%s5668_s26 + $0x110] sm:$0xff] }
  0x23   : > { %5452 = vmatprep.subr.msk.bf16.mxu1 %vm558_vm0, %v5420_v37  ;;  %v608_v35 = vsel %vm558_vm0, %v5429_v26, 0  ;;  %v614_v37 = vsel %vm558_vm0, %v5431_v29, 0  ;;  %v5412_v38 = vcombine.high %v264_v33, %v276_v34  ;;  %v5411_v47 = vcombine.low %v264_v33, %v276_v34 }
  0x24   : > { %780 = vmatpush1.bf16.msra.mxu0 %v572_v40  ;;  %v299_v40 = vld [vmem:[%s5668_s26 + $0x170] sm:$0x33] }
  0x25   : > { %853 = vmatpush1.bf16.msra.mxu1 %v578_v42  ;;  %923 = vmatprep.subr.bf16.mxu0 %v5398_v41  ;;  %v288_v41 = vld [vmem:[%s5668_s26 + $0x118] sm:$0xff]  ;;  %v5433_v48 = vcombine.low %v287_v39, %v299_v40  ;;  %v5434_v49 = vcombine.high %v287_v39, %v299_v40 }
  0x26   : > { %996 = vmatprep.subr.bf16.mxu1 %v5400_v43  ;;  %v300_v42 = vld [vmem:[%s5668_s26 + $0x178] sm:$0x33]  ;;  %v5409_v43 = vcombine.low %v263_v30, %v275_v31 }
  0x27   : > { %5439 = vmatmul.mubr.msk.bf16.gmra.mrb[4].mxu0 %vm545_vm1, %v5711_v44  ;;  %v5435_v50 = vcombine.low %v288_v41, %v300_v42 }
  0x28   : > { %5444 = vmatmul.mubr.msk.bf16.gmra.mrb[4].mxu1 %vm545_vm1, %v5711_v44  ;;  %683 = vmatprep.mubr.bf16.mxu0 %v8506_v0 }
  0x29   : > { %756 = vmatprep.mubr.bf16.mxu1 %v8506_v0  ;;  %v626_v53 = vsel %vm558_vm0, %v5435_v50, 0 }
  0x2f   : > { %5440 = vmatmul.mubr.msk.bf16.gmra.mrb[8].mxu0 %vm545_vm1, %v5723_v45 }
  0x30   : > { %5445 = vmatmul.mubr.msk.bf16.gmra.mrb[8].mxu1 %vm545_vm1, %v5723_v45  ;;  %693 = vmatprep.mubr.bf16.mxu0 %v8506_v0 }
  0x31   : > { %766 = vmatprep.mubr.bf16.mxu1 %v8506_v0 }
  0x37   : > { %5441 = vmatmul.mubr.msk.bf16.gmra.mrb[12].mxu0 %vm545_vm1, %v5734_v46 }
  0x38   : > { %5446 = vmatmul.mubr.msk.bf16.gmra.mrb[12].mxu1 %vm545_vm1, %v5734_v46  ;;  %809 = vmatprep.mubr.bf16.mxu0 %v8506_v0 }
  0x39   : > { %882 = vmatprep.mubr.bf16.mxu1 %v8506_v0 }
  0x3f   : > { %5448 = vmatmul.mubr.msk.bf16.vlgmr.msra.gmra.mrb[16].mxu0 %vm545_vm1, %v5691_v27 }
  0x40   : > { %5453 = vmatmul.mubr.msk.bf16.vlgmr.msra.gmra.mrb[16].mxu1 %vm545_vm1, %v5691_v27  ;;  %924 = vmatpush1.bf16.msra.mxu0 %v5397_v51  ;;  %v5436_v51 = vcombine.high %v288_v41, %v300_v42 }
  0x41   : > { %997 = vmatpush1.bf16.msra.mxu1 %v5399_v52  ;;  %819 = vmatprep.mubr.bf16.mxu0 %v8506_v0  ;;  %v620_v52 = vsel %vm558_vm0, %v5433_v48, 0 }
  0x42   : > { %892 = vmatprep.mubr.bf16.mxu1 %v8506_v0  ;;  %5457 = vmatprep.subr.msk.bf16.mxu0 %vm558_vm0, %v5422_v54 }
  0x43   : > { %5462 = vmatprep.subr.msk.bf16.mxu1 %vm558_vm0, %v5424_v58 }
  0x44   : > { %926 = vmatpush1.bf16.msra.mxu0 %v584_v61 }
  0x45   : > { %999 = vmatpush1.bf16.msra.mxu1 %v590_v63  ;;  %1069 = vmatprep.subr.bf16.mxu0 %v5402_v62 }
  0x46   : > { %1142 = vmatprep.subr.bf16.mxu1 %v5404_v1 }
  0x47   : > { %5449 = vmatmul.mubr.msk.bf16.gmra.mrb[20].mxu0 %vm545_vm1, %v5711_v44 }
  0x48   : > { %5454 = vmatmul.mubr.msk.bf16.gmra.mrb[20].mxu1 %vm545_vm1, %v5711_v44  ;;  %829 = vmatprep.mubr.bf16.mxu0 %v8506_v0 }
  0x49   : > { %902 = vmatprep.mubr.bf16.mxu1 %v8506_v0 }
  0x4f   : > { %5450 = vmatmul.mubr.msk.bf16.gmra.mrb[24].mxu0 %vm545_vm1, %v5723_v45 }
  0x50   : > { %5455 = vmatmul.mubr.msk.bf16.gmra.mrb[24].mxu1 %vm545_vm1, %v5723_v45  ;;  %839 = vmatprep.mubr.bf16.mxu0 %v8506_v0 }
  0x51   : > { %912 = vmatprep.mubr.bf16.mxu1 %v8506_v0 }
  0x57   : > { %5451 = vmatmul.mubr.msk.bf16.gmra.mrb[28].mxu0 %vm545_vm1, %v5734_v46 }
  0x58   : > { %5456 = vmatmul.mubr.msk.bf16.gmra.mrb[28].mxu1 %vm545_vm1, %v5734_v46  ;;  %955 = vmatprep.mubr.bf16.mxu0 %v8506_v0 }
  0x59   : > { %1028 = vmatprep.mubr.bf16.mxu1 %v8506_v0 }
  0x5f   : > { %5458 = vmatmul.mubr.msk.bf16.vlgmr.msra.gmra.mrb[32].mxu0 %vm545_vm1, %v5691_v27 }
  0x60   : > { %5463 = vmatmul.mubr.msk.bf16.vlgmr.msra.gmra.mrb[32].mxu1 %vm545_vm1, %v5691_v27  ;;  %1070 = vmatpush1.bf16.msra.mxu0 %v5401_v6 }
  0x61   : > { %1143 = vmatpush1.bf16.msra.mxu1 %v5403_v7  ;;  %965 = vmatprep.mubr.bf16.mxu0 %v8506_v0 }
  0x62   : > { %1038 = vmatprep.mubr.bf16.mxu1 %v8506_v0  ;;  %5467 = vmatprep.subr.msk.bf16.mxu0 %vm558_vm0, %v5426_v9 }
  0x63   : > { %5472 = vmatprep.subr.msk.bf16.mxu1 %vm558_vm0, %v5428_v13 }
  0x64   : > { %1072 = vmatpush1.bf16.msra.mxu0 %v596_v16 }
  0x65   : > { %1145 = vmatpush1.bf16.msra.mxu1 %v602_v18  ;;  %1215 = vmatprep.subr.bf16.mxu0 %v5406_v17 }
  0x66   : > { %1288 = vmatprep.subr.bf16.mxu1 %v5408_v19 }
  0x67   : > { %5459 = vmatmul.mubr.msk.bf16.gmra.mrb[36].mxu0 %vm545_vm1, %v5711_v44 }
  0x68   : > { %5464 = vmatmul.mubr.msk.bf16.gmra.mrb[36].mxu1 %vm545_vm1, %v5711_v44  ;;  %975 = vmatprep.mubr.bf16.mxu0 %v8506_v0 }
  0x69   : > { %1048 = vmatprep.mubr.bf16.mxu1 %v8506_v0 }
  0x6f   : > { %5460 = vmatmul.mubr.msk.bf16.gmra.mrb[40].mxu0 %vm545_vm1, %v5723_v45 }
  0x70   : > { %5465 = vmatmul.mubr.msk.bf16.gmra.mrb[40].mxu1 %vm545_vm1, %v5723_v45  ;;  %985 = vmatprep.mubr.bf16.mxu0 %v8506_v0 }
  0x71   : > { %1058 = vmatprep.mubr.bf16.mxu1 %v8506_v0 }
  0x77   : > { %5461 = vmatmul.mubr.msk.bf16.gmra.mrb[44].mxu0 %vm545_vm1, %v5734_v46 }
  0x78   : > { %5466 = vmatmul.mubr.msk.bf16.gmra.mrb[44].mxu1 %vm545_vm1, %v5734_v46  ;;  %1101 = vmatprep.mubr.bf16.mxu0 %v8506_v0 }
  0x79   : > { %1174 = vmatprep.mubr.bf16.mxu1 %v8506_v0 }
  0x7f   : > { %5468 = vmatmul.mubr.msk.bf16.vlgmr.msra.gmra.mrb[48].mxu0 %vm545_vm1, %v5691_v27 }
  0x80   : > { %5473 = vmatmul.mubr.msk.bf16.vlgmr.msra.gmra.mrb[48].mxu1 %vm545_vm1, %v5691_v27  ;;  %1216 = vmatpush1.bf16.msra.mxu0 %v5405_v24 }
  0x81   : > { %1289 = vmatpush1.bf16.msra.mxu1 %v5407_v25  ;;  %1111 = vmatprep.mubr.bf16.mxu0 %v8506_v0 }
  0x82   : > { %1184 = vmatprep.mubr.bf16.mxu1 %v8506_v0  ;;  %5477 = vmatprep.subr.msk.bf16.mxu0 %vm558_vm0, %v5430_v28 }
  0x83   : > { %5482 = vmatprep.subr.msk.bf16.mxu1 %vm558_vm0, %v5432_v32 }
  0x84   : > { %1218 = vmatpush1.bf16.msra.mxu0 %v608_v35 }
  0x85   : > { %1291 = vmatpush1.bf16.msra.mxu1 %v614_v37  ;;  %1361 = vmatprep.subr.bf16.mxu0 %v5410_v36 }
  0x86   : > { %1434 = vmatprep.subr.bf16.mxu1 %v5412_v38 }
  0x87   : > { %5469 = vmatmul.mubr.msk.bf16.gmra.mrb[52].mxu0 %vm545_vm1, %v5711_v44 }
  0x88   : > { %5474 = vmatmul.mubr.msk.bf16.gmra.mrb[52].mxu1 %vm545_vm1, %v5711_v44  ;;  %1121 = vmatprep.mubr.bf16.mxu0 %v8506_v0 }
  0x89   : > { %1194 = vmatprep.mubr.bf16.mxu1 %v8506_v0 }
  0x8f   : > { %5470 = vmatmul.mubr.msk.bf16.gmra.mrb[56].mxu0 %vm545_vm1, %v5723_v45 }
  0x90   : > { %5475 = vmatmul.mubr.msk.bf16.gmra.mrb[56].mxu1 %vm545_vm1, %v5723_v45  ;;  %1131 = vmatprep.mubr.bf16.mxu0 %v8506_v0 }
  0x91   : > { %1204 = vmatprep.mubr.bf16.mxu1 %v8506_v0 }
  0x97   : > { %5471 = vmatmul.mubr.msk.bf16.gmra.mrb[60].mxu0 %vm545_vm1, %v5734_v46 }
  0x98   : > { %5476 = vmatmul.mubr.msk.bf16.gmra.mrb[60].mxu1 %vm545_vm1, %v5734_v46  ;;  %1247 = vmatprep.mubr.bf16.mxu0 %v8506_v0 }
  0x99   : > { %1320 = vmatprep.mubr.bf16.mxu1 %v8506_v0 }
  0x9f   : > { %5478 = vmatmul.mubr.msk.bf16.vlgmr.msra.gmra.mrb[64].mxu0 %vm545_vm1, %v5691_v27 }
  0xa0   : > { %5483 = vmatmul.mubr.msk.bf16.vlgmr.msra.gmra.mrb[64].mxu1 %vm545_vm1, %v5691_v27  ;;  %1362 = vmatpush1.bf16.msra.mxu0 %v5409_v43 }
  0xa1   : > { %1435 = vmatpush1.bf16.msra.mxu1 %v5411_v47  ;;  %1257 = vmatprep.mubr.bf16.mxu0 %v8506_v0 }
  0xa2   : > { %1330 = vmatprep.mubr.bf16.mxu1 %v8506_v0  ;;  %5487 = vmatprep.subr.msk.bf16.mxu0 %vm558_vm0, %v5434_v49 }
  0xa3   : > { %5492 = vmatprep.subr.msk.bf16.mxu1 %vm558_vm0, %v5436_v51 }
  0xa4   : > { %1364 = vmatpush1.bf16.msra.mxu0 %v620_v52 }
  0xa5   : > { %1437 = vmatpush1.bf16.msra.mxu1 %v626_v53 }
  0xa7   : > { %5479 = vmatmul.mubr.msk.bf16.gmra.mrb[68].mxu0 %vm545_vm1, %v5711_v44 }
  0xa8   : > { %5484 = vmatmul.mubr.msk.bf16.gmra.mrb[68].mxu1 %vm545_vm1, %v5711_v44  ;;  %1267 = vmatprep.mubr.bf16.mxu0 %v8506_v0 }
  0xa9   : > { %1340 = vmatprep.mubr.bf16.mxu1 %v8506_v0 }
  0xaf   : > { %5480 = vmatmul.mubr.msk.bf16.gmra.mrb[72].mxu0 %vm545_vm1, %v5723_v45 }
  0xb0   : > { %5485 = vmatmul.mubr.msk.bf16.gmra.mrb[72].mxu1 %vm545_vm1, %v5723_v45  ;;  %1277 = vmatprep.mubr.bf16.mxu0 %v8506_v0 }
  0xb1   : > { %1350 = vmatprep.mubr.bf16.mxu1 %v8506_v0 }
  0xb7   : > { %5481 = vmatmul.mubr.msk.bf16.gmra.mrb[76].mxu0 %vm545_vm1, %v5734_v46 }
  0xb8   : > { %5486 = vmatmul.mubr.msk.bf16.gmra.mrb[76].mxu1 %vm545_vm1, %v5734_v46  ;;  %1393 = vmatprep.mubr.bf16.mxu0 %v8506_v0 }
  0xb9   : > { %1466 = vmatprep.mubr.bf16.mxu1 %v8506_v0 }
  0xbf   : > { %5488 = vmatmul.mubr.msk.bf16.vlgmr.msra.gmra.mrb[80].mxu0 %vm545_vm1, %v5691_v27 }
  0xc0   : > { %5493 = vmatmul.mubr.msk.bf16.vlgmr.msra.gmra.mrb[80].mxu1 %vm545_vm1, %v5691_v27  ;;  %1403 = vmatprep.mubr.bf16.mxu0 %v8506_v0 }
  0xc1   : > { %1476 = vmatprep.mubr.bf16.mxu1 %v8506_v0 }
  0xc7   : > { %5489 = vmatmul.mubr.msk.bf16.gmra.mrb[84].mxu0 %vm545_vm1, %v5711_v44 }
  0xc8   : > { %5494 = vmatmul.mubr.msk.bf16.gmra.mrb[84].mxu1 %vm545_vm1, %v5711_v44  ;;  %1413 = vmatprep.mubr.bf16.mxu0 %v8506_v0 }
  0xc9   : > { %1486 = vmatprep.mubr.bf16.mxu1 %v8506_v0 }
  0xcf   : > { %5490 = vmatmul.mubr.msk.bf16.gmra.mrb[88].mxu0 %vm545_vm1, %v5723_v45 }
  0xd0   : > { %5495 = vmatmul.mubr.msk.bf16.gmra.mrb[88].mxu1 %vm545_vm1, %v5723_v45  ;;  %1423 = vmatprep.mubr.bf16.mxu0 %v8506_v0 }
  0xd1   : > { %1496 = vmatprep.mubr.bf16.mxu1 %v8506_v0 }
  0xd7   : > { %5491 = vmatmul.mubr.msk.bf16.gmra.mrb[92].mxu0 %vm545_vm1, %v5734_v46 }
  0xd8   : > { %5496 = vmatmul.mubr.msk.bf16.gmra.mrb[92].mxu1 %vm545_vm1, %v5734_v46  ;;  %2917 = vmatprep.mubr.bf16.mxu0 %v8506_v0 }
  0xd9   : > { %2978 = vmatprep.mubr.bf16.mxu1 %v8506_v0 }
  0xf2   : > { %v665_v27 = vpop.f32.mrb[0].mxu0 }
  0xf3   : > { %v738_v44 = vpop.f32.mrb[0].mxu1  ;;  %v667_v54 = vpop.f32.mrb[1].mxu0  ;;  %v1507_v45 = vmax.f32 %v665_v27, 0.0 }
  0xf4   : > { %v740_v55 = vpop.f32.mrb[1].mxu1  ;;  %v669_v56 = vpop.f32.mrb[2].mxu0  ;;  %v1509_v59 = vmax.f32 %v738_v44, 0.0  ;;  %v1508_v63 = vmax.f32 %v667_v54, 0.0 }
  0xf5   : > { %v742_v57 = vpop.f32.mrb[2].mxu1  ;;  %v671_v58 = vpop.f32.mrb[3].mxu0  ;;  %v1891_v61 = vceil.f32 %v1507_v45  ;;  %v2083_v62 = vfloor.f32 %v1507_v45  ;;  %vm1699_vm2 = vcmp.lt.f32.partialorder %v1507_v45, 0.0  ;;  %v1531_v2 = vmax.f32 %v669_v56, 0.0 }
  0xf6   : > { %v744_v60 = vpop.f32.mrb[3].mxu1  ;;  %v1893_v1 = vceil.f32 %v1509_v59  ;;  %v2085_v46 = vfloor.f32 %v1509_v59  ;;  %vm1701_vm3 = vcmp.lt.f32.partialorder %v1509_v59, 0.0  ;;  %v1533_v4 = vmax.f32 %v742_v57, 0.0 }
  0xf7   : > { %v1510_v7 = vmax.f32 %v740_v55, 0.0  ;;  %v5906_v10 = vsel %vm1699_vm2, %v1891_v61, %v2083_v62  ;;  %vm1700_vm4 = vcmp.lt.f32.partialorder %v1508_v63, 0.0  ;;  %v1892_v11 = vceil.f32 %v1508_v63 }
  0xf8   : > { %v1532_v12 = vmax.f32 %v671_v58, 0.0  ;;  %v5910_v15 = vsel %vm1701_vm3, %v1893_v1, %v2085_v46  ;;  %v2084_v16 = vfloor.f32 %v1508_v63  ;;  %v1915_v17 = vceil.f32 %v1531_v2 }
  0xf9   : > { %v2107_v18 = vfloor.f32 %v1531_v2  ;;  %vm1723_vm5 = vcmp.lt.f32.partialorder %v1531_v2, 0.0  ;;  %v1917_v20 = vceil.f32 %v1533_v4  ;;  %v2109_v21 = vfloor.f32 %v1533_v4 }
  0xfa   : > { %v675_v3 = vpop.f32.mrb[4].mxu0  ;;  %v1534_v22 = vmax.f32 %v744_v60, 0.0  ;;  %v2467_v23 = vmin.f32 %v5906_v10, 127.0  ;;  %vm1702_vm6 = vcmp.lt.f32.partialorder %v1510_v7, 0.0  ;;  %vm1725_vm7 = vcmp.lt.f32.partialorder %v1533_v4, 0.0 }
  0xfb   : > { %v748_v5 = vpop.f32.mrb[4].mxu1  ;;  %v677_v6 = vpop.f32.mrb[5].mxu0  ;;  %v1555_v24 = vmax.f32 %v675_v3, 0.0  ;;  %v1894_v25 = vceil.f32 %v1510_v7  ;;  %v2086_v26 = vfloor.f32 %v1510_v7  ;;  %v1916_v28 = vceil.f32 %v1532_v12 }
  0xfc   : > { %v750_v8 = vpop.f32.mrb[5].mxu1  ;;  %v679_v9 = vpop.f32.mrb[6].mxu0  ;;  %v2108_v29 = vfloor.f32 %v1532_v12  ;;  %v2469_v30 = vmin.f32 %v5910_v15, 127.0  ;;  %v2299_v31 = vsel %vm1723_vm5, %v1915_v17, %v2107_v18  ;;  %vm1724_vm8 = vcmp.lt.f32.partialorder %v1532_v12, 0.0 }
  0xfd   : > { %v752_v13 = vpop.f32.mrb[6].mxu1  ;;  %v5908_v14 = vpop.f32.mrb[7].mxu0  ;;  %v2276_v32 = vsel %vm1700_vm4, %v1892_v11, %v2084_v16  ;;  %v2301_v34 = vsel %vm1725_vm7, %v1917_v20, %v2109_v21  ;;  %v1918_v35 = vceil.f32 %v1534_v22  ;;  %v2110_v36 = vfloor.f32 %v1534_v22 }
  0xfe   : > { %v5912_v19 = vpop.f32.mrb[7].mxu1  ;;  %v1557_v37 = vmax.f32 %v748_v5, 0.0  ;;  %vm1726_vm9 = vcmp.lt.f32.partialorder %v1534_v22, 0.0  ;;  %v1939_v40 = vceil.f32 %v1555_v24  ;;  %v2131_v41 = vfloor.f32 %v1555_v24 }
  0xff   : > { %v1579_v42 = vmax.f32 %v679_v9, 0.0  ;;  %vm1747_vm10 = vcmp.lt.f32.partialorder %v1555_v24, 0.0  ;;  %v1581_v48 = vmax.f32 %v752_v13, 0.0  ;;  %v2300_v49 = vsel %vm1724_vm8, %v1916_v28, %v2108_v29 }
 0x100   : > { %v2278_v50 = vsel %vm1702_vm6, %v1894_v25, %v2086_v26  ;;  %v2491_v53 = vmin.f32 %v2299_v31, 127.0  ;;  %v2493_v27 = vmin.f32 %v2301_v34, 127.0  ;;  %v5929_v44 = vmax.f32 %v677_v6, 0.0 }
 0x101   : > { %v2492_v54 = vmin.f32 %v2300_v49, 127.0  ;;  %vm1749_vm11 = vcmp.lt.f32.partialorder %v1557_v37, 0.0  ;;  %v5933_v56 = vmax.f32 %v750_v8, 0.0  ;;  %v2468_v45 = vmin.f32 %v2276_v32, 127.0 }
 0x102   : > { %v5917_v33 = vpop.f32.mrb[8].mxu0  ;;  %v2302_v57 = vsel %vm1726_vm9, %v1918_v35, %v2110_v36  ;;  %v5936_v58 = vsel %vm1747_vm10, %v1939_v40, %v2131_v41  ;;  %v1941_v59 = vceil.f32 %v1557_v37  ;;  %v2133_v60 = vfloor.f32 %v1557_v37 }
 0x103   : > { %v5919_v38 = vpop.f32.mrb[8].mxu1  ;;  %v5921_v39 = vpop.f32.mrb[9].mxu0  ;;  %vm1771_vm12 = vcmp.lt.f32.partialorder %v1579_v42, 0.0  ;;  %v1963_v61 = vceil.f32 %v1579_v42  ;;  %v2155_v62 = vfloor.f32 %v1579_v42  ;;  %v1965_v63 = vceil.f32 %v1581_v48 }
 0x104   : > { %v5923_v43 = vpop.f32.mrb[9].mxu1  ;;  %v689_v47 = vpop.f32.mrb[10].mxu0  ;;  %v2660_v1 = vpack.c.bf16 %v2492_v54, %v2468_v45  ;;  %v2157_v46 = vfloor.f32 %v1581_v48  ;;  %v2470_v2 = vmin.f32 %v2278_v50, 127.0  ;;  %v2494_v3 = vmin.f32 %v2302_v57, 127.0 }
 0x105   : > { %v762_v51 = vpop.f32.mrb[10].mxu1  ;;  %v5927_v52 = vpop.f32.mrb[11].mxu0  ;;  %v2659_v4 = vpack.c.bf16 %v2491_v53, %v2467_v23  ;;  %vm1748_vm13 = vcmp.lt.f32.partialorder %v5929_v44, 0.0  ;;  %vm1773_vm14 = vcmp.lt.f32.partialorder %v1581_v48, 0.0  ;;  %v1580_v6 = vmax.f32 %v5908_v14, 0.0 }
 0x106   : > { %v5931_v55 = vpop.f32.mrb[11].mxu1  ;;  %2885 = vmatprep.subr.bf16.mxu0 %v2660_v1  ;;  %v2661_v7 = vpack.c.bf16 %v2493_v27, %v2469_v30  ;;  %v5947_v10 = vsel %vm1749_vm11, %v1941_v59, %v2133_v60  ;;  %v1940_v11 = vceil.f32 %v5929_v44  ;;  %v1582_v12 = vmax.f32 %v5912_v19, 0.0 }
 0x107   : > { %v2662_v13 = vpack.c.bf16 %v2494_v3, %v2470_v2  ;;  %2886 = vmatpush1.bf16.msra.mxu0 %v2659_v4  ;;  %v2515_v14 = vmin.f32 %v5936_v58, 127.0  ;;  %v2132_v17 = vfloor.f32 %v5929_v44  ;;  %vm1750_vm15 = vcmp.lt.f32.partialorder %v5933_v56, 0.0 }
 0x108   : > { %v2347_v18 = vsel %vm1771_vm12, %v1963_v61, %v2155_v62  ;;  %v1942_v19 = vceil.f32 %v5933_v56  ;;  %v2134_v22 = vfloor.f32 %v5933_v56  ;;  %v2349_v23 = vsel %vm1773_vm14, %v1965_v63, %v2157_v46 }
 0x109   : > { %2946 = vmatprep.subr.bf16.mxu1 %v2662_v13  ;;  %v1603_v24 = vmax.f32 %v5917_v33, 0.0  ;;  %v2517_v26 = vmin.f32 %v5947_v10, 127.0  ;;  %v1964_v28 = vceil.f32 %v1580_v6  ;;  %v2156_v29 = vfloor.f32 %v1580_v6 }
 0x10a   : > { %v5938_v5 = vpop.f32.mrb[12].mxu0  ;;  %2947 = vmatpush1.bf16.msra.mxu1 %v2661_v7  ;;  %v1605_v30 = vmax.f32 %v5919_v38, 0.0  ;;  %v2539_v31 = vmin.f32 %v2347_v18, 127.0  ;;  %vm1772_vm1 = vcmp.lt.f32.partialorder %v1580_v6, 0.0  ;;  %vm1774_vm2 = vcmp.lt.f32.partialorder %v1582_v12, 0.0 }
 0x10b   : > { %v5942_v8 = vpop.f32.mrb[12].mxu1  ;;  %v5944_v9 = vpop.f32.mrb[13].mxu0  ;;  %v1627_v32 = vmax.f32 %v689_v47, 0.0  ;;  %v2541_v34 = vmin.f32 %v2349_v23, 127.0  ;;  %v1966_v35 = vceil.f32 %v1582_v12  ;;  %v2158_v36 = vfloor.f32 %v1582_v12 }
 0x10c   : > { %v5951_v15 = vpop.f32.mrb[13].mxu1  ;;  %v5953_v16 = vpop.f32.mrb[14].mxu0  ;;  %v1629_v37 = vmax.f32 %v762_v51, 0.0  ;;  %vm1795_vm3 = vcmp.lt.f32.partialorder %v1603_v24, 0.0  ;;  %v1987_v40 = vceil.f32 %v1603_v24  ;;  %v5972_v33 = vmax.f32 %v5921_v39, 0.0 }
 0x10d   : > { %v5959_v20 = vpop.f32.mrb[14].mxu1  ;;  %v5961_v21 = vpop.f32.mrb[15].mxu0  ;;  %v5975_v41 = vmax.f32 %v5923_v43, 0.0  ;;  %v2179_v48 = vfloor.f32 %v1603_v24  ;;  %vm1797_vm4 = vcmp.lt.f32.partialorder %v1605_v30, 0.0  ;;  %v2324_v38 = vsel %vm1748_vm13, %v1940_v11, %v2132_v17 }
 0x10e   : > { %v5967_v25 = vpop.f32.mrb[15].mxu1  ;;  %v2348_v47 = vsel %vm1772_vm1, %v1964_v28, %v2156_v29  ;;  %v1989_v51 = vceil.f32 %v1605_v30  ;;  %v2181_v53 = vfloor.f32 %v1605_v30  ;;  %vm1819_vm5 = vcmp.lt.f32.partialorder %v1627_v32, 0.0 }
 0x10f   : > { %v2326_v39 = vsel %vm1750_vm15, %v1942_v19, %v2134_v22  ;;  %v2011_v54 = vceil.f32 %v1627_v32  ;;  %v2203_v45 = vfloor.f32 %v1627_v32  ;;  %vm1821_vm6 = vcmp.lt.f32.partialorder %v1629_v37, 0.0 }
 0x110   : > { %v2013_v44 = vceil.f32 %v1629_v37  ;;  %v2205_v59 = vfloor.f32 %v1629_v37  ;;  %v2516_v60 = vmin.f32 %v2324_v38, 127.0  ;;  %v2540_v61 = vmin.f32 %v2348_v47, 127.0 }
 0x111   : > { %v2350_v62 = vsel %vm1774_vm2, %v1966_v35, %v2158_v36  ;;  %v2518_v56 = vmin.f32 %v2326_v39, 127.0  ;;  %v2683_v46 = vpack.c.bf16 %v2539_v31, %v2515_v14  ;;  %v2685_v2 = vpack.c.bf16 %v2541_v34, %v2517_v26 }
 0x112   : > { %v5977_v42 = vpop.f32.mrb[16].mxu0  ;;  %v2542_v1 = vmin.f32 %v2350_v62, 127.0  ;;  %v5999_v3 = vsel %vm1795_vm3, %v1987_v40, %v2179_v48  ;;  %vm1796_vm7 = vcmp.lt.f32.partialorder %v5972_v33, 0.0  ;;  %v1628_v4 = vmax.f32 %v5927_v52, 0.0 }
 0x113   : > { %v5981_v49 = vpop.f32.mrb[16].mxu1  ;;  %v5983_v50 = vpop.f32.mrb[17].mxu0  ;;  %v2684_v6 = vpack.c.bf16 %v2540_v61, %v2516_v60  ;;  %v6004_v7 = vsel %vm1797_vm4, %v1989_v51, %v2181_v53  ;;  %v1988_v10 = vceil.f32 %v5972_v33  ;;  %v6008_v11 = vsel %vm1819_vm5, %v2011_v54, %v2203_v45 }
 0x114   : > { %v5987_v43 = vpop.f32.mrb[17].mxu1  ;;  %v5989_v27 = vpop.f32.mrb[18].mxu0  ;;  %v2686_v12 = vpack.c.bf16 %v2542_v1, %v2518_v56  ;;  %v2180_v13 = vfloor.f32 %v5972_v33  ;;  %vm1798_vm8 = vcmp.lt.f32.partialorder %v5975_v41, 0.0  ;;  %v6013_v14 = vsel %vm1821_vm6, %v2013_v44, %v2205_v59 }
 0x115   : > { %v5991_v57 = vpop.f32.mrb[18].mxu1  ;;  %v5993_v58 = vpop.f32.mrb[19].mxu0  ;;  %v1630_v17 = vmax.f32 %v5931_v55, 0.0  ;;  %2887 = vmatprep.subr.bf16.mxu0 %v2684_v6  ;;  %v2563_v18 = vmin.f32 %v5999_v3, 127.0  ;;  %v1990_v19 = vceil.f32 %v5975_v41  ;;  %v2182_v22 = vfloor.f32 %v5975_v41 }
 0x116   : > { %v5996_v63 = vpop.f32.mrb[19].mxu1  ;;  %2948 = vmatprep.subr.bf16.mxu1 %v2686_v12  ;;  %2888 = vmatpush1.bf16.msra.mxu0 %v2683_v46  ;;  %v6022_v23 = vmax.f32 %v5938_v5, 0.0  ;;  %v2565_v55 = vmin.f32 %v6004_v7, 127.0  ;;  %v2587_v28 = vmin.f32 %v6008_v11, 127.0  ;;  %vm1820_vm9 = vcmp.lt.f32.partialorder %v1628_v4, 0.0 }
 0x117   : > { %2949 = vmatpush1.bf16.msra.mxu1 %v2685_v2  ;;  %v1652_v29 = vmax.f32 %v5944_v9, 0.0  ;;  %v2589_v32 = vmin.f32 %v6013_v14, 127.0  ;;  %v2012_v5 = vceil.f32 %v1628_v4  ;;  %v2204_v34 = vfloor.f32 %v1628_v4 }
 0x118   : > { %v1654_v35 = vmax.f32 %v5951_v15, 0.0  ;;  %vm1822_vm10 = vcmp.lt.f32.partialorder %v1630_v17, 0.0  ;;  %v2014_v40 = vceil.f32 %v1630_v17  ;;  %v2206_v48 = vfloor.f32 %v1630_v17 }
 0x119   : > { %v6042_v38 = vmax.f32 %v5942_v8, 0.0  ;;  %v2035_v47 = vceil.f32 %v6022_v23  ;;  %v6048_v51 = vmax.f32 %v5953_v16, 0.0  ;;  %v6051_v53 = vmax.f32 %v5959_v20, 0.0 }
 0x11a   : > { %v6016_v52 = vpop.f32.mrb[20].mxu0  ;;  %v1676_v15 = vmax.f32 %v5961_v21, 0.0  ;;  %v2227_v39 = vfloor.f32 %v6022_v23  ;;  %vm1844_vm11 = vcmp.lt.f32.partialorder %v1652_v29, 0.0  ;;  %v1678_v54 = vmax.f32 %v5967_v25, 0.0 }
 0x11b   : > { %v6024_v24 = vpop.f32.mrb[20].mxu1  ;;  %v6026_v26 = vpop.f32.mrb[21].mxu0  ;;  %v2372_v8 = vsel %vm1796_vm7, %v1988_v10, %v2180_v13  ;;  %v2036_v45 = vceil.f32 %v1652_v29  ;;  %v2228_v44 = vfloor.f32 %v1652_v29  ;;  %vm1846_vm12 = vcmp.lt.f32.partialorder %v1654_v35, 0.0 }
 0x11c   : > { %v6031_v30 = vpop.f32.mrb[21].mxu1  ;;  %v6033_v31 = vpop.f32.mrb[22].mxu0  ;;  %v2038_v59 = vceil.f32 %v1654_v35  ;;  %vm1843_vm13 = vcmp.lt.f32.partialorder %v6022_v23, 0.0  ;;  %v2060_v16 = vceil.f32 %v1676_v15  ;;  %v2252_v60 = vfloor.f32 %v1676_v15 }
 0x11d   : > { %v6037_v36 = vpop.f32.mrb[22].mxu1  ;;  %v6039_v37 = vpop.f32.mrb[23].mxu0  ;;  %v2062_v20 = vceil.f32 %v1678_v54  ;;  %v2396_v61 = vsel %vm1820_vm9, %v2012_v5, %v2204_v34  ;;  %v2254_v62 = vfloor.f32 %v1678_v54  ;;  %v2564_v56 = vmin.f32 %v2372_v8, 127.0 }
 0x11e   : > { %v6044_v9 = vpop.f32.mrb[23].mxu1  ;;  %v2588_v1 = vmin.f32 %v2396_v61, 127.0  ;;  %v2374_v25 = vsel %vm1798_vm8, %v1990_v19, %v2182_v22  ;;  %v2230_v2 = vfloor.f32 %v1654_v35  ;;  %vm1868_vm14 = vcmp.lt.f32.partialorder %v1676_v15, 0.0 }
 0x11f   : > { %vm1870_vm15 = vcmp.lt.f32.partialorder %v1678_v54, 0.0  ;;  %v2398_v3 = vsel %vm1822_vm10, %v2014_v40, %v2206_v48  ;;  %v2566_v10 = vmin.f32 %v2374_v25, 127.0  ;;  %v2707_v12 = vpack.c.bf16 %v2587_v28, %v2563_v18 }
 0x120   : > { %v2708_v7 = vpack.c.bf16 %v2588_v1, %v2564_v56  ;;  %v2590_v11 = vmin.f32 %v2398_v3, 127.0  ;;  %vm1845_vm1 = vcmp.lt.f32.partialorder %v6042_v38, 0.0  ;;  %v2037_v14 = vceil.f32 %v6042_v38 }
 0x121   : > { %v2420_v19 = vsel %vm1844_vm11, %v2036_v45, %v2228_v44  ;;  %v2709_v17 = vpack.c.bf16 %v2589_v32, %v2565_v55  ;;  %v2444_v5 = vsel %vm1868_vm14, %v2060_v16, %v2252_v60  ;;  %v2446_v34 = vsel %vm1870_vm15, %v2062_v20, %v2254_v62 }
 0x122   : > { %v6060_v21 = vpop.f32.mrb[24].mxu0  ;;  %2889 = vmatprep.subr.bf16.mxu0 %v2708_v7  ;;  %v2710_v40 = vpack.c.bf16 %v2590_v11, %v2566_v10  ;;  %v1511_v18 = vmax.f32 %v5977_v42, 0.0  ;;  %v2229_v28 = vfloor.f32 %v6042_v38  ;;  %v2422_v48 = vsel %vm1846_vm12, %v2038_v59, %v2230_v2 }
 0x123   : > { %v6064_v33 = vpop.f32.mrb[24].mxu1  ;;  %v6066_v46 = vpop.f32.mrb[25].mxu0  ;;  %vm1867_vm2 = vcmp.lt.f32.partialorder %v6048_v51, 0.0  ;;  %2890 = vmatpush1.bf16.msra.mxu0 %v2707_v12  ;;  %v1513_v29 = vmax.f32 %v5981_v49, 0.0  ;;  %v2059_v55 = vceil.f32 %v6048_v51  ;;  %v2251_v32 = vfloor.f32 %v6048_v51 }
 0x124   : > { %v6069_v6 = vpop.f32.mrb[25].mxu1  ;;  %v6071_v4 = vpop.f32.mrb[26].mxu0  ;;  %vm1869_vm3 = vcmp.lt.f32.partialorder %v6051_v53, 0.0  ;;  %v2061_v15 = vceil.f32 %v6051_v53  ;;  %2950 = vmatprep.subr.bf16.mxu1 %v2710_v40  ;;  %v2612_v54 = vmin.f32 %v2420_v19, 127.0  ;;  %v2253_v42 = vfloor.f32 %v6051_v53 }
 0x125   : > { %v6073_v13 = vpop.f32.mrb[26].mxu1  ;;  %v6075_v41 = vpop.f32.mrb[27].mxu0  ;;  %v2636_v8 = vmin.f32 %v2444_v5, 127.0  ;;  %v2638_v35 = vmin.f32 %v2446_v34, 127.0  ;;  %2951 = vmatpush1.bf16.msra.mxu1 %v2709_v17  ;;  %v2614_v44 = vmin.f32 %v2422_v48, 127.0  ;;  %v1895_v59 = vceil.f32 %v1511_v18 }
 0x126   : > { %v6080_v22 = vpop.f32.mrb[27].mxu1  ;;  %v2087_v49 = vfloor.f32 %v1511_v18  ;;  %v6097_v16 = vmax.f32 %v5983_v50, 0.0  ;;  %vm1703_vm4 = vcmp.lt.f32.partialorder %v1511_v18, 0.0  ;;  %v1897_v61 = vceil.f32 %v1513_v29 }
 0x127   : > { %v2089_v62 = vfloor.f32 %v1513_v29  ;;  %v1535_v56 = vmax.f32 %v5989_v27, 0.0  ;;  %v2419_v50 = vsel %vm1843_vm13, %v2035_v47, %v2227_v39  ;;  %v2421_v2 = vsel %vm1845_vm1, %v2037_v14, %v2229_v28 }
 0x128   : > { %v2443_v3 = vsel %vm1867_vm2, %v2059_v55, %v2251_v32  ;;  %vm1705_vm5 = vcmp.lt.f32.partialorder %v1513_v29, 0.0  ;;  %v2445_v10 = vsel %vm1869_vm3, %v2061_v15, %v2253_v42  ;;  %v1537_v11 = vmax.f32 %v5991_v57, 0.0 }
 0x129   : > { %v2732_v12 = vpack.c.bf16 %v2636_v8, %v2612_v54  ;;  %v2734_v19 = vpack.c.bf16 %v2638_v35, %v2614_v44  ;;  %vm2803_vm6 = vcmask 490496   ;;  %v6128_v38 = vsel %vm1703_vm4, %v1895_v59, %v2087_v49  ;;  %v6156_v44 = vld [vmem:[%s8501_s2] sm:$0xff]  }
 0x12a   : > { %v6094_v45 = vpop.f32.mrb[28].mxu0  ;;  %vm1704_vm7 = vcmp.lt.f32.partialorder %v6097_v16, 0.0  ;;  %v1896_v47 = vceil.f32 %v6097_v16  ;;  %v6133_v51 = vmax.f32 %v5987_v43, 0.0  ;;  %v6135_v39 = vsel %vm1705_vm5, %v1897_v61, %v2089_v62 }
 0x12b   : > { %v6099_v60 = vpop.f32.mrb[28].mxu1  ;;  %v6101_v20 = vpop.f32.mrb[29].mxu0  ;;  %v2088_v53 = vfloor.f32 %v6097_v16  ;;  %vm1727_vm8 = vcmp.lt.f32.partialorder %v1535_v56, 0.0  ;;  %v1919_v57 = vceil.f32 %v1535_v56  ;;  %5500 = vmatprep.subr.msk.bf16.mxu0 %vm558_vm0, %v2732_v12  ;;  %5504 = vmatprep.subr.msk.bf16.mxu1 %vm558_vm0, %v2734_v19  ;;  %v2611_v14 = vmin.f32 %v2419_v50, 127.0 }
 0x12c   : > { %v6104_v1 = vpop.f32.mrb[29].mxu1  ;;  %v6106_v25 = vpop.f32.mrb[30].mxu0  ;;  %v2635_v17 = vmin.f32 %v2443_v3, 127.0  ;;  %v2613_v5 = vmin.f32 %v2421_v2, 127.0  ;;  %v2637_v34 = vmin.f32 %v2445_v10, 127.0  ;;  %v2111_v40 = vfloor.f32 %v1535_v56 }
 0x12d   : > { %v6118_v7 = vpop.f32.mrb[30].mxu1  ;;  %v6120_v27 = vpop.f32.mrb[31].mxu0  ;;  %v1921_v18 = vceil.f32 %v1537_v11  ;;  %v2113_v28 = vfloor.f32 %v1537_v11  ;;  %v1536_v43 = vmax.f32 %v5993_v58, 0.0  ;;  %vm1706_vm9 = vcmp.lt.f32.partialorder %v6133_v51, 0.0 }
 0x12e   : > { %v6125_v23 = vpop.f32.mrb[31].mxu1  ;;  %vm1729_vm10 = vcmp.lt.f32.partialorder %v1537_v11, 0.0  ;;  %v2731_v29 = vpack.c.bf16 %v2635_v17, %v2611_v14  ;;  %v2733_v55 = vpack.c.bf16 %v2637_v34, %v2613_v5  ;;  %v1559_v32 = vmax.f32 %v6016_v52, 0.0 }
 0x12f   : > { %v2471_v42 = vmin.f32 %v6128_v38, 127.0  ;;  %v1898_v8 = vceil.f32 %v6133_v51  ;;  %v2090_v35 = vfloor.f32 %v6133_v51  ;;  %v1561_v58 = vmax.f32 %v6024_v24, 0.0 }
 0x130   : > { %v2473_v49 = vmin.f32 %v6135_v39, 127.0  ;;  %v1538_v61 = vmax.f32 %v5996_v63, 0.0  ;;  %v2814_v62 = vsel %vm558_vm0, %v2731_v29, 0  ;;  %v2820_v50 = vsel %vm558_vm0, %v2733_v55, 0 }
 0x131   : > { %v2303_v3 = vsel %vm1727_vm8, %v1919_v57, %v2111_v40  ;;  %v2305_v10 = vsel %vm1729_vm10, %v1921_v18, %v2113_v28  ;;  %v1920_v12 = vceil.f32 %v1536_v43  ;;  %v2112_v19 = vfloor.f32 %v1536_v43  ;;  %2892 = vmatpush1.bf16.msra.mxu0 %v2814_v62  ;;  %2953 = vmatpush1.bf16.msra.mxu1 %v2820_v50 }
 0x132   : > { %v6141_v48 = vpop.f32.mrb[32].mxu0  ;;  %vm1728_vm11 = vcmp.lt.f32.partialorder %v1536_v43, 0.0  ;;  %v1943_v63 = vceil.f32 %v1559_v32  ;;  %v2135_v39 = vfloor.f32 %v1559_v32  ;;  %v6175_v17 = vmax.f32 %v6026_v26, 0.0 }
 0x133   : > { %v6145_v15 = vpop.f32.mrb[32].mxu1  ;;  %v6147_v54 = vpop.f32.mrb[33].mxu0  ;;  %vm1751_vm12 = vcmp.lt.f32.partialorder %v1559_v32, 0.0  ;;  %v1945_v5 = vceil.f32 %v1561_v58  ;;  %v2137_v34 = vfloor.f32 %v1561_v58  ;;  %v1583_v56 = vmax.f32 %v6033_v31, 0.0 }
 0x134   : > { %v6158_v59 = vpop.f32.mrb[33].mxu1  ;;  %v6160_v52 = vpop.f32.mrb[34].mxu0  ;;  %v2495_v57 = vmin.f32 %v2303_v3, 127.0  ;;  %v2497_v11 = vmin.f32 %v2305_v10, 127.0  ;;  %vm1753_vm13 = vcmp.lt.f32.partialorder %v1561_v58, 0.0  ;;  %5501 = vmatmul.mubr.msk.bf16.vlgmr.msra.gmra.mrb[96].mxu0 %vm2803_vm6, %v6156_v44  ;;  %5505 = vmatmul.mubr.msk.bf16.vlgmr.msra.gmra.mrb[96].mxu1 %vm2803_vm6, %v6156_v44  ;;  %v1585_v40 = vmax.f32 %v6037_v36, 0.0 }
 0x135   : > { %v6166_v2 = vpop.f32.mrb[34].mxu1  ;;  %v6168_v24 = vpop.f32.mrb[35].mxu0  ;;  %v1922_v18 = vceil.f32 %v1538_v61  ;;  %v2114_v28 = vfloor.f32 %v1538_v61  ;;  %v2280_v26 = vsel %vm1704_vm7, %v1896_v47, %v2088_v53  ;;  %v2304_v29 = vsel %vm1728_vm11, %v1920_v12, %v2112_v19  ;;  %2927 = vmatprep.mubr.bf16.mxu0 %v8506_v0  ;;  %2988 = vmatprep.mubr.bf16.mxu1 %v8506_v0  ;;  %v6211_v19 = vld [vmem:[%s8501_s2 + $0x8] sm:$0xff]  }
 0x136   : > { %v6172_v14 = vpop.f32.mrb[35].mxu1  ;;  %vm1730_vm14 = vcmp.lt.f32.partialorder %v1538_v61, 0.0  ;;  %v6191_v55 = vsel %vm1751_vm12, %v1943_v63, %v2135_v39  ;;  %v6194_v62 = vmax.f32 %v6031_v30, 0.0  ;;  %v2496_v36 = vmin.f32 %v2304_v29, 127.0 }
 0x137   : > { %v6201_v47 = vsel %vm1753_vm13, %v1945_v5, %v2137_v34  ;;  %vm1752_vm15 = vcmp.lt.f32.partialorder %v6175_v17, 0.0  ;;  %vm1775_vm1 = vcmp.lt.f32.partialorder %v1583_v56, 0.0  ;;  %v2472_v53 = vmin.f32 %v2280_v26, 127.0 }
 0x138   : > { %v1967_v3 = vceil.f32 %v1583_v56  ;;  %v2159_v10 = vfloor.f32 %v1583_v56  ;;  %v1969_v30 = vceil.f32 %v1585_v40  ;;  %v2161_v12 = vfloor.f32 %v1585_v40 }
 0x139   : > { %v2664_v39 = vpack.c.bf16 %v2496_v36, %v2472_v53  ;;  %v2282_v5 = vsel %vm1706_vm9, %v1898_v8, %v2090_v35  ;;  %v2306_v34 = vsel %vm1730_vm14, %v1922_v18, %v2114_v28  ;;  %v2663_v26 = vpack.c.bf16 %v2495_v57, %v2471_v42 }
 0x13a   : > { %v6188_v31 = vpop.f32.mrb[36].mxu0  ;;  %v1584_v0 = vmax.f32 %v6039_v37, 0.0  ;;  %vm1777_vm2 = vcmp.lt.f32.partialorder %v1585_v40, 0.0  ;;  %v1607_v36 = vmax.f32 %v6060_v21, 0.0  ;;  %v1609_v51 = vmax.f32 %v6064_v33, 0.0 }
 0x13b   : > { %v6196_v50 = vpop.f32.mrb[36].mxu1  ;;  %v6198_v16 = vpop.f32.mrb[37].mxu0  ;;  %3007 = vmatprep.subr.bf16.mxu0 %v2664_v39  ;;  %v2136_v38 = vfloor.f32 %v6175_v17  ;;  %vm1754_vm3 = vcmp.lt.f32.partialorder %v6194_v62, 0.0  ;;  %v1946_v35 = vceil.f32 %v6194_v62  ;;  %v1586_v21 = vmax.f32 %v6044_v9, 0.0 }
 0x13c   : > { %8508 = vst [vmem:[#allocation2_spill] sm:$0xff] %v6198_v16  ;;  %v6204_v43 = vpop.f32.mrb[37].mxu1  ;;  %v6206_v32 = vpop.f32.mrb[38].mxu0  ;;  %v2665_v16 = vpack.c.bf16 %v2497_v11, %v2473_v49  ;;  %3008 = vmatpush1.bf16.msra.mxu0 %v2663_v26  ;;  %5506 = vmatmul.mubr.msk.bf16.gmra.mrb[100].mxu1 %vm2803_vm6, %v6211_v19  ;;  %v2351_v49 = vsel %vm1775_vm1, %v1967_v3, %v2159_v10  ;;  %v8512_v33 = vmov 0   ;;  %vm1776_vm4 = vcmp.lt.f32.partialorder %v1584_v0, 0.0 }
 0x13d   : > { %8509 = vst [vmem:[#allocation3_spill] sm:$0xff] %v6204_v43  ;;  %8510 = vst [vmem:[#allocation4_spill] sm:$0xff] %v6206_v32  ;;  %v6213_v58 = vpop.f32.mrb[38].mxu1  ;;  %v6215_v63 = vpop.f32.mrb[39].mxu0  ;;  %v2474_v43 = vmin.f32 %v2282_v5, 127.0  ;;  %v2498_v32 = vmin.f32 %v2306_v34, 127.0  ;;  %5502 = vmatmul.mubr.msk.bf16.gmra.mrb[100].mxu0 %vm2803_vm6, %v6211_v19  ;;  %2998 = vmatprep.mubr.bf16.mxu1 %v8512_v33  ;;  %v2353_v57 = vsel %vm1777_vm2, %v1969_v30, %v2161_v12  ;;  %v1968_v11 = vceil.f32 %v1584_v0 }
 0x13e   : > { %8511 = vst [vmem:[#allocation5_spill] sm:$0xff] %v6213_v58  ;;  %v6222_v29 = vpop.f32.mrb[39].mxu1  ;;  %v1944_v58 = vceil.f32 %v6175_v17  ;;  %v2160_v18 = vfloor.f32 %v1584_v0  ;;  %2937 = vmatprep.mubr.bf16.mxu0 %v8512_v33  ;;  %v1991_v9 = vceil.f32 %v1607_v36  ;;  %v2183_v53 = vfloor.f32 %v1607_v36  ;;  %v6251_v40 = vld [vmem:[%s8501_s2 + $0x10] ss:$0 sps:$4 sm:$0x11]  }
 0x13f   : > { %v2666_v42 = vpack.c.bf16 %v2498_v32, %v2474_v43  ;;  %v1993_v43 = vceil.f32 %v1609_v51  ;;  %v2185_v32 = vfloor.f32 %v1609_v51  ;;  %v2138_v30 = vfloor.f32 %v6194_v62 }
 0x140   : > { %vm1799_vm5 = vcmp.lt.f32.partialorder %v1607_v36, 0.0  ;;  %vm1801_vm7 = vcmp.lt.f32.partialorder %v1609_v51, 0.0  ;;  %v1631_v12 = vmax.f32 %v6071_v4, 0.0  ;;  %v2543_v5 = vmin.f32 %v2351_v49, 127.0 }
 0x141   : > { %3068 = vmatprep.subr.bf16.mxu1 %v2666_v42  ;;  %v2545_v34 = vmin.f32 %v2353_v57, 127.0  ;;  %v1970_v26 = vceil.f32 %v1586_v21  ;;  %v1633_v42 = vmax.f32 %v6073_v13, 0.0  ;;  %v2162_v8 = vfloor.f32 %v1586_v21 }
 0x142   : > { %v6240_v61 = vpop.f32.mrb[40].mxu0  ;;  %3069 = vmatpush1.bf16.msra.mxu1 %v2665_v16  ;;  %v2328_v36 = vsel %vm1752_vm15, %v1944_v58, %v2136_v38  ;;  %v2352_v4 = vsel %vm1776_vm4, %v1968_v11, %v2160_v18  ;;  %vm1778_vm8 = vcmp.lt.f32.partialorder %v1586_v21, 0.0  ;;  %v6272_v51 = vsel %vm1799_vm5, %v1991_v9, %v2183_v53 }
 0x143   : > { %v6244_v28 = vpop.f32.mrb[40].mxu1  ;;  %v6246_v56 = vpop.f32.mrb[41].mxu0  ;;  %v6277_v49 = vmax.f32 %v6069_v6, 0.0  ;;  %vm1823_vm9 = vcmp.lt.f32.partialorder %v1631_v12, 0.0  ;;  %v2015_v13 = vceil.f32 %v1631_v12  ;;  %v2207_v57 = vfloor.f32 %v1631_v12  ;;  %v2760_v12 = vld [vmem:[%s8502_s3] sm:$0xff] }
 0x144   : > { %v6253_v3 = vpop.f32.mrb[41].mxu1  ;;  %v6255_v10 = vpop.f32.mrb[42].mxu0  ;;  %5507 = vmatmul.mubr.msk.bf16.gmra.mrb[104].mxu1 %vm2803_vm6, %v6251_v40  ;;  %vm1825_vm10 = vcmp.lt.f32.partialorder %v1633_v42, 0.0  ;;  %v6284_v0 = vmax.f32 %v6075_v41, 0.0  ;;  %v2520_v17 = vmin.f32 %v2328_v36, 127.0  ;;  %v2544_v58 = vmin.f32 %v2352_v4, 127.0  ;;  %2767 = vperm.xlu0 %5587, %v2760_v12  }
 0x145   : > { %8513 = vst [vmem:[#allocation6_spill] sm:$0xff] %v6253_v3  ;;  %v6259_v16 = vpop.f32.mrb[42].mxu1  ;;  %v6261_v39 = vpop.f32.mrb[43].mxu0  ;;  %v6267_v3 = vmax.f32 %v6066_v46, 0.0  ;;  %v2330_v46 = vsel %vm1754_vm3, %v1946_v35, %v2138_v30  ;;  %5503 = vmatmul.mubr.msk.bf16.gmra.mrb[104].mxu0 %vm2803_vm6, %v6251_v40  ;;  %3100 = vmatprep.mubr.bf16.mxu1 %v8512_v33  ;;  %v2017_v62 = vceil.f32 %v1633_v42  ;;  %v2209_v38 = vfloor.f32 %v1633_v42 }
 0x146   : > { %8514 = vst [vmem:[#allocation7_spill] sm:$0xff] %v6261_v39  ;;  %v6264_v37 = vpop.f32.mrb[43].mxu1  ;;  %v6274_v39 = vsel %vm1801_vm7, %v1993_v43, %v2185_v32  ;;  %v2354_v35 = vsel %vm1778_vm8, %v1970_v26, %v2162_v8  ;;  %v8517_v11 = vmin.f32 %v6191_v55, 127.0  ;;  %3039 = vmatprep.mubr.bf16.mxu0 %v8512_v33  ;;  %v2688_v53 = vpack.c.bf16 %v2544_v58, %v2520_v17 }
 0x147   : > { %8515 = vst [vmem:[#allocation8_spill] sm:$0xff] %v6264_v37  ;;  %vm1800_vm11 = vcmp.lt.f32.partialorder %v6267_v3, 0.0  ;;  %v2522_v43 = vmin.f32 %v2330_v46, 127.0  ;;  %v2546_v32 = vmin.f32 %v2354_v35, 127.0  ;;  %v8520_v30 = vmin.f32 %v6201_v47, 127.0 }
 0x148   : > { %v2687_v18 = vpack.c.bf16 %v2543_v5, %v8517_v11  ;;  %v1992_v8 = vceil.f32 %v6267_v3  ;;  %v2184_v55 = vfloor.f32 %v6267_v3  ;;  %v6309_v21 = vsel %vm1823_vm9, %v2015_v13, %v2207_v57  ;;  %3009 = vmatprep.subr.bf16.mxu0 %v2688_v53 }
 0x149   : > { %v2689_v36 = vpack.c.bf16 %v2545_v34, %v8520_v30  ;;  %v6312_v5 = vmax.f32 %v6080_v22, 0.0  ;;  %vm1802_vm12 = vcmp.lt.f32.partialorder %v6277_v49, 0.0  ;;  %v1994_v34 = vceil.f32 %v6277_v49 }
 0x14a   : > { %v6289_v6 = vpop.f32.mrb[44].mxu0  ;;  %v2690_v17 = vpack.c.bf16 %v2546_v32, %v2522_v43  ;;  %v2186_v13 = vfloor.f32 %v6277_v49  ;;  %v2401_v57 = vsel %vm1825_vm10, %v2017_v62, %v2209_v38  ;;  %3010 = vmatpush1.bf16.msra.mxu0 %v2687_v18  ;;  %v6330_v35 = vmax.f32 %v6094_v45, 0.0 }
 0x14b   : > { %8516 = vst [vmem:[#allocation9_spill] sm:$0xff] %v6289_v6  ;;  %v6296_v41 = vpop.f32.mrb[44].mxu1  ;;  %v6298_v9 = vpop.f32.mrb[45].mxu0  ;;  %v2591_v11 = vmin.f32 %v6309_v21, 127.0  ;;  %vm1824_vm13 = vcmp.lt.f32.partialorder %v6284_v0, 0.0  ;;  %v2016_v53 = vceil.f32 %v6284_v0  ;;  %v6336_v43 = vmax.f32 %v6099_v60, 0.0 }
 0x14c   : > { %8518 = vst [vmem:[#allocation10_spill] sm:$0xff] %v6296_v41  ;;  %8519 = vst [vmem:[#allocation11_spill] sm:$0xff] %v6298_v9  ;;  %v6302_v4 = vpop.f32.mrb[45].mxu1  ;;  %v6304_v6 = vpop.f32.mrb[46].mxu0  ;;  %3070 = vmatprep.subr.bf16.mxu1 %v2690_v17  ;;  %v2208_v32 = vfloor.f32 %v6284_v0  ;;  %vm1826_vm14 = vcmp.lt.f32.partialorder %v6312_v5, 0.0  ;;  %v2018_v42 = vceil.f32 %v6312_v5  ;;  %v1656_v45 = vmax.f32 %v6101_v20, 0.0 }
 0x14d   : > { %8521 = vst [vmem:[#allocation12_spill] sm:$0xff] %v6302_v4  ;;  %8522 = vst [vmem:[#allocation13_spill] sm:$0xff] %v6304_v6  ;;  %v6314_v26 = vpop.f32.mrb[46].mxu1  ;;  %v6316_v46 = vpop.f32.mrb[47].mxu0  ;;  %3071 = vmatpush1.bf16.msra.mxu1 %v2689_v36  ;;  %v2593_v62 = vmin.f32 %v2401_v57, 127.0  ;;  %v2210_v38 = vfloor.f32 %v6312_v5  ;;  %v1658_v18 = vmax.f32 %v6104_v1, 0.0  ;;  %v2231_v57 = vfloor.f32 %v6330_v35 }
 0x14e   : > { %8523 = vst [vmem:[#allocation14_spill] sm:$0xff] %v6314_v26  ;;  %8524 = vst [vmem:[#allocation15_spill] sm:$0xff] %v6316_v46  ;;  %v6321_v58 = vpop.f32.mrb[47].mxu1  ;;  %v6345_v30 = vmax.f32 %v6106_v25, 0.0  ;;  %vm1847_vm15 = vcmp.lt.f32.partialorder %v6330_v35, 0.0  ;;  %v1680_v17 = vmax.f32 %v6120_v27, 0.0  ;;  %v2041_v1 = vceil.f32 %v6336_v43 }
 0x14f   : > { %8525 = vst [vmem:[#allocation16_spill] sm:$0xff] %v6321_v58  ;;  %v1682_v36 = vmax.f32 %v6125_v23, 0.0  ;;  %vm1849_vm1 = vcmp.lt.f32.partialorder %v6336_v43, 0.0  ;;  %v2233_v25 = vfloor.f32 %v6336_v43  ;;  %v2762_v27 = vld [vmem:[%s8502_s3 + $0x10] sm:$0xff]  ;;  %v2761_v23 = vld [vmem:[%s8502_s3 + $0x8] sm:$0xff]  ;;  %vm1848_vm2 = vcmp.lt.f32.partialorder %v1656_v45, 0.0 }
 0x150   : > { %v2040_v60 = vceil.f32 %v1656_v45  ;;  %2777 = vperm.xlu1 %5588, %v2762_v27   ;;  %2772 = vperm.xlu0 %5587, %v2761_v23   ;;  %vm1850_vm3 = vcmp.lt.f32.partialorder %v1658_v18, 0.0  ;;  %vm1872_vm4 = vcmp.lt.f32.partialorder %v1680_v17, 0.0  ;;  %v2042_v26 = vceil.f32 %v1658_v18 }
 0x151   : > { %v2066_v6 = vceil.f32 %v1682_v36  ;;  %v2258_v4 = vfloor.f32 %v1682_v36  ;;  %v2400_v9 = vsel %vm1824_vm13, %v2016_v53, %v2208_v32  ;;  %vm1874_vm5 = vcmp.lt.f32.partialorder %v1682_v36, 0.0 }
 0x152   : > { %v6347_v21 = vpop.f32.mrb[48].mxu0  ;;  %v2592_v41 = vmin.f32 %v2400_v9, 127.0  ;;  %v2378_v27 = vsel %vm1802_vm12, %v1994_v34, %v2186_v13  ;;  %v2234_v23 = vfloor.f32 %v1658_v18  ;;  %v2402_v3 = vsel %vm1826_vm14, %v2018_v42, %v2210_v38 }
 0x153   : > { %8526 = vst [vmem:[#allocation17_spill] sm:$0xff] %v6347_v21  ;;  %v6353_v12 = vpop.f32.mrb[48].mxu1  ;;  %v6355_v20 = vpop.f32.mrb[49].mxu0  ;;  %v2594_v37 = vmin.f32 %v2402_v3, 127.0  ;;  %v8535_v0 = vmin.f32 %v6274_v39, 127.0  ;;  %v2063_v9 = vceil.f32 %v6345_v30  ;;  %v2255_v49 = vfloor.f32 %v6345_v30 }
 0x154   : > { %8527 = vst [vmem:[#allocation18_spill] sm:$0xff] %v6353_v12  ;;  %8528 = vst [vmem:[#allocation19_spill] sm:$0xff] %v6355_v20  ;;  %v6361_v22 = vpop.f32.mrb[49].mxu1  ;;  %v6363_v47 = vpop.f32.mrb[50].mxu0  ;;  %v2064_v20 = vceil.f32 %v1680_v17  ;;  %v2256_v12 = vfloor.f32 %v1680_v17  ;;  %v2450_v5 = vsel %vm1874_vm5, %v2066_v6, %v2258_v4  ;;  %vm1871_vm7 = vcmp.lt.f32.partialorder %v6345_v30, 0.0 }
 0x155   : > { %8529 = vst [vmem:[#allocation20_spill] sm:$0xff] %v6361_v22  ;;  %8530 = vst [vmem:[#allocation21_spill] sm:$0xff] %v6363_v47  ;;  %v6371_v21 = vpop.f32.mrb[50].mxu1  ;;  %v6373_v58 = vpop.f32.mrb[51].mxu0  ;;  %v2232_v22 = vfloor.f32 %v1656_v45  ;;  %v2376_v47 = vsel %vm1800_vm11, %v1992_v8, %v2184_v55  ;;  %v8534_v8 = vmin.f32 %v6272_v51, 127.0  ;;  %v2713_v53 = vpack.c.bf16 %v2593_v62, %v8535_v0 }
 0x156   : > { %8531 = vst [vmem:[#allocation22_spill] sm:$0xff] %v6371_v21  ;;  %8532 = vst [vmem:[#allocation23_spill] sm:$0xff] %v6373_v58  ;;  %v6377_v46 = vpop.f32.mrb[51].mxu1  ;;  %v2568_v21 = vmin.f32 %v2376_v47, 127.0  ;;  %v2448_v58 = vsel %vm1872_vm4, %v2064_v20, %v2256_v12  ;;  %v1681_v47 = vmax.f32 %v6118_v7, 0.0  ;;  %v2763_v7 = vld [vmem:[%s8502_s3 + $0x18] sm:$0xff]  ;;  %v2426_v6 = vsel %vm1850_vm3, %v2042_v26, %v2234_v23 }
 0x157   : > { %8533 = vst [vmem:[#allocation24_spill] sm:$0xff] %v6377_v46  ;;  %v2711_v55 = vpack.c.bf16 %v2591_v11, %v8534_v8  ;;  %v2570_v46 = vmin.f32 %v2378_v27, 127.0  ;;  %v2640_v4 = vmin.f32 %v2448_v58, 127.0  ;;  %v1515_v42 = vmax.f32 %v6141_v48, 0.0  ;;  %2782 = vperm.xlu1 %5588, %v2763_v7  }
 0x158   : > { %v2712_v17 = vpack.c.bf16 %v2592_v41, %v2568_v21  ;;  %v2424_v41 = vsel %vm1848_vm2, %v2040_v60, %v2232_v22  ;;  %v2425_v62 = vsel %vm1849_vm1, %v2041_v1, %v2233_v25  ;;  %v2642_v38 = vmin.f32 %v2450_v5, 127.0 }
 0x159   : > { %v2714_v39 = vpack.c.bf16 %v2594_v37, %v2570_v46  ;;  %v8536_v37 = vceil.f32 %v6330_v35  ;;  %v1517_v26 = vmax.f32 %v6145_v15, 0.0  ;;  %v2616_v48 = vmin.f32 %v2424_v41, 127.0  ;;  %v2764_v15 = vld [vmem:[%s8502_s3 + $0x20] sm:$0x1] }
 0x15a   : > { %v6389_v32 = vpop.f32.mrb[52].mxu0  ;;  %3011 = vmatprep.subr.bf16.mxu0 %v2712_v17  ;;  %v2447_v18 = vsel %vm1871_vm7, %v2063_v9, %v2255_v49  ;;  %v2065_v21 = vceil.f32 %v1681_v47  ;;  %v2257_v60 = vfloor.f32 %v1681_v47  ;;  %v2618_v36 = vmin.f32 %v2426_v6, 127.0  ;;  %2787 = vperm.xlu0 %5587, %v2764_v15  }
 0x15b   : > { %v6395_v34 = vpop.f32.mrb[52].mxu1  ;;  %v6397_v51 = vpop.f32.mrb[53].mxu0  ;;  %3012 = vmatpush1.bf16.msra.mxu0 %v2711_v55  ;;  %v2423_v46 = vsel %vm1847_vm15, %v8536_v37, %v2231_v57  ;;  %3072 = vmatprep.subr.bf16.mxu1 %v2714_v39  ;;  %vm1873_vm8 = vcmp.lt.f32.partialorder %v1681_v47, 0.0  ;;  %v6426_v35 = vmax.f32 %v6147_v54, 0.0  ;;  %v1539_v43 = vmax.f32 %v6160_v52, 0.0 }
 0x15c   : > { %v6401_v13 = vpop.f32.mrb[53].mxu1  ;;  %v6403_v11 = vpop.f32.mrb[54].mxu0  ;;  %3073 = vmatpush1.bf16.msra.mxu1 %v2713_v53  ;;  %vm1707_vm9 = vcmp.lt.f32.partialorder %v1515_v42, 0.0  ;;  %v1899_v12 = vceil.f32 %v1515_v42  ;;  %v2091_v20 = vfloor.f32 %v1515_v42  ;;  %v2736_v57 = vpack.c.bf16 %v2640_v4, %v2616_v48 }
 0x15d   : > { %v6410_v45 = vpop.f32.mrb[54].mxu1  ;;  %v6412_v22 = vpop.f32.mrb[55].mxu0  ;;  %v1901_v30 = vceil.f32 %v1517_v26  ;;  %v2093_v1 = vfloor.f32 %v1517_v26  ;;  %v2738_v25 = vpack.c.bf16 %v2642_v38, %v2618_v36  ;;  %v2639_v27 = vmin.f32 %v2447_v18, 127.0 }
 0x15e   : > { %v6421_v58 = vpop.f32.mrb[55].mxu1  ;;  %v2449_v3 = vsel %vm1873_vm8, %v2065_v21, %v2257_v60  ;;  %vm1709_vm10 = vcmp.lt.f32.partialorder %v1517_v26, 0.0  ;;  %v6435_v54 = vmax.f32 %v6158_v59, 0.0  ;;  %5508 = vmatprep.subr.msk.bf16.mxu0 %vm558_vm0, %v2736_v57  ;;  %v2615_v52 = vmin.f32 %v2423_v46, 127.0 }
 0x15f   : > { %vm1708_vm11 = vcmp.lt.f32.partialorder %v6426_v35, 0.0  ;;  %v1541_v17 = vmax.f32 %v6166_v2, 0.0  ;;  %5512 = vmatprep.subr.msk.bf16.mxu1 %vm558_vm0, %v2738_v25  ;;  %v6450_v59 = vsel %vm1707_vm9, %v1899_v12, %v2091_v20  ;;  %v1900_v9 = vceil.f32 %v6426_v35 }
 0x160   : > { %v2092_v49 = vfloor.f32 %v6426_v35  ;;  %v2735_v47 = vpack.c.bf16 %v2639_v27, %v2615_v52  ;;  %v6459_v2 = vsel %vm1709_vm10, %v1901_v30, %v2093_v1  ;;  %vm1731_vm12 = vcmp.lt.f32.partialorder %v1539_v43, 0.0 }
 0x161   : > { %v2617_v39 = vmin.f32 %v2425_v62, 127.0  ;;  %v2641_v7 = vmin.f32 %v2449_v3, 127.0  ;;  %vm1710_vm13 = vcmp.lt.f32.partialorder %v6435_v54, 0.0  ;;  %v1923_v4 = vceil.f32 %v1539_v43  ;;  %v8537_v3 = vld [vmem:[#allocation2_spill] sm:$0xff] }
 0x162   : > { %v6432_v23 = vpop.f32.mrb[56].mxu0  ;;  %v2115_v42 = vfloor.f32 %v1539_v43  ;;  %v1540_v37 = vmax.f32 %v6168_v24, 0.0  ;;  %v2826_v46 = vsel %vm558_vm0, %v2735_v47, 0  ;;  %v1925_v38 = vceil.f32 %v1541_v17 }
 0x163   : > { %v6438_v8 = vpop.f32.mrb[56].mxu1  ;;  %v6440_v55 = vpop.f32.mrb[57].mxu0  ;;  %v2117_v48 = vfloor.f32 %v1541_v17  ;;  %3014 = vmatpush1.bf16.msra.mxu0 %v2826_v46  ;;  %v2737_v18 = vpack.c.bf16 %v2641_v7, %v2617_v39  ;;  %v1563_v26 = vmax.f32 %v6188_v31, 0.0  ;;  %v2475_v21 = vmin.f32 %v6450_v59, 127.0 }
 0x164   : > { %v6445_v0 = vpop.f32.mrb[57].mxu1  ;;  %v6447_v53 = vpop.f32.mrb[58].mxu0  ;;  %v1902_v62 = vceil.f32 %v6435_v54  ;;  %vm1733_vm14 = vcmp.lt.f32.partialorder %v1541_v17, 0.0  ;;  %v1565_v60 = vmax.f32 %v6196_v50, 0.0  ;;  %v2477_v36 = vmin.f32 %v6459_v2, 127.0  ;;  %v8538_v2 = vld [vmem:[#allocation4_spill] sm:$0xff] }
 0x165   : > { %v6454_v5 = vpop.f32.mrb[58].mxu1  ;;  %v6456_v41 = vpop.f32.mrb[59].mxu0  ;;  %v2094_v15 = vfloor.f32 %v6435_v54  ;;  %v1542_v24 = vmax.f32 %v6172_v14, 0.0  ;;  %v2832_v12 = vsel %vm558_vm0, %v2737_v18, 0  ;;  %v2307_v57 = vsel %vm1731_vm12, %v1923_v4, %v2115_v42 }
 0x166   : > { %v6461_v6 = vpop.f32.mrb[59].mxu1  ;;  %vm1732_vm15 = vcmp.lt.f32.partialorder %v1540_v37, 0.0  ;;  %v1924_v31 = vceil.f32 %v1540_v37  ;;  %v2116_v30 = vfloor.f32 %v1540_v37  ;;  %3075 = vmatpush1.bf16.msra.mxu1 %v2832_v12  ;;  %5509 = vmatmul.mubr.msk.bf16.vlgmr.msra.gmra.mrb[108].mxu0 %vm2803_vm6, %v6156_v44  ;;  %v2309_v25 = vsel %vm1733_vm14, %v1925_v38, %v2117_v48 }
 0x167   : > { %v1947_v27 = vceil.f32 %v1563_v26  ;;  %v2139_v14 = vfloor.f32 %v1563_v26  ;;  %v6484_v52 = vmax.f32 %v8537_v3, 0.0  ;;  %3049 = vmatprep.mubr.bf16.mxu0 %v8512_v33  ;;  %vm1755_vm1 = vcmp.lt.f32.partialorder %v1563_v26, 0.0 }
 0x168   : > { %v1949_v59 = vceil.f32 %v1565_v60  ;;  %v2141_v47 = vfloor.f32 %v1565_v60  ;;  %v6492_v39 = vmax.f32 %v8538_v2, 0.0  ;;  %v2499_v42 = vmin.f32 %v2307_v57, 127.0 }
 0x169   : > { %v1926_v46 = vceil.f32 %v1542_v24  ;;  %v2118_v38 = vfloor.f32 %v1542_v24  ;;  %vm1757_vm2 = vcmp.lt.f32.partialorder %v1565_v60, 0.0  ;;  %5513 = vmatmul.mubr.msk.bf16.vlgmr.msra.gmra.mrb[108].mxu1 %vm2803_vm6, %v6156_v44  ;;  %v2501_v18 = vmin.f32 %v2309_v25, 127.0  ;;  %v8542_v60 = vld [vmem:[#allocation3_spill] sm:$0xff]  ;;  %v8543_v44 = vld [vmem:[#allocation5_spill] sm:$0xff] }
 0x16a   : > { %v6474_v20 = vpop.f32.mrb[60].mxu0  ;;  %vm1734_vm3 = vcmp.lt.f32.partialorder %v1542_v24, 0.0  ;;  %v2284_v12 = vsel %vm1708_vm11, %v1900_v9, %v2092_v49  ;;  %v2308_v3 = vsel %vm1732_vm15, %v1924_v31, %v2116_v30  ;;  %3110 = vmatprep.mubr.bf16.mxu1 %v8512_v33  ;;  %v6507_v2 = vsel %vm1755_vm1, %v1947_v27, %v2139_v14 }
 0x16b   : > { %v6479_v50 = vpop.f32.mrb[60].mxu1  ;;  %v6481_v1 = vpop.f32.mrb[61].mxu0  ;;  %v1948_v57 = vceil.f32 %v6484_v52  ;;  %vm1756_vm4 = vcmp.lt.f32.partialorder %v6484_v52, 0.0  ;;  %v1971_v35 = vceil.f32 %v6492_v39  ;;  %v6519_v9 = vmax.f32 %v6215_v63, 0.0 }
 0x16c   : > { %v6487_v43 = vpop.f32.mrb[61].mxu1  ;;  %v6489_v17 = vpop.f32.mrb[62].mxu0  ;;  %v6522_v49 = vmax.f32 %v6222_v29, 0.0  ;;  %v2476_v37 = vmin.f32 %v2284_v12, 127.0  ;;  %v2500_v26 = vmin.f32 %v2308_v3, 127.0  ;;  %v2286_v31 = vsel %vm1710_vm13, %v1902_v62, %v2094_v15 }
 0x16d   : > { %v6494_v7 = vpop.f32.mrb[62].mxu1  ;;  %v6496_v4 = vpop.f32.mrb[63].mxu0  ;;  %v2310_v30 = vsel %vm1734_vm3, %v1926_v46, %v2118_v38  ;;  %v2478_v27 = vmin.f32 %v2286_v31, 127.0  ;;  %v2163_v12 = vfloor.f32 %v6492_v39  ;;  %vm1779_vm5 = vcmp.lt.f32.partialorder %v6492_v39, 0.0 }
 0x16e   : > { %8539 = vst [vmem:[#allocation2_spill] sm:$0xff] %v6494_v7  ;;  %8540 = vst [vmem:[#allocation4_spill] sm:$0xff] %v6496_v4  ;;  %v6500_v48 = vpop.f32.mrb[63].mxu1  ;;  %v6511_v7 = vmax.f32 %v8542_v60, 0.0  ;;  %v1589_v4 = vmax.f32 %v8543_v44, 0.0  ;;  %v2502_v14 = vmin.f32 %v2310_v30, 127.0  ;;  %5510 = vmatmul.mubr.msk.bf16.gmra.mrb[112].mxu0 %vm2803_vm6, %v6211_v19  ;;  %v2668_v62 = vpack.c.bf16 %v2500_v26, %v2476_v37 }
 0x16f   : > { %8541 = vst [vmem:[#allocation25_spill] sm:$0xff] %v6500_v48  ;;  %v6514_v48 = vsel %vm1757_vm2, %v1949_v59, %v2141_v47  ;;  %v2667_v59 = vpack.c.bf16 %v2499_v42, %v2475_v21  ;;  %v2669_v47 = vpack.c.bf16 %v2501_v18, %v2477_v36  ;;  %3059 = vmatprep.mubr.bf16.mxu0 %v8512_v33  ;;  %v1611_v36 = vmax.f32 %v6240_v61, 0.0 }
 0x170   : > { %v1973_v3 = vceil.f32 %v1589_v4  ;;  %v2165_v54 = vfloor.f32 %v1589_v4  ;;  %vm1781_vm7 = vcmp.lt.f32.partialorder %v1589_v4, 0.0  ;;  %v2670_v21 = vpack.c.bf16 %v2502_v14, %v2478_v27  ;;  %3129 = vmatprep.subr.bf16.mxu0 %v2668_v62 }
 0x171   : > { %v2523_v38 = vmin.f32 %v6507_v2, 127.0  ;;  %v2140_v18 = vfloor.f32 %v6484_v52  ;;  %vm1758_vm8 = vcmp.lt.f32.partialorder %v6511_v7, 0.0  ;;  %v1950_v60 = vceil.f32 %v6511_v7  ;;  %5514 = vmatmul.mubr.msk.bf16.gmra.mrb[112].mxu1 %vm2803_vm6, %v6211_v19  ;;  %3130 = vmatpush1.bf16.msra.mxu0 %v2667_v59 }
 0x172   : > { %v6527_v25 = vpop.f32.mrb[64].mxu0  ;;  %v2525_v61 = vmin.f32 %v6514_v48, 127.0  ;;  %v2142_v37 = vfloor.f32 %v6511_v7  ;;  %vm1780_vm9 = vcmp.lt.f32.partialorder %v6519_v9, 0.0  ;;  %v1972_v2 = vceil.f32 %v6519_v9  ;;  %3190 = vmatprep.subr.bf16.mxu1 %v2670_v21  ;;  %3120 = vmatprep.mubr.bf16.mxu1 %v8512_v33 }
 0x173   : > { %v6531_v63 = vpop.f32.mrb[64].mxu1  ;;  %v6533_v29 = vpop.f32.mrb[65].mxu0  ;;  %v2355_v26 = vsel %vm1779_vm5, %v1971_v35, %v2163_v12  ;;  %v2357_v31 = vsel %vm1781_vm7, %v1973_v3, %v2165_v54  ;;  %v2164_v30 = vfloor.f32 %v6519_v9  ;;  %3191 = vmatpush1.bf16.msra.mxu1 %v2669_v47  ;;  %v1613_v19 = vmax.f32 %v6244_v28, 0.0  ;;  %v8550_v3 = vld [vmem:[#allocation6_spill] sm:$0xff] }
 0x174   : > { %v6537_v15 = vpop.f32.mrb[65].mxu1  ;;  %v6539_v24 = vpop.f32.mrb[66].mxu0  ;;  %vm1782_vm10 = vcmp.lt.f32.partialorder %v6522_v49, 0.0  ;;  %v1995_v48 = vceil.f32 %v1611_v36  ;;  %v2187_v27 = vfloor.f32 %v1611_v36  ;;  %v1635_v14 = vmax.f32 %v6255_v10, 0.0 }
 0x175   : > { %8544 = vst [vmem:[#allocation3_spill] sm:$0xff] %v6537_v15  ;;  %8545 = vst [vmem:[#allocation5_spill] sm:$0xff] %v6539_v24  ;;  %v6543_v42 = vpop.f32.mrb[66].mxu1  ;;  %v6545_v46 = vpop.f32.mrb[67].mxu0  ;;  %v1974_v59 = vceil.f32 %v6522_v49  ;;  %vm1803_vm11 = vcmp.lt.f32.partialorder %v1611_v36, 0.0  ;;  %v6569_v39 = vmax.f32 %v6246_v56, 0.0  ;;  %v2166_v12 = vfloor.f32 %v6522_v49 }
 0x176   : > { %8546 = vst [vmem:[#allocation26_spill] sm:$0xff] %v6543_v42  ;;  %8547 = vst [vmem:[#allocation27_spill] sm:$0xff] %v6545_v46  ;;  %v6553_v44 = vpop.f32.mrb[67].mxu1  ;;  %v1637_v4 = vmax.f32 %v6259_v16, 0.0  ;;  %v2547_v47 = vmin.f32 %v2355_v26, 127.0  ;;  %v2549_v28 = vmin.f32 %v2357_v31, 127.0  ;;  %5511 = vmatmul.mubr.msk.bf16.gmra.mrb[116].mxu0 %vm2803_vm6, %v6251_v40  ;;  %v1997_v56 = vceil.f32 %v1613_v19 }
 0x177   : > { %8548 = vst [vmem:[#allocation28_spill] sm:$0xff] %v6553_v44  ;;  %v6576_v54 = vmax.f32 %v8550_v3, 0.0  ;;  %vm1805_vm12 = vcmp.lt.f32.partialorder %v1613_v19, 0.0  ;;  %v2332_v16 = vsel %vm1756_vm4, %v1948_v57, %v2140_v18  ;;  %v2356_v21 = vsel %vm1780_vm9, %v1972_v2, %v2164_v30  ;;  %3161 = vmatprep.mubr.bf16.mxu0 %v8512_v33  ;;  %v8559_v49 = vld [vmem:[#allocation8_spill] sm:$0xff] }
 0x178   : > { %v6596_v3 = vsel %vm1803_vm11, %v1995_v48, %v2187_v27  ;;  %vm1827_vm13 = vcmp.lt.f32.partialorder %v1635_v14, 0.0  ;;  %vm1804_vm14 = vcmp.lt.f32.partialorder %v6569_v39, 0.0  ;;  %v2019_v57 = vceil.f32 %v1635_v14 }
 0x179   : > { %v2211_v9 = vfloor.f32 %v1635_v14  ;;  %vm1829_vm15 = vcmp.lt.f32.partialorder %v1637_v4, 0.0  ;;  %v2021_v18 = vceil.f32 %v1637_v4  ;;  %5515 = vmatmul.mubr.msk.bf16.gmra.mrb[116].mxu1 %vm2803_vm6, %v6251_v40  ;;  %v2213_v2 = vfloor.f32 %v1637_v4  ;;  %v8558_v40 = vld [vmem:[#allocation7_spill] sm:$0xff] }
 0x17a   : > { %v6572_v35 = vpop.f32.mrb[68].mxu0  ;;  %v2524_v30 = vmin.f32 %v2332_v16, 127.0  ;;  %v2548_v48 = vmin.f32 %v2356_v21, 127.0  ;;  %v2358_v7 = vsel %vm1782_vm10, %v1974_v59, %v2166_v12  ;;  %3222 = vmatprep.mubr.bf16.mxu1 %v8512_v33  ;;  %v2691_v27 = vpack.c.bf16 %v2547_v47, %v2523_v38 }
 0x17b   : > { %8549 = vst [vmem:[#allocation29_spill] sm:$0xff] %v6572_v35  ;;  %v6580_v10 = vpop.f32.mrb[68].mxu1  ;;  %v6582_v62 = vpop.f32.mrb[69].mxu0  ;;  %v2188_v16 = vfloor.f32 %v6569_v39  ;;  %v6619_v21 = vsel %vm1827_vm13, %v2019_v57, %v2211_v9  ;;  %v6622_v59 = vmax.f32 %v8559_v49, 0.0  ;;  %vm1806_vm1 = vcmp.lt.f32.partialorder %v6576_v54, 0.0  ;;  %v8564_v9 = vld [vmem:[#allocation10_spill] sm:$0xff] }
 0x17c   : > { %8551 = vst [vmem:[#allocation6_spill] sm:$0xff] %v6580_v10  ;;  %8552 = vst [vmem:[#allocation30_spill] sm:$0xff] %v6582_v62  ;;  %v6591_v26 = vpop.f32.mrb[69].mxu1  ;;  %v6593_v31 = vpop.f32.mrb[70].mxu0  ;;  %v2189_v62 = vfloor.f32 %v1613_v19  ;;  %v2334_v10 = vsel %vm1758_vm8, %v1950_v60, %v2142_v37  ;;  %v2550_v37 = vmin.f32 %v2358_v7, 127.0  ;;  %v6630_v19 = vsel %vm1829_vm15, %v2021_v18, %v2213_v2  ;;  %v8570_v49 = vld [vmem:[#allocation12_spill] sm:$0xff] }
 0x17d   : > { %8553 = vst [vmem:[#allocation31_spill] sm:$0xff] %v6591_v26  ;;  %8554 = vst [vmem:[#allocation32_spill] sm:$0xff] %v6593_v31  ;;  %v6600_v35 = vpop.f32.mrb[70].mxu1  ;;  %v6602_v52 = vpop.f32.mrb[71].mxu0  ;;  %v2526_v60 = vmin.f32 %v2334_v10, 127.0  ;;  %v1996_v31 = vceil.f32 %v6569_v39  ;;  %v1636_v26 = vmax.f32 %v8558_v40, 0.0 }
 0x17e   : > { %8555 = vst [vmem:[#allocation33_spill] sm:$0xff] %v6600_v35  ;;  %8556 = vst [vmem:[#allocation34_spill] sm:$0xff] %v6602_v52  ;;  %v6607_v36 = vpop.f32.mrb[71].mxu1  ;;  %v2693_v52 = vpack.c.bf16 %v2549_v28, %v2525_v61  ;;  %v6613_v35 = vsel %vm1805_vm12, %v1997_v56, %v2189_v62  ;;  %v1998_v61 = vceil.f32 %v6576_v54  ;;  %v2190_v62 = vfloor.f32 %v6576_v54  ;;  %v8563_v56 = vld [vmem:[#allocation9_spill] sm:$0xff] }
 0x17f   : > { %8557 = vst [vmem:[#allocation35_spill] sm:$0xff] %v6607_v36  ;;  %v2692_v36 = vpack.c.bf16 %v2548_v48, %v2524_v30  ;;  %v2694_v12 = vpack.c.bf16 %v2550_v37, %v2526_v60  ;;  %v6639_v57 = vmax.f32 %v8563_v56, 0.0  ;;  %v6642_v30 = vmax.f32 %v8564_v9, 0.0  ;;  %v8567_v48 = vld [vmem:[#allocation11_spill] sm:$0xff] }
 0x180   : > { %vm1828_vm2 = vcmp.lt.f32.partialorder %v1636_v26, 0.0  ;;  %v2020_v2 = vceil.f32 %v1636_v26  ;;  %v1660_v7 = vmax.f32 %v8567_v48, 0.0  ;;  %v2212_v40 = vfloor.f32 %v1636_v26  ;;  %v8573_v48 = vld [vmem:[#allocation14_spill] sm:$0xff] }
 0x181   : > { %3131 = vmatprep.subr.bf16.mxu0 %v2692_v36  ;;  %3192 = vmatprep.subr.bf16.mxu1 %v2694_v12  ;;  %v2595_v36 = vmin.f32 %v6619_v21, 127.0  ;;  %vm1830_vm3 = vcmp.lt.f32.partialorder %v6622_v59, 0.0  ;;  %v1662_v12 = vmax.f32 %v8570_v49, 0.0  ;;  %v2022_v21 = vceil.f32 %v6622_v59 }
 0x182   : > { %v6624_v10 = vpop.f32.mrb[72].mxu0  ;;  %3132 = vmatpush1.bf16.msra.mxu0 %v2691_v27  ;;  %3193 = vmatpush1.bf16.msra.mxu1 %v2693_v52  ;;  %v2597_v27 = vmin.f32 %v6630_v19, 127.0  ;;  %v2214_v9 = vfloor.f32 %v6622_v59  ;;  %v8572_v52 = vld [vmem:[#allocation13_spill] sm:$0xff]  ;;  %v6665_v38 = vmax.f32 %v8573_v48, 0.0  ;;  %vm1852_vm4 = vcmp.lt.f32.partialorder %v1660_v7, 0.0 }
 0x183   : > { %8560 = vst [vmem:[#allocation7_spill] sm:$0xff] %v6624_v10  ;;  %v6632_v47 = vpop.f32.mrb[72].mxu1  ;;  %v6634_v14 = vpop.f32.mrb[73].mxu0  ;;  %v6662_v28 = vmax.f32 %v8572_v52, 0.0  ;;  %v2236_v52 = vfloor.f32 %v1660_v7  ;;  %vm1854_vm5 = vcmp.lt.f32.partialorder %v1662_v12, 0.0  ;;  %v2046_v10 = vceil.f32 %v1662_v12 }
 0x184   : > { %8561 = vst [vmem:[#allocation8_spill] sm:$0xff] %v6632_v47  ;;  %8562 = vst [vmem:[#allocation36_spill] sm:$0xff] %v6634_v14  ;;  %v6644_v4 = vpop.f32.mrb[73].mxu1  ;;  %v6646_v18 = vpop.f32.mrb[74].mxu0  ;;  %v2380_v47 = vsel %vm1804_vm14, %v1996_v31, %v2188_v16  ;;  %v2238_v48 = vfloor.f32 %v1662_v12  ;;  %vm1851_vm7 = vcmp.lt.f32.partialorder %v6639_v57, 0.0  ;;  %vm1853_vm8 = vcmp.lt.f32.partialorder %v6642_v30, 0.0 }
 0x185   : > { %8565 = vst [vmem:[#allocation9_spill] sm:$0xff] %v6644_v4  ;;  %8566 = vst [vmem:[#allocation10_spill] sm:$0xff] %v6646_v18  ;;  %v6650_v60 = vpop.f32.mrb[74].mxu1  ;;  %v6652_v37 = vpop.f32.mrb[75].mxu0  ;;  %v8575_v18 = vld [vmem:[#allocation16_spill] sm:$0xff]  ;;  %v2404_v19 = vsel %vm1828_vm2, %v2020_v2, %v2212_v40  ;;  %v2572_v31 = vmin.f32 %v2380_v47, 127.0  ;;  %v2382_v42 = vsel %vm1806_vm1, %v1998_v61, %v2190_v62  ;;  %v2237_v24 = vfloor.f32 %v6642_v30 }
 0x186   : > { %8568 = vst [vmem:[#allocation11_spill] sm:$0xff] %v6650_v60  ;;  %8569 = vst [vmem:[#allocation37_spill] sm:$0xff] %v6652_v37  ;;  %v6657_v56 = vpop.f32.mrb[75].mxu1  ;;  %v8574_v60 = vld [vmem:[#allocation15_spill] sm:$0xff]  ;;  %v1686_v14 = vmax.f32 %v8575_v18, 0.0  ;;  %v2596_v16 = vmin.f32 %v2404_v19, 127.0  ;;  %v2406_v26 = vsel %vm1830_vm3, %v2022_v21, %v2214_v9 }
 0x187   : > { %8571 = vst [vmem:[#allocation12_spill] sm:$0xff] %v6657_v56  ;;  %v1684_v49 = vmax.f32 %v8574_v60, 0.0  ;;  %v2044_v56 = vceil.f32 %v1660_v7  ;;  %v2574_v19 = vmin.f32 %v2382_v42, 127.0  ;;  %v8579_v54 = vmin.f32 %v6596_v3, 127.0  ;;  %v8581_v42 = vld [vmem:[#allocation17_spill] sm:$0xff]  ;;  %v8582_v7 = vld [vmem:[#allocation18_spill] sm:$0xff] }
 0x188   : > { %v2070_v60 = vceil.f32 %v1686_v14  ;;  %v2262_v39 = vfloor.f32 %v1686_v14  ;;  %vm1878_vm10 = vcmp.lt.f32.partialorder %v1686_v14, 0.0  ;;  %v2716_v47 = vpack.c.bf16 %v2596_v16, %v2572_v31  ;;  %v8583_v12 = vld [vmem:[#allocation21_spill] sm:$0xff] }
 0x189   : > { %v2068_v4 = vceil.f32 %v1684_v49  ;;  %v2260_v37 = vfloor.f32 %v1684_v49  ;;  %vm1876_vm9 = vcmp.lt.f32.partialorder %v1684_v49, 0.0  ;;  %v2715_v61 = vpack.c.bf16 %v2595_v36, %v8579_v54  ;;  %v8588_v54 = vld [vmem:[#allocation22_spill] sm:$0xff] }
 0x18a   : > { %v6674_v44 = vpop.f32.mrb[76].mxu0  ;;  %v2430_v49 = vsel %vm1854_vm5, %v2046_v10, %v2238_v48  ;;  %vm1875_vm11 = vcmp.lt.f32.partialorder %v6662_v28, 0.0  ;;  %v8580_v59 = vmin.f32 %v6613_v35, 127.0  ;;  %v2454_v9 = vsel %vm1878_vm10, %v2070_v60, %v2262_v39  ;;  %3133 = vmatprep.subr.bf16.mxu0 %v2716_v47 }
 0x18b   : > { %8576 = vst [vmem:[#allocation13_spill] sm:$0xff] %v6674_v44  ;;  %v6679_v46 = vpop.f32.mrb[76].mxu1  ;;  %v6681_v18 = vpop.f32.mrb[77].mxu0  ;;  %v2452_v21 = vsel %vm1876_vm9, %v2068_v4, %v2260_v37  ;;  %v1519_v16 = vmax.f32 %v8581_v42, 0.0  ;;  %v2067_v3 = vceil.f32 %v6662_v28  ;;  %v2259_v36 = vfloor.f32 %v6662_v28  ;;  %3134 = vmatpush1.bf16.msra.mxu0 %v2715_v61 }
 0x18c   : > { %8577 = vst [vmem:[#allocation14_spill] sm:$0xff] %v6681_v18  ;;  %v6685_v44 = vpop.f32.mrb[77].mxu1  ;;  %v6687_v15 = vpop.f32.mrb[78].mxu0  ;;  %v2598_v18 = vmin.f32 %v2406_v26, 127.0  ;;  %v2717_v14 = vpack.c.bf16 %v2597_v27, %v8580_v59  ;;  %v1543_v10 = vmax.f32 %v8583_v12, 0.0  ;;  %vm1877_vm12 = vcmp.lt.f32.partialorder %v6665_v38, 0.0 }
 0x18d   : > { %8578 = vst [vmem:[#allocation15_spill] sm:$0xff] %v6687_v15  ;;  %v6692_v2 = vpop.f32.mrb[78].mxu1  ;;  %v6694_v40 = vpop.f32.mrb[79].mxu0  ;;  %v2428_v15 = vsel %vm1852_vm4, %v2044_v56, %v2236_v52  ;;  %v1521_v56 = vmax.f32 %v8582_v7, 0.0  ;;  %v2069_v35 = vceil.f32 %v6665_v38  ;;  %v2261_v4 = vfloor.f32 %v6665_v38 }
 0x18e   : > { %v6698_v62 = vpop.f32.mrb[79].mxu1  ;;  %v2718_v31 = vpack.c.bf16 %v2598_v18, %v2574_v19  ;;  %v2620_v52 = vmin.f32 %v2428_v15, 127.0  ;;  %v2622_v27 = vmin.f32 %v2430_v49, 127.0  ;;  %v2644_v48 = vmin.f32 %v2452_v21, 127.0  ;;  %v8585_v18 = vld [vmem:[#allocation19_spill] sm:$0xff] }
 0x18f   : > { %v2646_v60 = vmin.f32 %v2454_v9, 127.0  ;;  %v6716_v39 = vmax.f32 %v8585_v18, 0.0  ;;  %vm1711_vm13 = vcmp.lt.f32.partialorder %v1519_v16, 0.0  ;;  %v1903_v15 = vceil.f32 %v1519_v16 }
 0x190   : > { %3194 = vmatprep.subr.bf16.mxu1 %v2718_v31  ;;  %v2095_v19 = vfloor.f32 %v1519_v16  ;;  %v1545_v61 = vmax.f32 %v8588_v54, 0.0  ;;  %v1905_v49 = vceil.f32 %v1521_v56  ;;  %v2097_v21 = vfloor.f32 %v1521_v56 }
 0x191   : > { %3195 = vmatpush1.bf16.msra.mxu1 %v2717_v14  ;;  %v1927_v9 = vceil.f32 %v1543_v10  ;;  %v2119_v14 = vfloor.f32 %v1543_v10  ;;  %v8593_v12 = vfloor.f32 %v6639_v57  ;;  %v8594_v18 = vceil.f32 %v6639_v57 }
 0x192   : > { %v6713_v37 = vpop.f32.mrb[80].mxu0  ;;  %v8595_v54 = vceil.f32 %v6642_v30  ;;  %vm1713_vm14 = vcmp.lt.f32.partialorder %v1521_v56, 0.0  ;;  %vm1735_vm15 = vcmp.lt.f32.partialorder %v1543_v10, 0.0  ;;  %v6748_v57 = vsel %vm1711_vm13, %v1903_v15, %v2095_v19 }
 0x193   : > { %8584 = vst [vmem:[#allocation16_spill] sm:$0xff] %v6713_v37  ;;  %v6718_v26 = vpop.f32.mrb[80].mxu1  ;;  %v6720_v47 = vpop.f32.mrb[81].mxu0  ;;  %v2742_v37 = vpack.c.bf16 %v2646_v60, %v2622_v27  ;;  %vm1712_vm1 = vcmp.lt.f32.partialorder %v6716_v39, 0.0  ;;  %v1904_v30 = vceil.f32 %v6716_v39  ;;  %v6755_v10 = vsel %vm1713_vm14, %v1905_v49, %v2097_v21  ;;  %v8597_v27 = vld [vmem:[#allocation23_spill] sm:$0xff] }
 0x194   : > { %8586 = vst [vmem:[#allocation17_spill] sm:$0xff] %v6718_v26  ;;  %8587 = vst [vmem:[#allocation18_spill] sm:$0xff] %v6720_v47  ;;  %v6723_v59 = vpop.f32.mrb[81].mxu1  ;;  %v6725_v31 = vpop.f32.mrb[82].mxu0  ;;  %v2427_v47 = vsel %vm1851_vm7, %v8594_v18, %v8593_v12  ;;  %v2740_v26 = vpack.c.bf16 %v2644_v48, %v2620_v52  ;;  %v6757_v12 = vsel %vm1735_vm15, %v1927_v9, %v2119_v14  ;;  %v1929_v28 = vceil.f32 %v1545_v61 }
 0x195   : > { %8589 = vst [vmem:[#allocation21_spill] sm:$0xff] %v6723_v59  ;;  %8590 = vst [vmem:[#allocation19_spill] sm:$0xff] %v6725_v31  ;;  %v6727_v42 = vpop.f32.mrb[82].mxu1  ;;  %v6729_v7 = vpop.f32.mrb[83].mxu0  ;;  %v2429_v59 = vsel %vm1853_vm8, %v8595_v54, %v2237_v24  ;;  %v8596_v24 = vld [vmem:[#allocation20_spill] sm:$0xff]  ;;  %5520 = vmatprep.subr.msk.bf16.mxu1 %vm558_vm0, %v2742_v37  ;;  %v2619_v38 = vmin.f32 %v2427_v47, 127.0 }
 0x196   : > { %8591 = vst [vmem:[#allocation22_spill] sm:$0xff] %v6727_v42  ;;  %8592 = vst [vmem:[#allocation38_spill] sm:$0xff] %v6729_v7  ;;  %v6741_v31 = vpop.f32.mrb[83].mxu1  ;;  %v2451_v42 = vsel %vm1875_vm11, %v2067_v3, %v2259_v36  ;;  %v2453_v7 = vsel %vm1877_vm12, %v2069_v35, %v2261_v4  ;;  %v6753_v56 = vmax.f32 %v8596_v24, 0.0  ;;  %v2121_v3 = vfloor.f32 %v1545_v61  ;;  %5516 = vmatprep.subr.msk.bf16.mxu0 %vm558_vm0, %v2740_v26 }
 0x197   : > { %v2643_v16 = vmin.f32 %v2451_v42, 127.0  ;;  %v2621_v36 = vmin.f32 %v2429_v59, 127.0  ;;  %v2645_v52 = vmin.f32 %v2453_v7, 127.0  ;;  %v2096_v4 = vfloor.f32 %v6716_v39  ;;  %v8599_v42 = vld [vmem:[#allocation24_spill] sm:$0xff] }
 0x198   : > { %vm1737_vm2 = vcmp.lt.f32.partialorder %v1545_v61, 0.0  ;;  %v1544_v48 = vmax.f32 %v8597_v27, 0.0  ;;  %v1567_v60 = vmax.f32 %v6389_v32, 0.0  ;;  %vm1714_vm3 = vcmp.lt.f32.partialorder %v6753_v56, 0.0 }
 0x199   : > { %v2739_v47 = vpack.c.bf16 %v2643_v16, %v2619_v38  ;;  %v2741_v59 = vpack.c.bf16 %v2645_v52, %v2621_v36  ;;  %v2098_v32 = vfloor.f32 %v6753_v56  ;;  %v2503_v14 = vmin.f32 %v6757_v12, 127.0 }
 0x19a   : > { %v6761_v35 = vpop.f32.mrb[84].mxu0  ;;  %v1546_v7 = vmax.f32 %v8599_v42, 0.0  ;;  %v2313_v24 = vsel %vm1737_vm2, %v1929_v28, %v2121_v3  ;;  %v1569_v36 = vmax.f32 %v6395_v34, 0.0  ;;  %v1928_v27 = vceil.f32 %v1544_v48 }
 0x19b   : > { %v6766_v15 = vpop.f32.mrb[84].mxu1  ;;  %v6768_v19 = vpop.f32.mrb[85].mxu0  ;;  %v2838_v38 = vsel %vm558_vm0, %v2739_v47, 0  ;;  %v2844_v16 = vsel %vm558_vm0, %v2741_v59, 0  ;;  %v2120_v9 = vfloor.f32 %v1544_v48  ;;  %v1951_v12 = vceil.f32 %v1567_v60 }
 0x19c   : > { %v6773_v49 = vpop.f32.mrb[85].mxu1  ;;  %v6775_v21 = vpop.f32.mrb[86].mxu0  ;;  %3136 = vmatpush1.bf16.msra.mxu0 %v2838_v38  ;;  %3197 = vmatpush1.bf16.msra.mxu1 %v2844_v16  ;;  %v2143_v42 = vfloor.f32 %v1567_v60  ;;  %vm1736_vm4 = vcmp.lt.f32.partialorder %v1544_v48, 0.0  ;;  %vm1759_vm5 = vcmp.lt.f32.partialorder %v1567_v60, 0.0  ;;  %v6792_v26 = vmax.f32 %v6397_v51, 0.0  ;;  %v6802_v60 = vld [vmem:[%s8501_s2] sm:$0xff]  }
 0x19d   : > { %8598 = vst [vmem:[#allocation20_spill] sm:$0xff] %v6773_v49  ;;  %v6781_v18 = vpop.f32.mrb[86].mxu1  ;;  %v6783_v54 = vpop.f32.mrb[87].mxu0  ;;  %v1591_v61 = vmax.f32 %v6403_v11, 0.0  ;;  %v2505_v28 = vmin.f32 %v2313_v24, 127.0  ;;  %vm1738_vm7 = vcmp.lt.f32.partialorder %v1546_v7, 0.0  ;;  %v1930_v3 = vceil.f32 %v1546_v7 }
 0x19e   : > { %8600 = vst [vmem:[#allocation23_spill] sm:$0xff] %v6783_v54  ;;  %v6789_v52 = vpop.f32.mrb[87].mxu1  ;;  %v1593_v34 = vmax.f32 %v6410_v45, 0.0  ;;  %v2122_v47 = vfloor.f32 %v1546_v7  ;;  %v1953_v59 = vceil.f32 %v1569_v36  ;;  %v2145_v37 = vfloor.f32 %v1569_v36 }
 0x19f   : > { %8601 = vst [vmem:[#allocation24_spill] sm:$0xff] %v6789_v52  ;;  %v6797_v38 = vmax.f32 %v6401_v13, 0.0  ;;  %5517 = vmatmul.mubr.msk.bf16.vlgmr.msra.gmra.mrb[120].mxu0 %vm2803_vm6, %v6802_v60  ;;  %5521 = vmatmul.mubr.msk.bf16.vlgmr.msra.gmra.mrb[120].mxu1 %vm2803_vm6, %v6802_v60  ;;  %v6810_v11 = vsel %vm1759_vm5, %v1951_v12, %v2143_v42  ;;  %vm1761_vm8 = vcmp.lt.f32.partialorder %v1569_v36, 0.0  ;;  %v2288_v13 = vsel %vm1712_vm1, %v1904_v30, %v2096_v4 }
 0x1a0   : > { %v2312_v45 = vsel %vm1736_vm4, %v1928_v27, %v2120_v9  ;;  %3171 = vmatprep.mubr.bf16.mxu0 %v8512_v33  ;;  %3232 = vmatprep.mubr.bf16.mxu1 %v8512_v33  ;;  %v1975_v54 = vceil.f32 %v1591_v61  ;;  %vm1760_vm9 = vcmp.lt.f32.partialorder %v6792_v26, 0.0  ;;  %vm1783_vm10 = vcmp.lt.f32.partialorder %v1591_v61, 0.0 }
 0x1a1   : > { %v2504_v12 = vmin.f32 %v2312_v45, 127.0  ;;  %v1977_v39 = vceil.f32 %v1593_v34  ;;  %v2169_v30 = vfloor.f32 %v1593_v34  ;;  %v2480_v4 = vmin.f32 %v2288_v13, 127.0 }
 0x1a2   : > { %v6808_v51 = vpop.f32.mrb[88].mxu0  ;;  %v6832_v27 = vsel %vm1761_vm8, %v1953_v59, %v2145_v37  ;;  %v2144_v52 = vfloor.f32 %v6792_v26  ;;  %vm1785_vm11 = vcmp.lt.f32.partialorder %v1593_v34, 0.0  ;;  %v1592_v45 = vmax.f32 %v6412_v22, 0.0 }
 0x1a3   : > { %8602 = vst [vmem:[#allocation39_spill] sm:$0xff] %v6808_v51  ;;  %v6817_v24 = vpop.f32.mrb[88].mxu1  ;;  %v6819_v16 = vpop.f32.mrb[89].mxu0  ;;  %v2167_v51 = vfloor.f32 %v1591_v61  ;;  %v8609_v61 = vceil.f32 %v6753_v56  ;;  %v8611_v34 = vmin.f32 %v6755_v10, 127.0  ;;  %vm1762_vm12 = vcmp.lt.f32.partialorder %v6797_v38, 0.0  ;;  %v6859_v10 = vld [vmem:[%s8501_s2 + $0x8] sm:$0xff]  }
 0x1a4   : > { %8603 = vst [vmem:[#allocation40_spill] sm:$0xff] %v6819_v16  ;;  %v6822_v42 = vpop.f32.mrb[89].mxu1  ;;  %v6824_v49 = vpop.f32.mrb[90].mxu0  ;;  %v1615_v56 = vmax.f32 %v6432_v23, 0.0  ;;  %v1639_v7 = vmax.f32 %v6447_v53, 0.0  ;;  %v2529_v23 = vmin.f32 %v6832_v27, 127.0 }
 0x1a5   : > { %8604 = vst [vmem:[#allocation41_spill] sm:$0xff] %v6822_v42  ;;  %8605 = vst [vmem:[#allocation42_spill] sm:$0xff] %v6824_v49  ;;  %v6827_v48 = vpop.f32.mrb[90].mxu1  ;;  %v6829_v9 = vpop.f32.mrb[91].mxu0  ;;  %v2672_v49 = vpack.c.bf16 %v2504_v12, %v2480_v4  ;;  %v2290_v13 = vsel %vm1714_vm3, %v8609_v61, %v2098_v32  ;;  %v6845_v37 = vsel %vm1783_vm10, %v1975_v54, %v2167_v51  ;;  %v1954_v32 = vceil.f32 %v6797_v38 }
 0x1a6   : > { %8606 = vst [vmem:[#allocation43_spill] sm:$0xff] %v6827_v48  ;;  %8607 = vst [vmem:[#allocation44_spill] sm:$0xff] %v6829_v9  ;;  %v6836_v42 = vpop.f32.mrb[91].mxu1  ;;  %v2314_v48 = vsel %vm1738_vm7, %v1930_v3, %v2122_v47  ;;  %v8610_v9 = vmin.f32 %v6748_v57, 127.0  ;;  %v2482_v59 = vmin.f32 %v2290_v13, 127.0  ;;  %v2673_v22 = vpack.c.bf16 %v2505_v28, %v8611_v34 }
 0x1a7   : > { %8608 = vst [vmem:[#allocation45_spill] sm:$0xff] %v6836_v42  ;;  %v2506_v16 = vmin.f32 %v2314_v48, 127.0  ;;  %v6851_v12 = vsel %vm1785_vm11, %v1977_v39, %v2169_v30  ;;  %3251 = vmatprep.subr.bf16.mxu0 %v2672_v49  ;;  %5522 = vmatmul.mubr.msk.bf16.gmra.mrb[124].mxu1 %vm2803_vm6, %v6859_v10  ;;  %v2146_v49 = vfloor.f32 %v6797_v38  ;;  %v2551_v28 = vmin.f32 %v6845_v37, 127.0 }
 0x1a8   : > { %v2671_v36 = vpack.c.bf16 %v2503_v14, %v8610_v9  ;;  %v1617_v14 = vmax.f32 %v6438_v8, 0.0  ;;  %v1594_v8 = vmax.f32 %v6421_v58, 0.0  ;;  %5518 = vmatmul.mubr.msk.bf16.gmra.mrb[124].mxu0 %vm2803_vm6, %v6859_v10  ;;  %3242 = vmatprep.mubr.bf16.mxu1 %v8512_v33  ;;  %v2553_v53 = vmin.f32 %v6851_v12, 127.0 }
 0x1a9   : > { %v2674_v57 = vpack.c.bf16 %v2506_v16, %v2482_v59  ;;  %vm1784_vm13 = vcmp.lt.f32.partialorder %v1592_v45, 0.0  ;;  %v1976_v51 = vceil.f32 %v1592_v45  ;;  %v2168_v16 = vfloor.f32 %v1592_v45  ;;  %3181 = vmatprep.mubr.bf16.mxu0 %v8512_v33 }
 0x1aa   : > { %3252 = vmatpush1.bf16.msra.mxu0 %v2671_v36  ;;  %v6864_v54 = vpop.f32.mrb[92].mxu0  ;;  %vm1807_vm14 = vcmp.lt.f32.partialorder %v1615_v56, 0.0  ;;  %v1999_v30 = vceil.f32 %v1615_v56  ;;  %v2191_v4 = vfloor.f32 %v1615_v56  ;;  %v6884_v48 = vmax.f32 %v6440_v55, 0.0 }
 0x1ab   : > { %v6873_v3 = vpop.f32.mrb[92].mxu1  ;;  %v6875_v47 = vpop.f32.mrb[93].mxu0  ;;  %3312 = vmatprep.subr.bf16.mxu1 %v2674_v57  ;;  %v2001_v61 = vceil.f32 %v1617_v14  ;;  %v2193_v13 = vfloor.f32 %v1617_v14  ;;  %v2023_v36 = vceil.f32 %v1639_v7  ;;  %v2215_v37 = vfloor.f32 %v1639_v7 }
 0x1ac   : > { %v6879_v39 = vpop.f32.mrb[93].mxu1  ;;  %v6881_v58 = vpop.f32.mrb[94].mxu0  ;;  %3313 = vmatpush1.bf16.msra.mxu1 %v2673_v22  ;;  %vm1786_vm15 = vcmp.lt.f32.partialorder %v1594_v8, 0.0  ;;  %vm1809_vm1 = vcmp.lt.f32.partialorder %v1617_v14, 0.0  ;;  %vm1831_vm2 = vcmp.lt.f32.partialorder %v1639_v7, 0.0  ;;  %v1641_v34 = vmax.f32 %v6454_v5, 0.0 }
 0x1ad   : > { %8612 = vst [vmem:[#allocation46_spill] sm:$0xff] %v6879_v39  ;;  %8613 = vst [vmem:[#allocation47_spill] sm:$0xff] %v6881_v58  ;;  %v6886_v9 = vpop.f32.mrb[94].mxu1  ;;  %v6888_v27 = vpop.f32.mrb[95].mxu0  ;;  %v1978_v22 = vceil.f32 %v1594_v8  ;;  %v2170_v12 = vfloor.f32 %v1594_v8  ;;  %v8617_v55 = vceil.f32 %v6792_v26  ;;  %v2360_v42 = vsel %vm1784_vm13, %v1976_v51, %v2168_v16 }
 0x1ae   : > { %8614 = vst [vmem:[#allocation48_spill] sm:$0xff] %v6886_v9  ;;  %8615 = vst [vmem:[#allocation49_spill] sm:$0xff] %v6888_v27  ;;  %v6890_v59 = vpop.f32.mrb[95].mxu1  ;;  %v6899_v27 = vsel %vm1807_vm14, %v1999_v30, %v2191_v4  ;;  %v2000_v9 = vceil.f32 %v6884_v48  ;;  %v2338_v5 = vsel %vm1762_vm12, %v1954_v32, %v2146_v49  ;;  %v6907_v14 = vsel %vm1809_vm1, %v2001_v61, %v2193_v13 }
 0x1af   : > { %8616 = vst [vmem:[#allocation50_spill] sm:$0xff] %v6890_v59  ;;  %v2336_v57 = vsel %vm1760_vm9, %v8617_v55, %v2144_v52  ;;  %v6903_v59 = vmax.f32 %v6445_v0, 0.0  ;;  %v2192_v7 = vfloor.f32 %v6884_v48  ;;  %v6910_v58 = vsel %vm1831_vm2, %v2023_v36, %v2215_v37  ;;  %v6918_v52 = vld [vmem:[%s8501_s2 + $0x10] ss:$0 sps:$4 sm:$0x11]  }
 0x1b0   : > { %v6913_v26 = vmax.f32 %v6456_v41, 0.0  ;;  %5523 = vmatmul.mubr.msk.bf16.gmra.mrb[128].mxu1 %vm2803_vm6, %v6918_v52  ;;  %vm1833_vm3 = vcmp.lt.f32.partialorder %v1641_v34, 0.0  ;;  %v2025_v0 = vceil.f32 %v1641_v34  ;;  %v2528_v38 = vmin.f32 %v2336_v57, 127.0  ;;  %5519 = vmatmul.mubr.msk.bf16.gmra.mrb[128].mxu0 %vm2803_vm6, %v6918_v52 }
 0x1b1   : > { %v2552_v45 = vmin.f32 %v2360_v42, 127.0  ;;  %3344 = vmatprep.mubr.bf16.mxu1 %v8512_v33  ;;  %vm1808_vm4 = vcmp.lt.f32.partialorder %v6884_v48, 0.0  ;;  %v2217_v41 = vfloor.f32 %v1641_v34  ;;  %v2362_v56 = vsel %vm1786_vm15, %v1978_v22, %v2170_v12  ;;  %3283 = vmatprep.mubr.bf16.mxu0 %v8512_v33 }
 0x1b2   : > { %v2530_v32 = vmin.f32 %v2338_v5, 127.0  ;;  %v8618_v49 = vmin.f32 %v6810_v11, 127.0  ;;  %v2554_v30 = vmin.f32 %v2362_v56, 127.0  ;;  %v2697_v4 = vpack.c.bf16 %v2553_v53, %v2529_v23 }
 0x1b3   : > { %v2696_v16 = vpack.c.bf16 %v2552_v45, %v2528_v38  ;;  %v1663_v42 = vmax.f32 %v6474_v20, 0.0  ;;  %v2575_v61 = vmin.f32 %v6899_v27, 127.0  ;;  %vm1810_vm5 = vcmp.lt.f32.partialorder %v6903_v59, 0.0  ;;  %v8619_v38 = vld [vmem:[#allocation4_spill] sm:$0xff] }
 0x1b4   : > { %v2695_v51 = vpack.c.bf16 %v2551_v28, %v8618_v49  ;;  %v2002_v13 = vceil.f32 %v6903_v59  ;;  %v2194_v8 = vfloor.f32 %v6903_v59  ;;  %v1642_v36 = vmax.f32 %v6461_v6, 0.0  ;;  %v4412_v6 = vld [vmem:[%s8504_s5] sm:$0xff] }
 0x1b5   : > { %v2577_v11 = vmin.f32 %v6907_v14, 127.0  ;;  %v2599_v28 = vmin.f32 %v6910_v58, 127.0  ;;  %3253 = vmatprep.subr.bf16.mxu0 %v2696_v16  ;;  %v2698_v37 = vpack.c.bf16 %v2554_v30, %v2530_v32  ;;  %v1664_v23 = vmax.f32 %v6481_v1, 0.0  ;;  %v4414_v58 = vld [vmem:[%s8504_s5 + $0x10] sm:$0xf]  ;;  %4417 = vperm.xlu0 %5587, %v4412_v6  }
 0x1b6   : > { %v2409_v20 = vsel %vm1833_vm3, %v2025_v0, %v2217_v41  ;;  %vm1832_vm7 = vcmp.lt.f32.partialorder %v6913_v26, 0.0  ;;  %v2024_v53 = vceil.f32 %v6913_v26  ;;  %3254 = vmatpush1.bf16.msra.mxu0 %v2695_v51  ;;  %v6943_v27 = vmax.f32 %v6479_v50, 0.0  ;;  %4427 = vperm.xlu1 %5588, %v4414_v58   ;;  %v8620_v41 = vld [vmem:[#allocation25_spill] sm:$0xff] }
 0x1b7   : > { %v2216_v1 = vfloor.f32 %v6913_v26  ;;  %3314 = vmatprep.subr.bf16.mxu1 %v2698_v37  ;;  %v2047_v34 = vceil.f32 %v1663_v42  ;;  %v2239_v22 = vfloor.f32 %v1663_v42  ;;  %v1666_v12 = vmax.f32 %v6487_v43, 0.0  ;;  %v8621_v37 = vld [vmem:[#allocation2_spill] sm:$0xff] }
 0x1b8   : > { %vm1834_vm8 = vcmp.lt.f32.partialorder %v1642_v36, 0.0  ;;  %v2026_v55 = vceil.f32 %v1642_v36  ;;  %v2218_v50 = vfloor.f32 %v1642_v36  ;;  %3315 = vmatpush1.bf16.msra.mxu1 %v2697_v4  ;;  %vm1855_vm9 = vcmp.lt.f32.partialorder %v1663_v42, 0.0 }
 0x1b9   : > { %v2601_v57 = vmin.f32 %v2409_v20, 127.0  ;;  %v2048_v5 = vceil.f32 %v1664_v23  ;;  %v2240_v14 = vfloor.f32 %v1664_v23  ;;  %v1687_v0 = vmax.f32 %v6489_v17, 0.0 }
 0x1ba   : > { %vm1857_vm10 = vcmp.lt.f32.partialorder %v6943_v27, 0.0  ;;  %vm1856_vm11 = vcmp.lt.f32.partialorder %v1664_v23, 0.0  ;;  %v1688_v45 = vmax.f32 %v8619_v38, 0.0  ;;  %v1690_v56 = vmax.f32 %v8620_v41, 0.0 }
 0x1bb   : > { %v6957_v43 = vsel %vm1855_vm9, %v2047_v34, %v2239_v22  ;;  %v2049_v32 = vceil.f32 %v6943_v27  ;;  %v2241_v49 = vfloor.f32 %v6943_v27  ;;  %vm1858_vm12 = vcmp.lt.f32.partialorder %v1666_v12, 0.0  ;;  %v4413_v34 = vld [vmem:[%s8504_s5 + $0x8] sm:$0xff] }
 0x1bc   : > { %v2050_v51 = vceil.f32 %v1666_v12  ;;  %v2242_v16 = vfloor.f32 %v1666_v12  ;;  %v2072_v30 = vceil.f32 %v1688_v45  ;;  %v2264_v4 = vfloor.f32 %v1688_v45  ;;  %4422 = vperm.xlu1 %5588, %v4413_v34  }
 0x1bd   : > { %v2432_v42 = vsel %vm1856_vm11, %v2048_v5, %v2240_v14  ;;  %vm1879_vm13 = vcmp.lt.f32.partialorder %v1687_v0, 0.0  ;;  %vm1880_vm14 = vcmp.lt.f32.partialorder %v1688_v45, 0.0  ;;  %v2384_v17 = vsel %vm1808_vm4, %v2000_v9, %v2192_v7 }
 0x1be   : > { %v1689_v23 = vmax.f32 %v8621_v37, 0.0  ;;  %v2074_v20 = vceil.f32 %v1690_v56  ;;  %v2266_v6 = vfloor.f32 %v1690_v56  ;;  %v2408_v58 = vsel %vm1832_vm7, %v2024_v53, %v2216_v1 }
 0x1bf   : > { %vm1882_vm15 = vcmp.lt.f32.partialorder %v1690_v56, 0.0  ;;  %v2576_v22 = vmin.f32 %v2384_v17, 127.0  ;;  %v2600_v5 = vmin.f32 %v2408_v58, 127.0  ;;  %v2386_v14 = vsel %vm1810_vm5, %v2002_v13, %v2194_v8 }
 0x1c0   : > { %v2456_v48 = vsel %vm1880_vm14, %v2072_v30, %v2264_v4  ;;  %v2410_v9 = vsel %vm1834_vm8, %v2026_v55, %v2218_v50  ;;  %v2578_v7 = vmin.f32 %v2386_v14, 127.0  ;;  %v2719_v38 = vpack.c.bf16 %v2599_v28, %v2575_v61 }
 0x1c1   : > { %v2720_v45 = vpack.c.bf16 %v2600_v5, %v2576_v22  ;;  %v2602_v41 = vmin.f32 %v2410_v9, 127.0  ;;  %v2721_v26 = vpack.c.bf16 %v2601_v57, %v2577_v11  ;;  %v1523_v53 = vmax.f32 %v6527_v25, 0.0 }
 0x1c2   : > { %v2434_v1 = vsel %vm1858_vm12, %v2050_v51, %v2242_v16  ;;  %v2071_v37 = vceil.f32 %v1687_v0  ;;  %v2263_v39 = vfloor.f32 %v1687_v0  ;;  %v2458_v17 = vsel %vm1882_vm15, %v2074_v20, %v2266_v6  ;;  %v8623_v20 = vld [vmem:[#allocation3_spill] sm:$0xff] }
 0x1c3   : > { %3255 = vmatprep.subr.bf16.mxu0 %v2720_v45  ;;  %v2722_v59 = vpack.c.bf16 %v2602_v41, %v2578_v7  ;;  %v1907_v13 = vceil.f32 %v1523_v53  ;;  %v2099_v8 = vfloor.f32 %v1523_v53  ;;  %v1525_v36 = vmax.f32 %v6531_v63, 0.0  ;;  %v8622_v63 = vld [vmem:[#allocation5_spill] sm:$0xff]  ;;  %v8626_v41 = vld [vmem:[#allocation28_spill] sm:$0xff] }
 0x1c4   : > { %v2073_v55 = vceil.f32 %v1689_v23  ;;  %v2265_v50 = vfloor.f32 %v1689_v23  ;;  %v2648_v61 = vmin.f32 %v2456_v48, 127.0  ;;  %3256 = vmatpush1.bf16.msra.mxu0 %v2719_v38  ;;  %vm1715_vm1 = vcmp.lt.f32.partialorder %v1523_v53, 0.0  ;;  %v8625_v38 = vld [vmem:[#allocation27_spill] sm:$0xff] }
 0x1c5   : > { %v2433_v25 = vsel %vm1857_vm10, %v2049_v32, %v2241_v49  ;;  %vm1881_vm2 = vcmp.lt.f32.partialorder %v1689_v23, 0.0  ;;  %v2650_v11 = vmin.f32 %v2458_v17, 127.0  ;;  %3316 = vmatprep.subr.bf16.mxu1 %v2722_v59  ;;  %v6983_v28 = vmax.f32 %v6533_v29, 0.0  ;;  %v8624_v49 = vld [vmem:[#allocation26_spill] sm:$0xff]  ;;  %v8627_v17 = vld [vmem:[#allocation29_spill] sm:$0xff] }
 0x1c6   : > { %v2624_v12 = vmin.f32 %v2432_v42, 127.0  ;;  %v2626_v57 = vmin.f32 %v2434_v1, 127.0  ;;  %v2455_v56 = vsel %vm1879_vm13, %v2071_v37, %v2263_v39  ;;  %3317 = vmatpush1.bf16.msra.mxu1 %v2721_v26  ;;  %v1547_v51 = vmax.f32 %v8622_v63, 0.0 }
 0x1c7   : > { %v6987_v16 = vsel %vm1715_vm1, %v1907_v13, %v2099_v8  ;;  %v1909_v30 = vceil.f32 %v1525_v36  ;;  %v2101_v4 = vfloor.f32 %v1525_v36  ;;  %v6990_v27 = vmax.f32 %v8623_v20, 0.0 }
 0x1c8   : > { %v2457_v32 = vsel %vm1881_vm2, %v2073_v55, %v2265_v50  ;;  %vm1717_vm3 = vcmp.lt.f32.partialorder %v1525_v36, 0.0  ;;  %v1549_v23 = vmax.f32 %v8624_v49, 0.0  ;;  %v2744_v29 = vpack.c.bf16 %v2648_v61, %v2624_v12  ;;  %v8628_v36 = vld [vmem:[#allocation6_spill] sm:$0xff] }
 0x1c9   : > { %v1908_v42 = vceil.f32 %v6983_v28  ;;  %v2100_v0 = vfloor.f32 %v6983_v28  ;;  %v2746_v39 = vpack.c.bf16 %v2650_v11, %v2626_v57  ;;  %v2647_v6 = vmin.f32 %v2455_v56, 127.0 }
 0x1ca   : > { %v2483_v58 = vmin.f32 %v6987_v16, 127.0  ;;  %v1931_v34 = vceil.f32 %v1547_v51  ;;  %v2123_v22 = vfloor.f32 %v1547_v51  ;;  %5524 = vmatprep.subr.msk.bf16.mxu0 %vm558_vm0, %v2744_v29  ;;  %v2623_v5 = vmin.f32 %v6957_v43, 127.0 }
 0x1cb   : > { %v6998_v14 = vsel %vm1717_vm3, %v1909_v30, %v2101_v4  ;;  %vm1716_vm4 = vcmp.lt.f32.partialorder %v6983_v28, 0.0  ;;  %v1910_v48 = vceil.f32 %v6990_v27  ;;  %v2102_v9 = vfloor.f32 %v6990_v27  ;;  %5528 = vmatprep.subr.msk.bf16.mxu1 %vm558_vm0, %v2746_v39  ;;  %v8630_v4 = vld [vmem:[#allocation31_spill] sm:$0xff] }
 0x1cc   : > { %vm1739_vm5 = vcmp.lt.f32.partialorder %v1547_v51, 0.0  ;;  %v1933_v7 = vceil.f32 %v1549_v23  ;;  %v1548_v45 = vmax.f32 %v8625_v38, 0.0  ;;  %v7006_v26 = vmax.f32 %v8626_v41, 0.0  ;;  %v8629_v51 = vld [vmem:[#allocation30_spill] sm:$0xff] }
 0x1cd   : > { %v2743_v53 = vpack.c.bf16 %v2647_v6, %v2623_v5  ;;  %v2125_v1 = vfloor.f32 %v1549_v23  ;;  %v2625_v43 = vmin.f32 %v2433_v25, 127.0  ;;  %v2649_v37 = vmin.f32 %v2457_v32, 127.0  ;;  %v8631_v6 = vld [vmem:[#allocation32_spill] sm:$0xff] }
 0x1ce   : > { %v1571_v59 = vmax.f32 %v8627_v17, 0.0  ;;  %vm1718_vm7 = vcmp.lt.f32.partialorder %v6990_v27, 0.0  ;;  %v2315_v13 = vsel %vm1739_vm5, %v1931_v34, %v2123_v22  ;;  %vm1741_vm8 = vcmp.lt.f32.partialorder %v1549_v23, 0.0 }
 0x1cf   : > { %v2850_v8 = vsel %vm558_vm0, %v2743_v53, 0  ;;  %v1573_v55 = vmax.f32 %v8628_v36, 0.0  ;;  %v2745_v50 = vpack.c.bf16 %v2649_v37, %v2625_v43  ;;  %v2485_v12 = vmin.f32 %v6998_v14, 127.0  ;;  %v8633_v36 = vld [vmem:[#allocation34_spill] sm:$0xff] }
 0x1d0   : > { %3258 = vmatpush1.bf16.msra.mxu0 %v2850_v8  ;;  %vm1763_vm9 = vcmp.lt.f32.partialorder %v1571_v59, 0.0  ;;  %v1955_v61 = vceil.f32 %v1571_v59  ;;  %v2147_v11 = vfloor.f32 %v1571_v59  ;;  %v2317_v56 = vsel %vm1741_vm8, %v1933_v7, %v2125_v1  ;;  %v8632_v7 = vld [vmem:[#allocation33_spill] sm:$0xff] }
 0x1d1   : > { %vm1765_vm10 = vcmp.lt.f32.partialorder %v1573_v55, 0.0  ;;  %v1957_v25 = vceil.f32 %v1573_v55  ;;  %v2149_v57 = vfloor.f32 %v1573_v55  ;;  %v2856_v63 = vsel %vm558_vm0, %v2745_v50, 0  ;;  %v8634_v50 = vld [vmem:[#allocation35_spill] sm:$0xff] }
 0x1d2   : > { %v7015_v30 = vmax.f32 %v8629_v51, 0.0  ;;  %v7018_v20 = vmax.f32 %v8630_v4, 0.0  ;;  %v2507_v32 = vmin.f32 %v2315_v13, 127.0  ;;  %v1932_v49 = vceil.f32 %v1548_v45  ;;  %3319 = vmatpush1.bf16.msra.mxu1 %v2856_v63 }
 0x1d3   : > { %v2124_v23 = vfloor.f32 %v1548_v45  ;;  %v7020_v29 = vsel %vm1763_vm9, %v1955_v61, %v2147_v11  ;;  %5525 = vmatmul.mubr.msk.bf16.vlgmr.msra.gmra.mrb[132].mxu0 %vm2803_vm6, %v6802_v60  ;;  %vm1740_vm11 = vcmp.lt.f32.partialorder %v1548_v45, 0.0  ;;  %vm1742_vm12 = vcmp.lt.f32.partialorder %v7006_v26, 0.0 }
 0x1d4   : > { %v7025_v39 = vsel %vm1765_vm10, %v1957_v25, %v2149_v57  ;;  %v1595_v34 = vmax.f32 %v8631_v6, 0.0  ;;  %3293 = vmatprep.mubr.bf16.mxu0 %v8512_v33  ;;  %v2509_v22 = vmin.f32 %v2317_v56, 127.0  ;;  %v1934_v5 = vceil.f32 %v7006_v26 }
 0x1d5   : > { %v2126_v14 = vfloor.f32 %v7006_v26  ;;  %v1597_v38 = vmax.f32 %v8632_v7, 0.0  ;;  %v2531_v41 = vmin.f32 %v7020_v29, 127.0  ;;  %v1956_v53 = vceil.f32 %v7015_v30  ;;  %5529 = vmatmul.mubr.msk.bf16.vlgmr.msra.gmra.mrb[132].mxu1 %vm2803_vm6, %v6802_v60  ;;  %v8636_v7 = vld [vmem:[#allocation8_spill] sm:$0xff] }
 0x1d6   : > { %v2148_v1 = vfloor.f32 %v7015_v30  ;;  %v1958_v43 = vceil.f32 %v7018_v20  ;;  %v2533_v37 = vmin.f32 %v7025_v39, 127.0  ;;  %v2150_v17 = vfloor.f32 %v7018_v20  ;;  %3354 = vmatprep.mubr.bf16.mxu1 %v8512_v33 }
 0x1d7   : > { %v2292_v59 = vsel %vm1716_vm4, %v1908_v42, %v2100_v0  ;;  %v2316_v13 = vsel %vm1740_vm11, %v1932_v49, %v2124_v23  ;;  %vm1787_vm13 = vcmp.lt.f32.partialorder %v1595_v34, 0.0  ;;  %v1979_v8 = vceil.f32 %v1595_v34  ;;  %v8635_v23 = vld [vmem:[#allocation7_spill] sm:$0xff] }
 0x1d8   : > { %v1596_v55 = vmax.f32 %v8633_v36, 0.0  ;;  %v7050_v61 = vmax.f32 %v8634_v50, 0.0  ;;  %vm1764_vm14 = vcmp.lt.f32.partialorder %v7015_v30, 0.0  ;;  %v2171_v11 = vfloor.f32 %v1595_v34 }
 0x1d9   : > { %vm1789_vm15 = vcmp.lt.f32.partialorder %v1597_v38, 0.0  ;;  %v1981_v25 = vceil.f32 %v1597_v38  ;;  %v2173_v57 = vfloor.f32 %v1597_v38  ;;  %vm1766_vm1 = vcmp.lt.f32.partialorder %v7018_v20, 0.0  ;;  %v8639_v38 = vld [vmem:[#allocation11_spill] sm:$0xff] }
 0x1da   : > { %v2484_v28 = vmin.f32 %v2292_v59, 127.0  ;;  %v2508_v42 = vmin.f32 %v2316_v13, 127.0  ;;  %v2294_v0 = vsel %vm1718_vm7, %v1910_v48, %v2102_v9  ;;  %v2318_v45 = vsel %vm1742_vm12, %v1934_v5, %v2126_v14 }
 0x1db   : > { %v2486_v56 = vmin.f32 %v2294_v0, 127.0  ;;  %v2510_v63 = vmin.f32 %v2318_v45, 127.0  ;;  %v2675_v51 = vpack.c.bf16 %v2507_v32, %v2483_v58  ;;  %v2677_v4 = vpack.c.bf16 %v2509_v22, %v2485_v12  ;;  %5526 = vmatmul.mubr.msk.bf16.gmra.mrb[136].mxu0 %vm2803_vm6, %v6859_v10  ;;  %v8637_v12 = vld [vmem:[#allocation36_spill] sm:$0xff]  ;;  %v8638_v22 = vld [vmem:[#allocation10_spill] sm:$0xff] }
 0x1dc   : > { %vm1788_vm2 = vcmp.lt.f32.partialorder %v1596_v55, 0.0  ;;  %v2676_v49 = vpack.c.bf16 %v2508_v42, %v2484_v28  ;;  %v1619_v6 = vmax.f32 %v8635_v23, 0.0  ;;  %v1621_v59 = vmax.f32 %v8636_v7, 0.0  ;;  %3303 = vmatprep.mubr.bf16.mxu0 %v8512_v33 }
 0x1dd   : > { %v2363_v27 = vsel %vm1787_vm13, %v1979_v8, %v2171_v11  ;;  %v2365_v48 = vsel %vm1789_vm15, %v1981_v25, %v2173_v57  ;;  %v1980_v9 = vceil.f32 %v1596_v55  ;;  %v2678_v26 = vpack.c.bf16 %v2510_v63, %v2486_v56  ;;  %5530 = vmatmul.mubr.msk.bf16.gmra.mrb[136].mxu1 %vm2803_vm6, %v6859_v10  ;;  %v8640_v57 = vld [vmem:[#allocation9_spill] sm:$0xff] }
 0x1de   : > { %3373 = vmatprep.subr.bf16.mxu0 %v2676_v49  ;;  %v2003_v16 = vceil.f32 %v1619_v6  ;;  %v2195_v58 = vfloor.f32 %v1619_v6  ;;  %v7072_v32 = vmax.f32 %v8637_v12, 0.0  ;;  %v1643_v5 = vmax.f32 %v8638_v22, 0.0  ;;  %3364 = vmatprep.mubr.bf16.mxu1 %v8512_v33 }
 0x1df   : > { %3434 = vmatprep.subr.bf16.mxu1 %v2678_v26  ;;  %3374 = vmatpush1.bf16.msra.mxu0 %v2675_v51  ;;  %vm1811_vm3 = vcmp.lt.f32.partialorder %v1619_v6, 0.0  ;;  %v2005_v34 = vceil.f32 %v1621_v59  ;;  %v2197_v14 = vfloor.f32 %v1621_v59  ;;  %v1645_v13 = vmax.f32 %v8639_v38, 0.0 }
 0x1e0   : > { %v2172_v8 = vfloor.f32 %v1596_v55  ;;  %vm1790_vm4 = vcmp.lt.f32.partialorder %v7050_v61, 0.0  ;;  %v1982_v36 = vceil.f32 %v7050_v61  ;;  %3435 = vmatpush1.bf16.msra.mxu1 %v2677_v4  ;;  %vm1813_vm5 = vcmp.lt.f32.partialorder %v1621_v59, 0.0 }
 0x1e1   : > { %v2555_v50 = vmin.f32 %v2363_v27, 127.0  ;;  %v2557_v11 = vmin.f32 %v2365_v48, 127.0  ;;  %v2174_v25 = vfloor.f32 %v7050_v61  ;;  %v7083_v28 = vmax.f32 %v8640_v57, 0.0 }
 0x1e2   : > { %v7085_v42 = vsel %vm1811_vm3, %v2003_v16, %v2195_v58  ;;  %v2004_v0 = vceil.f32 %v7072_v32  ;;  %v2027_v45 = vceil.f32 %v1643_v5  ;;  %v2219_v56 = vfloor.f32 %v1643_v5 }
 0x1e3   : > { %v7088_v63 = vsel %vm1813_vm5, %v2005_v34, %v2197_v14  ;;  %vm1835_vm7 = vcmp.lt.f32.partialorder %v1643_v5, 0.0  ;;  %v2029_v51 = vceil.f32 %v1645_v13  ;;  %v2221_v4 = vfloor.f32 %v1645_v13  ;;  %5527 = vmatmul.mubr.msk.bf16.gmra.mrb[140].mxu0 %vm2803_vm6, %v6918_v52  ;;  %v8643_v14 = vld [vmem:[#allocation13_spill] sm:$0xff] }
 0x1e4   : > { %v2196_v49 = vfloor.f32 %v7072_v32  ;;  %vm1837_vm8 = vcmp.lt.f32.partialorder %v1645_v13, 0.0  ;;  %v2340_v23 = vsel %vm1764_vm14, %v1956_v53, %v2148_v1  ;;  %v2364_v6 = vsel %vm1788_vm2, %v1980_v9, %v2172_v8  ;;  %3405 = vmatprep.mubr.bf16.mxu0 %v8512_v33  ;;  %v8641_v1 = vld [vmem:[#allocation37_spill] sm:$0xff]  ;;  %v8642_v9 = vld [vmem:[#allocation12_spill] sm:$0xff]  ;;  %v8644_v8 = vld [vmem:[#allocation14_spill] sm:$0xff] }
 0x1e5   : > { %v2579_v7 = vmin.f32 %v7085_v42, 127.0  ;;  %v2006_v59 = vceil.f32 %v7083_v28  ;;  %v2198_v27 = vfloor.f32 %v7083_v28  ;;  %v2342_v48 = vsel %vm1766_vm1, %v1958_v43, %v2150_v17  ;;  %5531 = vmatmul.mubr.msk.bf16.gmra.mrb[140].mxu1 %vm2803_vm6, %v6918_v52 }
 0x1e6   : > { %v2581_v30 = vmin.f32 %v7088_v63, 127.0  ;;  %vm1812_vm9 = vcmp.lt.f32.partialorder %v7072_v32, 0.0  ;;  %v7112_v53 = vsel %vm1835_vm7, %v2027_v45, %v2219_v56  ;;  %v1644_v55 = vmax.f32 %v8641_v1, 0.0  ;;  %3466 = vmatprep.mubr.bf16.mxu1 %v8512_v33 }
 0x1e7   : > { %v7116_v26 = vmax.f32 %v8642_v9, 0.0  ;;  %v7120_v16 = vsel %vm1837_vm8, %v2029_v51, %v2221_v4  ;;  %v2532_v58 = vmin.f32 %v2340_v23, 127.0  ;;  %v2556_v12 = vmin.f32 %v2364_v6, 127.0 }
 0x1e8   : > { %v2366_v20 = vsel %vm1790_vm4, %v1982_v36, %v2174_v25  ;;  %v2534_v43 = vmin.f32 %v2342_v48, 127.0  ;;  %v2699_v22 = vpack.c.bf16 %v2555_v50, %v2531_v41  ;;  %v2701_v5 = vpack.c.bf16 %v2557_v11, %v2533_v37 }
 0x1e9   : > { %v2558_v17 = vmin.f32 %v2366_v20, 127.0  ;;  %vm1814_vm10 = vcmp.lt.f32.partialorder %v7083_v28, 0.0  ;;  %v2700_v34 = vpack.c.bf16 %v2556_v12, %v2532_v58  ;;  %v1667_v38 = vmax.f32 %v8643_v14, 0.0  ;;  %v8646_v28 = vld [vmem:[#allocation16_spill] sm:$0xff] }
 0x1ea   : > { %v1669_v13 = vmax.f32 %v6679_v46, 0.0  ;;  %v1668_v61 = vmax.f32 %v8644_v8, 0.0  ;;  %v2603_v36 = vmin.f32 %v7112_v53, 127.0  ;;  %vm1836_vm11 = vcmp.lt.f32.partialorder %v1644_v55, 0.0  ;;  %v8645_v46 = vld [vmem:[#allocation15_spill] sm:$0xff] }
 0x1eb   : > { %v2028_v25 = vceil.f32 %v1644_v55  ;;  %v2702_v57 = vpack.c.bf16 %v2558_v17, %v2534_v43  ;;  %v2605_v29 = vmin.f32 %v7120_v16, 127.0  ;;  %3375 = vmatprep.subr.bf16.mxu0 %v2700_v34  ;;  %v2051_v41 = vceil.f32 %v1667_v38 }
 0x1ec   : > { %v2243_v39 = vfloor.f32 %v1667_v38  ;;  %v1670_v37 = vmax.f32 %v6685_v44, 0.0  ;;  %3376 = vmatpush1.bf16.msra.mxu0 %v2699_v22  ;;  %vm1859_vm12 = vcmp.lt.f32.partialorder %v1667_v38, 0.0  ;;  %v2053_v50 = vceil.f32 %v1669_v13 }
 0x1ed   : > { %3436 = vmatprep.subr.bf16.mxu1 %v2702_v57  ;;  %v2245_v11 = vfloor.f32 %v1669_v13  ;;  %v7137_v45 = vmax.f32 %v8645_v46, 0.0  ;;  %v2220_v56 = vfloor.f32 %v1644_v55  ;;  %vm1861_vm13 = vcmp.lt.f32.partialorder %v1669_v13, 0.0  ;;  %v8649_v46 = vld [vmem:[#allocation19_spill] sm:$0xff] }
 0x1ee   : > { %3437 = vmatpush1.bf16.msra.mxu1 %v2701_v5  ;;  %v2052_v51 = vceil.f32 %v1668_v61  ;;  %v2244_v4 = vfloor.f32 %v1668_v61  ;;  %vm1838_vm14 = vcmp.lt.f32.partialorder %v7116_v26, 0.0  ;;  %v2030_v23 = vceil.f32 %v7116_v26 }
 0x1ef   : > { %vm1860_vm15 = vcmp.lt.f32.partialorder %v1668_v61, 0.0  ;;  %v1693_v44 = vmax.f32 %v6692_v2, 0.0  ;;  %v2222_v6 = vfloor.f32 %v7116_v26  ;;  %v7143_v48 = vsel %vm1859_vm12, %v2051_v41, %v2243_v39  ;;  %v8648_v26 = vld [vmem:[#allocation18_spill] sm:$0xff] }
 0x1f0   : > { %vm1862_vm1 = vcmp.lt.f32.partialorder %v1670_v37, 0.0  ;;  %v2054_v53 = vceil.f32 %v1670_v37  ;;  %v7145_v1 = vsel %vm1861_vm13, %v2053_v50, %v2245_v11  ;;  %v2246_v9 = vfloor.f32 %v1670_v37 }
 0x1f1   : > { %vm1883_vm2 = vcmp.lt.f32.partialorder %v7137_v45, 0.0  ;;  %v1692_v16 = vmax.f32 %v6694_v40, 0.0  ;;  %v7149_v58 = vsel %vm1860_vm15, %v2052_v51, %v2244_v4  ;;  %v2075_v12 = vceil.f32 %v7137_v45  ;;  %v8650_v51 = vld [vmem:[#allocation22_spill] sm:$0xff] }
 0x1f2   : > { %v1694_v20 = vmax.f32 %v6698_v62, 0.0  ;;  %v2388_v2 = vsel %vm1812_vm9, %v2004_v0, %v2196_v49  ;;  %v2267_v43 = vfloor.f32 %v7137_v45  ;;  %vm1885_vm3 = vcmp.lt.f32.partialorder %v1693_v44, 0.0 }
 0x1f3   : > { %v2077_v17 = vceil.f32 %v1693_v44  ;;  %vm1884_vm4 = vcmp.lt.f32.partialorder %v1692_v16, 0.0  ;;  %v2076_v22 = vceil.f32 %v1692_v16  ;;  %v2268_v40 = vfloor.f32 %v1692_v16 }
 0x1f4   : > { %v2078_v5 = vceil.f32 %v1694_v20  ;;  %v2412_v34 = vsel %vm1836_vm11, %v2028_v25, %v2220_v56  ;;  %v2270_v14 = vfloor.f32 %v1694_v20  ;;  %v2580_v38 = vmin.f32 %v2388_v2, 127.0 }
 0x1f5   : > { %v2604_v62 = vmin.f32 %v2412_v34, 127.0  ;;  %v2390_v32 = vsel %vm1814_vm10, %v2006_v59, %v2198_v27  ;;  %v2438_v0 = vsel %vm1862_vm1, %v2054_v53, %v2246_v9  ;;  %v2269_v49 = vfloor.f32 %v1693_v44  ;;  %v8647_v27 = vld [vmem:[#allocation17_spill] sm:$0xff] }
 0x1f6   : > { %vm1886_vm5 = vcmp.lt.f32.partialorder %v1694_v20, 0.0  ;;  %v2414_v13 = vsel %vm1838_vm14, %v2030_v23, %v2222_v6  ;;  %v2582_v55 = vmin.f32 %v2390_v32, 127.0  ;;  %v2723_v25 = vpack.c.bf16 %v2603_v36, %v2579_v7 }
 0x1f7   : > { %v2724_v8 = vpack.c.bf16 %v2604_v62, %v2580_v38  ;;  %v2606_v61 = vmin.f32 %v2414_v13, 127.0  ;;  %v2460_v57 = vsel %vm1884_vm4, %v2076_v22, %v2268_v40  ;;  %v2725_v41 = vpack.c.bf16 %v2605_v29, %v2581_v30 }
 0x1f8   : > { %v1527_v59 = vmax.f32 %v8646_v28, 0.0  ;;  %v1529_v39 = vmax.f32 %v8647_v27, 0.0  ;;  %v2462_v37 = vsel %vm1886_vm5, %v2078_v5, %v2270_v14  ;;  %v7178_v11 = vmax.f32 %v8648_v26, 0.0 }
 0x1f9   : > { %3377 = vmatprep.subr.bf16.mxu0 %v2724_v8  ;;  %v2726_v50 = vpack.c.bf16 %v2606_v61, %v2582_v55  ;;  %v1551_v56 = vmax.f32 %v8649_v46, 0.0  ;;  %v2628_v42 = vmin.f32 %v7149_v58, 127.0  ;;  %v1553_v63 = vmax.f32 %v8650_v51, 0.0  ;;  %v8651_v58 = vld [vmem:[#allocation21_spill] sm:$0xff]  ;;  %v8653_v51 = vld [vmem:[#allocation20_spill] sm:$0xff] }
 0x1fa   : > { %3378 = vmatpush1.bf16.msra.mxu0 %v2723_v25  ;;  %v1911_v7 = vceil.f32 %v1527_v59  ;;  %v2103_v36 = vfloor.f32 %v1527_v59  ;;  %vm1719_vm7 = vcmp.lt.f32.partialorder %v1527_v59, 0.0  ;;  %vm1721_vm8 = vcmp.lt.f32.partialorder %v1529_v39, 0.0 }
 0x1fb   : > { %3438 = vmatprep.subr.bf16.mxu1 %v2726_v50  ;;  %v1913_v30 = vceil.f32 %v1529_v39  ;;  %v2105_v29 = vfloor.f32 %v1529_v39  ;;  %v2630_v4 = vmin.f32 %v2438_v0, 127.0  ;;  %v2459_v23 = vsel %vm1883_vm2, %v2075_v12, %v2267_v43  ;;  %v8652_v43 = vld [vmem:[#allocation38_spill] sm:$0xff] }
 0x1fc   : > { %v2652_v6 = vmin.f32 %v2460_v57, 127.0  ;;  %v2654_v53 = vmin.f32 %v2462_v37, 127.0  ;;  %3439 = vmatpush1.bf16.msra.mxu1 %v2725_v41  ;;  %v2461_v9 = vsel %vm1885_vm3, %v2077_v17, %v2269_v49  ;;  %v1912_v16 = vceil.f32 %v7178_v11 }
 0x1fd   : > { %v7188_v20 = vmax.f32 %v8651_v58, 0.0  ;;  %vm1743_vm9 = vcmp.lt.f32.partialorder %v1551_v56, 0.0  ;;  %v7190_v2 = vsel %vm1719_vm7, %v1911_v7, %v2103_v36  ;;  %v7192_v22 = vsel %vm1721_vm8, %v1913_v30, %v2105_v29  ;;  %v8654_v58 = vld [vmem:[#allocation23_spill] sm:$0xff] }
 0x1fe   : > { %v1935_v40 = vceil.f32 %v1551_v56  ;;  %v2127_v5 = vfloor.f32 %v1551_v56  ;;  %vm1745_vm10 = vcmp.lt.f32.partialorder %v1553_v63, 0.0  ;;  %v1937_v45 = vceil.f32 %v1553_v63 }
 0x1ff   : > { %v2129_v12 = vfloor.f32 %v1553_v63  ;;  %v1552_v34 = vmax.f32 %v8652_v43, 0.0  ;;  %v2104_v44 = vfloor.f32 %v7178_v11  ;;  %v2748_v14 = vpack.c.bf16 %v2652_v6, %v2628_v42 }
 0x200   : > { %v7196_v17 = vsel %vm1743_vm9, %v1935_v40, %v2127_v5  ;;  %v2750_v38 = vpack.c.bf16 %v2654_v53, %v2630_v4  ;;  %v2487_v62 = vmin.f32 %v7190_v2, 127.0  ;;  %v2489_v32 = vmin.f32 %v7192_v22, 127.0  ;;  %v8659_v2 = vld [vmem:[#allocation42_spill] sm:$0xff] }
 0x201   : > { %vm1720_vm11 = vcmp.lt.f32.partialorder %v7178_v11, 0.0  ;;  %v1914_v0 = vceil.f32 %v7188_v20  ;;  %v2106_v49 = vfloor.f32 %v7188_v20  ;;  %v2511_v13 = vmin.f32 %v7196_v17, 127.0  ;;  %5532 = vmatprep.subr.msk.bf16.mxu0 %vm558_vm0, %v2748_v14 }
 0x202   : > { %v7204_v8 = vsel %vm1745_vm10, %v1937_v45, %v2129_v12  ;;  %v7207_v55 = vmax.f32 %v6741_v31, 0.0  ;;  %5536 = vmatprep.subr.msk.bf16.mxu1 %vm558_vm0, %v2750_v38  ;;  %v2627_v61 = vmin.f32 %v7143_v48, 127.0  ;;  %vm1744_vm12 = vcmp.lt.f32.partialorder %v1552_v34, 0.0 }
 0x203   : > { %v2651_v25 = vmin.f32 %v2459_v23, 127.0  ;;  %v2629_v57 = vmin.f32 %v7145_v1, 127.0  ;;  %v2653_v41 = vmin.f32 %v2461_v9, 127.0  ;;  %v1936_v28 = vceil.f32 %v1552_v34 }
 0x204   : > { %v1575_v59 = vmax.f32 %v6761_v35, 0.0  ;;  %v1577_v27 = vmax.f32 %v6766_v15, 0.0  ;;  %v7216_v39 = vmax.f32 %v6768_v19, 0.0  ;;  %vm1722_vm13 = vcmp.lt.f32.partialorder %v7188_v20, 0.0  ;;  %v8657_v20 = vld [vmem:[#allocation40_spill] sm:$0xff] }
 0x205   : > { %v2747_v31 = vpack.c.bf16 %v2651_v25, %v2627_v61  ;;  %v2749_v37 = vpack.c.bf16 %v2653_v41, %v2629_v57  ;;  %v1599_v50 = vmax.f32 %v6775_v21, 0.0  ;;  %v1601_v48 = vmax.f32 %v6781_v18, 0.0  ;;  %v8655_v61 = vld [vmem:[#allocation24_spill] sm:$0xff] }
 0x206   : > { %vm1767_vm14 = vcmp.lt.f32.partialorder %v1575_v59, 0.0  ;;  %v1959_v26 = vceil.f32 %v1575_v59  ;;  %v2151_v1 = vfloor.f32 %v1575_v59  ;;  %vm1769_vm15 = vcmp.lt.f32.partialorder %v1577_v27, 0.0 }
 0x207   : > { %v2862_v46 = vsel %vm558_vm0, %v2747_v31, 0  ;;  %v2868_v35 = vsel %vm558_vm0, %v2749_v37, 0  ;;  %v1961_v15 = vceil.f32 %v1577_v27  ;;  %v2153_v56 = vfloor.f32 %v1577_v27  ;;  %v7253_v12 = vpop.f32.mrb[96].mxu1 }
 0x208   : > { %v2513_v19 = vmin.f32 %v7204_v8, 127.0  ;;  %v2128_v42 = vfloor.f32 %v1552_v34  ;;  %vm1746_vm1 = vcmp.lt.f32.partialorder %v7207_v55, 0.0  ;;  %v1938_v7 = vceil.f32 %v7207_v55  ;;  %3380 = vmatpush1.bf16.msra.mxu0 %v2862_v46  ;;  %3441 = vmatpush1.bf16.msra.mxu1 %v2868_v35  ;;  %v7264_v34 = vpop.f32.mrb[97].mxu1 }
 0x209   : > { %v2130_v21 = vfloor.f32 %v7207_v55  ;;  %v7227_v18 = vsel %vm1767_vm14, %v1959_v26, %v2151_v1  ;;  %v1960_v36 = vceil.f32 %v7216_v39  ;;  %v7231_v63 = vmax.f32 %v8653_v51, 0.0 }
 0x20a   : > { %v7233_v30 = vsel %vm1769_vm15, %v1961_v15, %v2153_v56  ;;  %v2152_v29 = vfloor.f32 %v7216_v39  ;;  %vm1791_vm2 = vcmp.lt.f32.partialorder %v1599_v50, 0.0  ;;  %v1983_v4 = vceil.f32 %v1599_v50 }
 0x20b   : > { %5533 = vmatmul.mubr.msk.bf16.vlgmr.msra.gmra.mrb[144].mxu0 %vm2803_vm6, %v6802_v60  ;;  %5537 = vmatmul.mubr.msk.bf16.vlgmr.msra.gmra.mrb[144].mxu1 %vm2803_vm6, %v6802_v60  ;;  %v2175_v23 = vfloor.f32 %v1599_v50  ;;  %vm1793_vm3 = vcmp.lt.f32.partialorder %v1601_v48, 0.0  ;;  %v1985_v6 = vceil.f32 %v1601_v48  ;;  %v2177_v53 = vfloor.f32 %v1601_v48  ;;  %v7251_v60 = vpop.f32.mrb[96].mxu0 }
 0x20c   : > { %v2535_v9 = vmin.f32 %v7227_v18, 127.0  ;;  %v7242_v40 = vmax.f32 %v8654_v58, 0.0  ;;  %v2296_v5 = vsel %vm1720_vm11, %v1912_v16, %v2104_v44  ;;  %v2320_v45 = vsel %vm1744_vm12, %v1936_v28, %v2128_v42  ;;  %3415 = vmatprep.mubr.bf16.mxu0 %v8512_v33  ;;  %3476 = vmatprep.mubr.bf16.mxu1 %v8512_v33  ;;  %v7262_v16 = vpop.f32.mrb[97].mxu0  ;;  %v7273_v28 = vpop.f32.mrb[98].mxu1  ;;  %v8656_v42 = vld [vmem:[#allocation39_spill] sm:$0xff] }
 0x20d   : > { %vm1768_vm4 = vcmp.lt.f32.partialorder %v7216_v39, 0.0  ;;  %v1962_v43 = vceil.f32 %v7231_v63  ;;  %v7258_v14 = vsel %vm1791_vm2, %v1983_v4, %v2175_v23  ;;  %v7260_v38 = vsel %vm1793_vm3, %v1985_v6, %v2177_v53  ;;  %v7271_v41 = vpop.f32.mrb[98].mxu0  ;;  %v7282_v50 = vpop.f32.mrb[99].mxu1 }
 0x20e   : > { %v2512_v11 = vmin.f32 %v2320_v45, 127.0  ;;  %v2537_v44 = vmin.f32 %v7233_v30, 127.0  ;;  %v2154_v8 = vfloor.f32 %v7231_v63  ;;  %v7269_v25 = vmax.f32 %v8655_v61, 0.0  ;;  %v7280_v37 = vpop.f32.mrb[99].mxu0 }
 0x20f   : > { %v2488_v57 = vmin.f32 %v2296_v5, 127.0  ;;  %vm1770_vm5 = vcmp.lt.f32.partialorder %v7231_v63, 0.0  ;;  %v2559_v59 = vmin.f32 %v7258_v14, 127.0  ;;  %v2561_v27 = vmin.f32 %v7260_v38, 127.0  ;;  %v8667_v5 = vld [vmem:[#allocation50_spill] sm:$0xff] }
 0x210   : > { %vm1792_vm7 = vcmp.lt.f32.partialorder %v7242_v40, 0.0  ;;  %v1984_v31 = vceil.f32 %v7242_v40  ;;  %v2298_v26 = vsel %vm1722_vm13, %v1914_v0, %v2106_v49  ;;  %v2322_v1 = vsel %vm1746_vm1, %v1938_v7, %v2130_v21  ;;  %v8658_v49 = vld [vmem:[#allocation41_spill] sm:$0xff]  ;;  %v7318_v21 = vpop.f32.mrb[100].mxu1  ;;  %v7327_v53 = vpop.f32.mrb[100].mxu0 }
 0x211   : > { %v2680_v48 = vpack.c.bf16 %v2512_v11, %v2488_v57  ;;  %v2679_v46 = vpack.c.bf16 %v2511_v13, %v2487_v62  ;;  %v2490_v35 = vmin.f32 %v2298_v26, 127.0  ;;  %v2514_v15 = vmin.f32 %v2322_v1, 127.0  ;;  %v7329_v58 = vpop.f32.mrb[101].mxu1  ;;  %v7337_v57 = vpop.f32.mrb[101].mxu0 }
 0x212   : > { %v2681_v56 = vpack.c.bf16 %v2513_v19, %v2489_v32  ;;  %v1623_v51 = vmax.f32 %v8656_v42, 0.0  ;;  %v1625_v4 = vmax.f32 %v6817_v24, 0.0  ;;  %v7301_v0 = vmax.f32 %v8657_v20, 0.0  ;;  %v7313_v19 = vld [vmem:[%s8501_s2 + $0x8] sm:$0xff]   ;;  %v8662_v20 = vld [vmem:[#allocation45_spill] sm:$0xff] }
 0x213   : > { %3495 = vmatprep.subr.bf16.mxu0 %v2680_v48  ;;  %v7304_v55 = vmax.f32 %v8658_v49, 0.0  ;;  %v1647_v7 = vmax.f32 %v8659_v2, 0.0  ;;  %v2682_v17 = vpack.c.bf16 %v2514_v15, %v2490_v35  ;;  %5538 = vmatmul.mubr.msk.bf16.gmra.mrb[148].mxu1 %vm2803_vm6, %v6859_v10  ;;  %v2176_v22 = vfloor.f32 %v7242_v40  ;;  %v7339_v48 = vpop.f32.mrb[102].mxu1  ;;  %v7342_v35 = vpop.f32.mrb[102].mxu0 }
 0x214   : > { %3496 = vmatpush1.bf16.msra.mxu0 %v2679_v46  ;;  %vm1815_vm8 = vcmp.lt.f32.partialorder %v1623_v51, 0.0  ;;  %v2007_v62 = vceil.f32 %v1623_v51  ;;  %v2199_v13 = vfloor.f32 %v1623_v51  ;;  %vm1817_vm9 = vcmp.lt.f32.partialorder %v1625_v4, 0.0  ;;  %3486 = vmatprep.mubr.bf16.mxu1 %v8512_v33  ;;  %v7344_v15 = vpop.f32.mrb[103].mxu1  ;;  %v8661_v51 = vld [vmem:[#allocation44_spill] sm:$0xff] }
 0x215   : > { %v2009_v24 = vceil.f32 %v1625_v4  ;;  %v2201_v32 = vfloor.f32 %v1625_v4  ;;  %5534 = vmatmul.mubr.msk.bf16.gmra.mrb[148].mxu0 %vm2803_vm6, %v7313_v19  ;;  %vm1794_vm10 = vcmp.lt.f32.partialorder %v7269_v25, 0.0  ;;  %v1986_v10 = vceil.f32 %v7269_v25  ;;  %3556 = vmatprep.subr.bf16.mxu1 %v2682_v17  ;;  %v7385_v63 = vld [vmem:[%s8501_s2 + $0x10] ss:$0 sps:$4 sm:$0x11]  }
 0x216   : > { %v2178_v23 = vfloor.f32 %v7269_v25  ;;  %v7324_v6 = vsel %vm1815_vm8, %v2007_v62, %v2199_v13  ;;  %3425 = vmatprep.mubr.bf16.mxu0 %v8512_v33  ;;  %3557 = vmatpush1.bf16.msra.mxu1 %v2681_v56  ;;  %v2008_v11 = vceil.f32 %v7301_v0  ;;  %v2200_v61 = vfloor.f32 %v7301_v0  ;;  %v8660_v56 = vld [vmem:[#allocation43_spill] sm:$0xff] }
 0x217   : > { %v7333_v45 = vsel %vm1817_vm9, %v2009_v24, %v2201_v32  ;;  %v2010_v26 = vceil.f32 %v7304_v55  ;;  %vm1839_vm11 = vcmp.lt.f32.partialorder %v1647_v7, 0.0  ;;  %v2031_v1 = vceil.f32 %v1647_v7 }
 0x218   : > { %v2223_v46 = vfloor.f32 %v1647_v7  ;;  %v1649_v42 = vmax.f32 %v8660_v56, 0.0  ;;  %v7348_v4 = vmax.f32 %v8661_v51, 0.0  ;;  %v7351_v49 = vmax.f32 %v8662_v20, 0.0  ;;  %v7359_v7 = vpop.f32.mrb[103].mxu0 }
 0x219   : > { %v2344_v2 = vsel %vm1768_vm4, %v1960_v36, %v2152_v29  ;;  %v2202_v62 = vfloor.f32 %v7304_v55  ;;  %v2368_v24 = vsel %vm1792_vm7, %v1984_v31, %v2176_v22  ;;  %v2346_v39 = vsel %vm1770_vm5, %v1962_v43, %v2154_v8  ;;  %v7390_v43 = vpop.f32.mrb[104].mxu1  ;;  %v8666_v36 = vld [vmem:[#allocation49_spill] sm:$0xff] }
 0x21a   : > { %v7363_v13 = vsel %vm1839_vm11, %v2031_v1, %v2223_v46  ;;  %vm1841_vm12 = vcmp.lt.f32.partialorder %v1649_v42, 0.0  ;;  %v2033_v32 = vceil.f32 %v1649_v42  ;;  %v2225_v56 = vfloor.f32 %v1649_v42 }
 0x21b   : > { %v2032_v29 = vceil.f32 %v7348_v4  ;;  %v2224_v1 = vfloor.f32 %v7348_v4  ;;  %v2536_v46 = vmin.f32 %v2344_v2, 127.0  ;;  %5539 = vmatmul.mubr.msk.bf16.gmra.mrb[152].mxu1 %vm2803_vm6, %v6918_v52  ;;  %v2034_v31 = vceil.f32 %v7351_v49  ;;  %v7401_v2 = vpop.f32.mrb[104].mxu0 }
 0x21c   : > { %v7378_v40 = vsel %vm1841_vm12, %v2033_v32, %v2225_v56  ;;  %v2226_v22 = vfloor.f32 %v7351_v49  ;;  %v2560_v42 = vmin.f32 %v2368_v24, 127.0  ;;  %3588 = vmatprep.mubr.bf16.mxu1 %v8512_v33  ;;  %vm1816_vm13 = vcmp.lt.f32.partialorder %v7301_v0, 0.0  ;;  %v7403_v24 = vpop.f32.mrb[105].mxu1 }
 0x21d   : > { %5535 = vmatmul.mubr.msk.bf16.gmra.mrb[152].mxu0 %vm2803_vm6, %v7385_v63  ;;  %v2370_v8 = vsel %vm1794_vm10, %v1986_v10, %v2178_v23  ;;  %v2538_v51 = vmin.f32 %v2346_v39, 127.0  ;;  %v2703_v20 = vpack.c.bf16 %v2559_v59, %v2535_v9  ;;  %vm1840_vm14 = vcmp.lt.f32.partialorder %v7348_v4, 0.0  ;;  %v7411_v10 = vpop.f32.mrb[105].mxu0  ;;  %v3004_v9 = vpop.f32.mrb[106].mxu1  ;;  %v8663_v23 = vld [vmem:[#allocation46_spill] sm:$0xff] }
 0x21e   : > { %3527 = vmatprep.mubr.bf16.mxu0 %v8512_v33  ;;  %v2704_v32 = vpack.c.bf16 %v2560_v42, %v2536_v46  ;;  %v2562_v56 = vmin.f32 %v2370_v8, 127.0  ;;  %v2705_v25 = vpack.c.bf16 %v2561_v27, %v2537_v44  ;;  %v1671_v18 = vmax.f32 %v6864_v54, 0.0  ;;  %v8664_v46 = vld [vmem:[#allocation47_spill] sm:$0xff]  ;;  %v2943_v8 = vpop.f32.mrb[106].mxu0  ;;  %v3005_v30 = vpop.f32.mrb[107].mxu1 }
 0x21f   : > { %vm1818_vm15 = vcmp.lt.f32.partialorder %v7304_v55, 0.0  ;;  %v1673_v14 = vmax.f32 %v6873_v3, 0.0  ;;  %v1672_v59 = vmax.f32 %v6875_v47, 0.0  ;;  %v1674_v39 = vmax.f32 %v8663_v23, 0.0  ;;  %v2944_v27 = vpop.f32.mrb[107].mxu0 }
 0x220   : > { %v1695_v42 = vmax.f32 %v8664_v46, 0.0  ;;  %vm1842_vm1 = vcmp.lt.f32.partialorder %v7351_v49, 0.0  ;;  %3497 = vmatprep.subr.bf16.mxu0 %v2704_v32  ;;  %v2706_v38 = vpack.c.bf16 %v2562_v56, %v2538_v51  ;;  %vm1863_vm2 = vcmp.lt.f32.partialorder %v1671_v18, 0.0 }
 0x221   : > { %v2055_v54 = vceil.f32 %v1671_v18  ;;  %v2247_v44 = vfloor.f32 %v1671_v18  ;;  %3498 = vmatpush1.bf16.msra.mxu0 %v2703_v20  ;;  %vm1865_vm3 = vcmp.lt.f32.partialorder %v1673_v14, 0.0  ;;  %v2057_v9 = vceil.f32 %v1673_v14  ;;  %v8665_v18 = vld [vmem:[#allocation48_spill] sm:$0xff] }
 0x222   : > { %v2249_v3 = vfloor.f32 %v1673_v14  ;;  %vm1864_vm4 = vcmp.lt.f32.partialorder %v1672_v59, 0.0  ;;  %3558 = vmatprep.subr.bf16.mxu1 %v2706_v38  ;;  %v2056_v23 = vceil.f32 %v1672_v59  ;;  %v2248_v52 = vfloor.f32 %v1672_v59 }
 0x223   : > { %v2439_v47 = vsel %vm1863_vm2, %v2055_v54, %v2247_v44  ;;  %vm1866_vm5 = vcmp.lt.f32.partialorder %v1674_v39, 0.0  ;;  %3559 = vmatpush1.bf16.msra.mxu1 %v2705_v25  ;;  %v2058_v8 = vceil.f32 %v1674_v39  ;;  %v2250_v30 = vfloor.f32 %v1674_v39  ;;  %v7422_v25 = vpop.permute.xlu0 %2767 }
 0x224   : > { %v2441_v46 = vsel %vm1865_vm3, %v2057_v9, %v2249_v3  ;;  %vm1887_vm7 = vcmp.lt.f32.partialorder %v1695_v42, 0.0  ;;  %v2440_v51 = vsel %vm1864_vm4, %v2056_v23, %v2248_v52  ;;  %v2079_v32 = vceil.f32 %v1695_v42 }
 0x225   : > { %v2271_v56 = vfloor.f32 %v1695_v42  ;;  %v1697_v27 = vmax.f32 %v8665_v18, 0.0  ;;  %v2632_v20 = vmin.f32 %v2440_v51, 127.0  ;;  %v2442_v17 = vsel %vm1866_vm5, %v2058_v8, %v2250_v30 }
 0x226   : > { %v1696_v14 = vmax.f32 %v8666_v36, 0.0  ;;  %v1698_v38 = vmax.f32 %v8667_v5, 0.0  ;;  %v2634_v54 = vmin.f32 %v2442_v17, 127.0  ;;  %v2392_v5 = vsel %vm1816_vm13, %v2008_v11, %v2200_v61 }
 0x227   : > { %v2463_v44 = vsel %vm1887_vm7, %v2079_v32, %v2271_v56  ;;  %vm1889_vm8 = vcmp.lt.f32.partialorder %v1697_v27, 0.0  ;;  %v2081_v59 = vceil.f32 %v1697_v27  ;;  %v2273_v9 = vfloor.f32 %v1697_v27 }
 0x228   : > { %vm1888_vm9 = vcmp.lt.f32.partialorder %v1696_v14, 0.0  ;;  %v2080_v39 = vceil.f32 %v1696_v14  ;;  %v2272_v52 = vfloor.f32 %v1696_v14  ;;  %vm1890_vm10 = vcmp.lt.f32.partialorder %v1698_v38, 0.0 }
 0x229   : > { %v2082_v42 = vceil.f32 %v1698_v38  ;;  %v2274_v3 = vfloor.f32 %v1698_v38  ;;  %v2465_v17 = vsel %vm1889_vm8, %v2081_v59, %v2273_v9  ;;  %v2416_v23 = vsel %vm1840_vm14, %v2032_v29, %v2224_v1  ;;  %v7456_v38 = vpop.permute.xlu0 %2772 }
 0x22a   : > { %v2464_v36 = vsel %vm1888_vm9, %v2080_v39, %v2272_v52  ;;  %v2584_v8 = vmin.f32 %v2392_v5, 127.0  ;;  %v2608_v32 = vmin.f32 %v2416_v23, 127.0  ;;  %v2394_v0 = vsel %vm1818_vm15, %v2010_v26, %v2202_v62 }
 0x22b   : > { %v2656_v30 = vmin.f32 %v2464_v36, 127.0  ;;  %v2466_v51 = vsel %vm1890_vm10, %v2082_v42, %v2274_v3  ;;  %v2418_v61 = vsel %vm1842_vm1, %v2034_v31, %v2226_v22  ;;  %v2586_v4 = vmin.f32 %v2394_v0, 127.0 }
 0x22c   : > { %v2658_v11 = vmin.f32 %v2466_v51, 127.0  ;;  %v8668_v29 = vmin.f32 %v7324_v6, 127.0  ;;  %v8669_v1 = vmin.f32 %v7363_v13, 127.0  ;;  %v2728_v18 = vpack.c.bf16 %v2608_v32, %v2584_v8 }
 0x22d   : > { %v2610_v27 = vmin.f32 %v2418_v61, 127.0  ;;  %v8670_v14 = vmin.f32 %v7333_v45, 127.0  ;;  %v8671_v55 = vmin.f32 %v7378_v40, 127.0  ;;  %v2752_v62 = vpack.c.bf16 %v2656_v30, %v2632_v20 }
 0x22e   : > { %v2727_v56 = vpack.c.bf16 %v8669_v1, %v8668_v29  ;;  %v2754_v59 = vpack.c.bf16 %v2658_v11, %v2634_v54  ;;  %v2631_v9 = vmin.f32 %v2439_v47, 127.0  ;;  %v2655_v49 = vmin.f32 %v2463_v44, 127.0  ;;  %3499 = vmatprep.subr.bf16.mxu0 %v2728_v18  ;;  %v7466_v47 = vpop.permute.xlu1 %2777 }
 0x22f   : > { %v2729_v26 = vpack.c.bf16 %v8671_v55, %v8670_v14  ;;  %v2633_v31 = vmin.f32 %v2441_v46, 127.0  ;;  %v2730_v22 = vpack.c.bf16 %v2610_v27, %v2586_v4  ;;  %v2657_v6 = vmin.f32 %v2465_v17, 127.0  ;;  %v7493_v4 = vpop.permute.xlu0 %2787 }
 0x230   : > { %v2920_v13 = vadd.f32 %v7251_v60, %v7422_v25  ;;  %v2981_v39 = vadd.f32 %v7253_v12, %v7422_v25  ;;  %3500 = vmatpush1.bf16.msra.mxu0 %v2727_v56  ;;  %v2751_v45 = vpack.c.bf16 %v2655_v49, %v2631_v9  ;;  %v2922_v40 = vadd.f32 %v7262_v16, %v7422_v25 }
 0x231   : > { %v2983_v20 = vadd.f32 %v7264_v34, %v7422_v25  ;;  %v2926_v46 = vadd.f32 %v7280_v37, %v7456_v38  ;;  %3560 = vmatprep.subr.bf16.mxu1 %v2730_v22  ;;  %5540 = vmatprep.subr.msk.bf16.mxu0 %vm558_vm0, %v2752_v62  ;;  %v2753_v60 = vpack.c.bf16 %v2657_v6, %v2633_v31 }
 0x232   : > { %v3617_v54 = vmax.f32 %v2920_v13, 0.0  ;;  %v3619_v44 = vmax.f32 %v2981_v39, 0.0  ;;  %3561 = vmatpush1.bf16.msra.mxu1 %v2729_v26  ;;  %v2874_v12 = vsel %vm558_vm0, %v2751_v45, 0  ;;  %v7472_v52 = vmax.f32 %v2922_v40, 0.0  ;;  %v7491_v61 = vpop.permute.xlu1 %2782 }
 0x233   : > { %v7474_v16 = vmax.f32 %v2983_v20, 0.0  ;;  %v7476_v42 = vmax.f32 %v2926_v46, 0.0  ;;  %5544 = vmatprep.subr.msk.bf16.mxu1 %vm558_vm0, %v2754_v59  ;;  %v2880_v34 = vsel %vm558_vm0, %v2753_v60, 0  ;;  %v2987_v36 = vadd.f32 %v7282_v50, %v7456_v38  ;;  %v5603_v50 = vld [vmem:[%s8501_s2] sm:$0xff]  }
 0x234   : > { %vm3737_vm11 = vcmp.lt.f32.partialorder %v3617_v54, 0.0  ;;  %v3857_v37 = vceil.f32 %v3617_v54  ;;  %v3977_v3 = vfloor.f32 %v3617_v54  ;;  %3502 = vmatpush1.bf16.msra.mxu0 %v2874_v12  ;;  %vm3739_vm12 = vcmp.lt.f32.partialorder %v3619_v44, 0.0 }
 0x235   : > { %v3859_v5 = vceil.f32 %v3619_v44  ;;  %v3979_v17 = vfloor.f32 %v3619_v44  ;;  %v3858_v8 = vceil.f32 %v7472_v52  ;;  %v3978_v30 = vfloor.f32 %v7472_v52 }
 0x236   : > { %v7482_v23 = vsel %vm3737_vm11, %v3857_v37, %v3977_v3  ;;  %3563 = vmatpush1.bf16.msra.mxu1 %v2880_v34  ;;  %v3860_v0 = vceil.f32 %v7474_v16  ;;  %v3980_v11 = vfloor.f32 %v7474_v16  ;;  %vm3738_vm0 = vcmp.lt.f32.partialorder %v7472_v52, 0.0 }
 0x237   : > { %v4217_v51 = vmin.f32 %v7482_v23, 127.0  ;;  %v7487_v32 = vsel %vm3739_vm12, %v3859_v5, %v3979_v17  ;;  %5541 = vmatmul.mubr.msk.bf16.vlgmr.msra.gmra.mrb[156].mxu0 %vm2803_vm6, %v5603_v50  ;;  %vm3740_vm13 = vcmp.lt.f32.partialorder %v7474_v16, 0.0  ;;  %vm3762_vm14 = vcmp.lt.f32.partialorder %v7476_v42, 0.0 }
 0x238   : > { %v4219_v29 = vmin.f32 %v7487_v32, 127.0  ;;  %v3882_v1 = vceil.f32 %v7476_v42  ;;  %v4002_v56 = vfloor.f32 %v7476_v42  ;;  %3537 = vmatprep.mubr.bf16.mxu0 %v8512_v33  ;;  %v7506_v18 = vmax.f32 %v2987_v36, 0.0 }
 0x239   : > { %v2930_v27 = vadd.f32 %v7327_v53, %v7466_v47  ;;  %v2991_v14 = vadd.f32 %v7318_v21, %v7466_v47  ;;  %v2932_v55 = vadd.f32 %v7337_v57, %v7466_v47  ;;  %5545 = vmatmul.mubr.msk.bf16.vlgmr.msra.gmra.mrb[156].mxu1 %vm2803_vm6, %v5603_v50  ;;  %v2993_v26 = vadd.f32 %v7329_v58, %v7466_v47  ;;  %v7543_v44 = vpop.f32.mrb[108].mxu0 }
 0x23a   : > { %v2936_v62 = vadd.f32 %v7359_v7, %v7491_v61  ;;  %v2997_v59 = vadd.f32 %v7344_v15, %v7491_v61  ;;  %v2942_v53 = vadd.f32 %v7411_v10, %v7493_v4  ;;  %3598 = vmatprep.mubr.bf16.mxu1 %v8512_v33  ;;  %vm3764_vm15 = vcmp.lt.f32.partialorder %v7506_v18, 0.0  ;;  %v7550_v3 = vpop.f32.mrb[109].mxu0 }
 0x23b   : > { %v3884_v21 = vceil.f32 %v7506_v18  ;;  %v4004_v57 = vfloor.f32 %v7506_v18  ;;  %v3665_v9 = vmax.f32 %v2930_v27, 0.0  ;;  %v3667_v49 = vmax.f32 %v2991_v14, 0.0  ;;  %v7559_v50 = vpop.f32.mrb[110].mxu0 }
 0x23c   : > { %v3666_v58 = vmax.f32 %v2932_v55, 0.0  ;;  %v7527_v31 = vmax.f32 %v2993_v26, 0.0  ;;  %v7529_v7 = vmax.f32 %v2936_v62, 0.0  ;;  %v7531_v6 = vmax.f32 %v2997_v59, 0.0  ;;  %v7578_v26 = vpop.f32.mrb[108].mxu1 }
 0x23d   : > { %vm3785_vm1 = vcmp.lt.f32.partialorder %v3665_v9, 0.0  ;;  %v3905_v15 = vceil.f32 %v3665_v9  ;;  %v4025_v22 = vfloor.f32 %v3665_v9  ;;  %vm3787_vm2 = vcmp.lt.f32.partialorder %v3667_v49, 0.0  ;;  %v7585_v42 = vpop.f32.mrb[109].mxu1 }
 0x23e   : > { %v3907_v10 = vceil.f32 %v3667_v49  ;;  %v4027_v13 = vfloor.f32 %v3667_v49  ;;  %vm3786_vm3 = vcmp.lt.f32.partialorder %v3666_v58, 0.0  ;;  %v3906_v45 = vceil.f32 %v3666_v58 }
 0x23f   : > { %v7533_v39 = vsel %vm3785_vm1, %v3905_v15, %v4025_v22  ;;  %v4026_v40 = vfloor.f32 %v3666_v58  ;;  %vm3788_vm4 = vcmp.lt.f32.partialorder %v7527_v31, 0.0  ;;  %5542 = vmatmul.mubr.msk.bf16.gmra.mrb[160].mxu0 %vm2803_vm6, %v7313_v19  ;;  %v3908_v60 = vceil.f32 %v7527_v31 }
 0x240   : > { %v4265_v20 = vmin.f32 %v7533_v39, 127.0  ;;  %v7539_v46 = vsel %vm3787_vm2, %v3907_v10, %v4027_v13  ;;  %v4028_v54 = vfloor.f32 %v7527_v31  ;;  %3547 = vmatprep.mubr.bf16.mxu0 %v8512_v33  ;;  %vm3810_vm5 = vcmp.lt.f32.partialorder %v7529_v7, 0.0 }
 0x241   : > { %v4267_v12 = vmin.f32 %v7539_v46, 127.0  ;;  %v3930_v34 = vceil.f32 %v7529_v7  ;;  %v4050_v37 = vfloor.f32 %v7529_v7  ;;  %5546 = vmatmul.mubr.msk.bf16.gmra.mrb[160].mxu1 %vm2803_vm6, %v7313_v19  ;;  %vm3812_vm7 = vcmp.lt.f32.partialorder %v7531_v6, 0.0 }
 0x242   : > { %v3932_v5 = vceil.f32 %v7531_v6  ;;  %v4052_v17 = vfloor.f32 %v7531_v6  ;;  %v7557_v36 = vmax.f32 %v2942_v53, 0.0  ;;  %3608 = vmatprep.mubr.bf16.mxu1 %v8512_v33  ;;  %v3003_v27 = vadd.f32 %v7403_v24, %v7493_v4  ;;  %v7580_v24 = vpop.f32.mrb[111].mxu0 }
 0x243   : > { %v4098_v19 = vsel %vm3738_vm0, %v3858_v8, %v3978_v30  ;;  %v4122_v14 = vsel %vm3762_vm14, %v3882_v1, %v4002_v56  ;;  %v4100_v55 = vsel %vm3740_vm13, %v3860_v0, %v3980_v11  ;;  %v4124_v56 = vsel %vm3764_vm15, %v3884_v21, %v4004_v57  ;;  %v7589_v0 = vpop.f32.mrb[110].mxu1  ;;  %v7602_v13 = vpop.f32.mrb[112].mxu0 }
 0x244   : > { %vm3834_vm8 = vcmp.lt.f32.partialorder %v7557_v36, 0.0  ;;  %v3954_v62 = vceil.f32 %v7557_v36  ;;  %v4074_v52 = vfloor.f32 %v7557_v36  ;;  %v4218_v8 = vmin.f32 %v4098_v19, 127.0  ;;  %v7596_v49 = vpop.f32.mrb[111].mxu1 }
 0x245   : > { %v3716_v30 = vmax.f32 %v3003_v27, 0.0  ;;  %v4242_v1 = vmin.f32 %v4122_v14, 127.0  ;;  %v4220_v16 = vmin.f32 %v4100_v55, 127.0  ;;  %v4244_v11 = vmin.f32 %v4124_v56, 127.0  ;;  %v7609_v27 = vpop.f32.mrb[113].mxu0  ;;  %v7616_v6 = vpop.f32.mrb[112].mxu1 }
 0x246   : > { %v2924_v59 = vadd.f32 %v7271_v41, %v7456_v38  ;;  %v2985_v53 = vadd.f32 %v7273_v28, %v7456_v38  ;;  %v4146_v9 = vsel %vm3786_vm3, %v3906_v45, %v4026_v40  ;;  %v4170_v41 = vsel %vm3810_vm5, %v3930_v34, %v4050_v37  ;;  %v7613_v37 = vpop.f32.mrb[114].mxu0 }
 0x247   : > { %vm3836_vm9 = vcmp.lt.f32.partialorder %v3716_v30, 0.0  ;;  %v3956_v15 = vceil.f32 %v3716_v30  ;;  %v4076_v22 = vfloor.f32 %v3716_v30  ;;  %v4338_v10 = vpack.c.bf16 %v4242_v1, %v4218_v8  ;;  %5543 = vmatmul.mubr.msk.bf16.gmra.mrb[164].mxu0 %vm2803_vm6, %v7385_v63  ;;  %v7624_v8 = vpop.f32.mrb[113].mxu1 }
 0x248   : > { %v4340_v18 = vpack.c.bf16 %v4244_v11, %v4220_v16  ;;  %v3641_v21 = vmax.f32 %v2924_v59, 0.0  ;;  %v3643_v57 = vmax.f32 %v2985_v53, 0.0  ;;  %v4266_v28 = vmin.f32 %v4146_v9, 127.0  ;;  %4552 = vmatprep.mubr.bf16.mxu0 %v8512_v33  ;;  %v7628_v11 = vpop.f32.mrb[114].mxu1 }
 0x249   : > { %4520 = vmatprep.subr.bf16.mxu0 %v4338_v10  ;;  %v4290_v58 = vmin.f32 %v4170_v41, 127.0  ;;  %v4148_v45 = vsel %vm3788_vm4, %v3908_v60, %v4028_v54  ;;  %v4172_v40 = vsel %vm3812_vm7, %v3932_v5, %v4052_v17  ;;  %5547 = vmatmul.mubr.msk.bf16.gmra.mrb[164].mxu1 %vm2803_vm6, %v7385_v63  ;;  %v7618_v5 = vpop.f32.mrb[115].mxu0  ;;  %v2934_v63 = vadd.f32 %v7342_v35, %v7491_v61 }
 0x24a   : > { %4571 = vmatprep.subr.bf16.mxu1 %v4340_v18  ;;  %vm3761_vm10 = vcmp.lt.f32.partialorder %v3641_v21, 0.0  ;;  %v3881_v7 = vceil.f32 %v3641_v21  ;;  %v4001_v34 = vfloor.f32 %v3641_v21  ;;  %vm3763_vm11 = vcmp.lt.f32.partialorder %v3643_v57, 0.0  ;;  %4603 = vmatprep.mubr.bf16.mxu1 %v8512_v33  ;;  %v7630_v18 = vpop.f32.mrb[115].mxu1  ;;  %v7640_v41 = vpop.f32.mrb[116].mxu0 }
 0x24b   : > { %v3883_v19 = vceil.f32 %v3643_v57  ;;  %v4003_v31 = vfloor.f32 %v3643_v57  ;;  %v4362_v60 = vpack.c.bf16 %v4290_v58, %v4266_v28  ;;  %v4268_v54 = vmin.f32 %v4148_v45, 127.0 }
 0x24c   : > { %v4121_v17 = vsel %vm3761_vm10, %v3881_v7, %v4001_v34  ;;  %v4292_v14 = vmin.f32 %v4172_v40, 127.0  ;;  %v2995_v55 = vadd.f32 %v7339_v48, %v7491_v61  ;;  %v4194_v16 = vsel %vm3834_vm8, %v3954_v62, %v4074_v52  ;;  %v7649_v34 = vpop.f32.mrb[116].mxu1 }
 0x24d   : > { %v4241_v1 = vmin.f32 %v4121_v17, 127.0  ;;  %v4123_v56 = vsel %vm3763_vm11, %v3883_v19, %v4003_v31  ;;  %vm4445_vm6 = vcmask 1040384   ;;  %v3689_v9 = vmax.f32 %v2934_v63, 0.0 }
 0x24e   : > { %v4243_v59 = vmin.f32 %v4123_v56, 127.0  ;;  %v4364_v53 = vpack.c.bf16 %v4292_v14, %v4268_v54  ;;  %v3691_v10 = vmax.f32 %v2995_v55, 0.0  ;;  %v4314_v48 = vmin.f32 %v4194_v16, 127.0  ;;  %v7651_v14 = vpop.f32.mrb[117].mxu1 }
 0x24f   : > { %v4337_v35 = vpack.c.bf16 %v4241_v1, %v4217_v51  ;;  %v7635_v21 = vsel %vm4445_vm6, 65535, %v8512_v33  ;;  %v4196_v57 = vsel %vm3836_vm9, %v3956_v15, %v4076_v22  ;;  %vm3809_vm12 = vcmp.lt.f32.partialorder %v3689_v9, 0.0  ;;  %v7642_v51 = vpop.f32.mrb[117].mxu0  ;;  %v3126_v1 = vpop.f32.mrb[118].mxu1 }
 0x250   : > { %v4339_v36 = vpack.c.bf16 %v4243_v59, %v4219_v29  ;;  %v3929_v62 = vceil.f32 %v3689_v9  ;;  %v4049_v52 = vfloor.f32 %v3689_v9  ;;  %vm3811_vm0 = vcmp.lt.f32.partialorder %v3691_v10, 0.0  ;;  %v3065_v15 = vpop.f32.mrb[118].mxu0 }
 0x251   : > { %4521 = vmatpush1.bf16.msra.mxu0 %v4337_v35  ;;  %v3931_v28 = vceil.f32 %v3691_v10  ;;  %v4051_v58 = vfloor.f32 %v3691_v10  ;;  %v4386_v23 = vpack.c.bf16 %v4314_v48, %v4314_v48  ;;  %v4316_v30 = vmin.f32 %v4196_v57, 127.0  ;;  %v3066_v19 = vpop.f32.mrb[119].mxu0 }
 0x252   : > { %4572 = vmatpush1.bf16.msra.mxu1 %v4339_v36  ;;  %4522 = vmatprep.subr.bf16.mxu0 %v4362_v60  ;;  %v4169_v45 = vsel %vm3809_vm12, %v3929_v62, %v4049_v52  ;;  %v2940_v32 = vadd.f32 %v7401_v2, %v7493_v4  ;;  %v3001_v29 = vadd.f32 %v7390_v43, %v7493_v4  ;;  %vm4438_vm2 = vcmask 269312  }
 0x253   : > { %4573 = vmatprep.subr.bf16.mxu1 %v4364_v53  ;;  %v4289_v22 = vmin.f32 %v4169_v45, 127.0  ;;  %v4171_v40 = vsel %vm3811_vm0, %v3931_v28, %v4051_v58  ;;  %v4452_v7 = vand.u32 %v7635_v21, %v4386_v23  ;;  %v4388_v54 = vpack.c.bf16 %v4316_v30, %v4316_v30  ;;  %v3127_v53 = vpop.f32.mrb[119].mxu1 }
 0x254   : > { %v4291_v31 = vmin.f32 %v4171_v40, 127.0  ;;  %v3713_v60 = vmax.f32 %v2940_v32, 0.0  ;;  %v3715_v17 = vmax.f32 %v3001_v29, 0.0  ;;  %v3042_v43 = vadd.f32 %v7543_v44, %v7422_v25 }
 0x255   : > { %v4361_v2 = vpack.c.bf16 %v4289_v22, %v4265_v20  ;;  %v3103_v63 = vadd.f32 %v7578_v26, %v7422_v25  ;;  %v3044_v55 = vadd.f32 %v7550_v3, %v7422_v25  ;;  %v4458_v16 = vand.u32 %v7635_v21, %v4388_v54 }
 0x256   : > { %v4363_v56 = vpack.c.bf16 %v4291_v31, %v4267_v12  ;;  %vm3833_vm13 = vcmp.lt.f32.partialorder %v3713_v60, 0.0  ;;  %v3953_v59 = vceil.f32 %v3713_v60  ;;  %v4073_v39 = vfloor.f32 %v3713_v60 }
 0x257   : > { %4523 = vmatpush1.bf16.msra.mxu0 %v4361_v2  ;;  %vm3835_vm14 = vcmp.lt.f32.partialorder %v3715_v17, 0.0  ;;  %v3955_v20 = vceil.f32 %v3715_v17  ;;  %v4075_v44 = vfloor.f32 %v3715_v17  ;;  %v3621_v26 = vmax.f32 %v3042_v43, 0.0 }
 0x258   : > { %4574 = vmatpush1.bf16.msra.mxu1 %v4363_v56  ;;  %4524 = vmatprep.subr.bf16.mxu0 %v4452_v7  ;;  %v3623_v9 = vmax.f32 %v3103_v63, 0.0  ;;  %v4193_v3 = vsel %vm3833_vm13, %v3953_v59, %v4073_v39  ;;  %v7664_v35 = vmax.f32 %v3044_v55, 0.0  ;;  %v3105_v46 = vadd.f32 %v7585_v42, %v7422_v25 }
 0x259   : > { %4575 = vmatprep.subr.bf16.mxu1 %v4458_v16  ;;  %v4195_v10 = vsel %vm3835_vm14, %v3955_v20, %v4075_v44  ;;  %v4313_v12 = vmin.f32 %v4193_v3, 127.0  ;;  %v3046_v57 = vadd.f32 %v7559_v50, %v7456_v38  ;;  %v3107_v36 = vadd.f32 %v7589_v0, %v7456_v38  ;;  %v7678_v50 = vld [vmem:[%s8503_s4] sm:$0xff]   ;;  %v7721_v3 = vld [vmem:[%s8503_s4 + $0x8] ss:$0 sps:$4 sm:$0x33]  }
 0x25a   : > { %v4315_v48 = vmin.f32 %v4195_v10, 127.0  ;;  %v3861_v62 = vceil.f32 %v3621_v26  ;;  %v3981_v52 = vfloor.f32 %v3621_v26  ;;  %v3863_v28 = vceil.f32 %v3623_v9 }
 0x25b   : > { %v3983_v58 = vfloor.f32 %v3623_v9  ;;  %v4385_v23 = vpack.c.bf16 %v4313_v12, %v4313_v12  ;;  %vm3741_vm15 = vcmp.lt.f32.partialorder %v3621_v26, 0.0  ;;  %vm3743_vm1 = vcmp.lt.f32.partialorder %v3623_v9, 0.0 }
 0x25c   : > { %v4387_v45 = vpack.c.bf16 %v4315_v48, %v4315_v48  ;;  %v3862_v32 = vceil.f32 %v7664_v35  ;;  %v7680_v0 = vsel %vm3741_vm15, %v3861_v62, %v3981_v52  ;;  %v7684_v15 = vmax.f32 %v3105_v46, 0.0 }
 0x25d   : > { %v4449_v30 = vand.u32 %v7635_v21, %v4385_v23  ;;  %v7682_v29 = vsel %vm3743_vm1, %v3863_v28, %v3983_v58  ;;  %v3645_v22 = vmax.f32 %v3046_v57, 0.0  ;;  %v3647_v40 = vmax.f32 %v3107_v36, 0.0 }
 0x25e   : > { %v4455_v42 = vand.u32 %v7635_v21, %v4387_v45  ;;  %v3048_v7 = vadd.f32 %v7580_v24, %v7456_v38  ;;  %v3109_v19 = vadd.f32 %v7596_v49, %v7456_v38  ;;  %v3052_v31 = vadd.f32 %v7602_v13, %v7466_v47 }
 0x25f   : > { %4525 = vmatpush1.bf16.msra.mxu0 %v4449_v30  ;;  %vm3765_vm3 = vcmp.lt.f32.partialorder %v3645_v22, 0.0  ;;  %v3885_v54 = vceil.f32 %v3645_v22  ;;  %v4005_v60 = vfloor.f32 %v3645_v22  ;;  %v3113_v17 = vadd.f32 %v7616_v6, %v7466_v47 }
 0x260   : > { %4576 = vmatpush1.bf16.msra.mxu1 %v4455_v42  ;;  %vm3767_vm4 = vcmp.lt.f32.partialorder %v3647_v40, 0.0  ;;  %v3887_v2 = vceil.f32 %v3647_v40  ;;  %v4007_v43 = vfloor.f32 %v3647_v40  ;;  %v7694_v63 = vmax.f32 %v3048_v7, 0.0 }
 0x261   : > { %v3982_v24 = vfloor.f32 %v7664_v35  ;;  %v7701_v49 = vsel %vm3765_vm3, %v3885_v54, %v4005_v60  ;;  %v3669_v13 = vmax.f32 %v3052_v31, 0.0  ;;  %v3671_v55 = vmax.f32 %v3113_v17, 0.0 }
 0x262   : > { %5550 = vmatmul.mubr.msk.bf16.vlgmr.msra.gmra.mrb[168].mxu0 %vm4438_vm2, %v7678_v50  ;;  %v4221_v1 = vmin.f32 %v7680_v0, 127.0  ;;  %v4223_v6 = vmin.f32 %v7682_v29, 127.0  ;;  %v3864_v56 = vceil.f32 %v7684_v15  ;;  %v7706_v16 = vsel %vm3767_vm4, %v3887_v2, %v4007_v43 }
 0x263   : > { %5552 = vmatmul.mubr.msk.bf16.vlgmr.msra.gmra.mrb[168].mxu1 %vm4438_vm2, %v7678_v50  ;;  %4562 = vmatprep.mubr.bf16.mxu0 %v8512_v33  ;;  %v3984_v59 = vfloor.f32 %v7684_v15  ;;  %v4245_v53 = vmin.f32 %v7701_v49, 127.0  ;;  %v3886_v39 = vceil.f32 %v7694_v63  ;;  %v7713_v20 = vmax.f32 %v3109_v19, 0.0 }
 0x264   : > { %4613 = vmatprep.mubr.bf16.mxu1 %v8512_v33  ;;  %v4247_v44 = vmin.f32 %v7706_v16, 127.0  ;;  %vm3789_vm5 = vcmp.lt.f32.partialorder %v3669_v13, 0.0  ;;  %v3909_v26 = vceil.f32 %v3669_v13  ;;  %v4029_v9 = vfloor.f32 %v3669_v13 }
 0x265   : > { %vm3742_vm7 = vcmp.lt.f32.partialorder %v7664_v35, 0.0  ;;  %vm3766_vm8 = vcmp.lt.f32.partialorder %v7694_v63, 0.0  ;;  %vm3791_vm9 = vcmp.lt.f32.partialorder %v3671_v55, 0.0  ;;  %v3911_v10 = vceil.f32 %v3671_v55 }
 0x266   : > { %v4031_v46 = vfloor.f32 %v3671_v55  ;;  %v3054_v12 = vadd.f32 %v7609_v27, %v7466_v47  ;;  %v7725_v48 = vsel %vm3789_vm5, %v3909_v26, %v4029_v9  ;;  %v3115_v57 = vadd.f32 %v7624_v8, %v7466_v47 }
 0x267   : > { %v3056_v36 = vadd.f32 %v7613_v37, %v7491_v61  ;;  %v3117_v62 = vadd.f32 %v7628_v11, %v7491_v61  ;;  %v4006_v52 = vfloor.f32 %v7694_v63  ;;  %v3058_v27 = vadd.f32 %v7618_v5, %v7491_v61 }
 0x268   : > { %v7734_v28 = vsel %vm3791_vm9, %v3911_v10, %v4031_v46  ;;  %v7736_v58 = vmax.f32 %v3054_v12, 0.0  ;;  %v3888_v23 = vceil.f32 %v7713_v20  ;;  %v7741_v45 = vmax.f32 %v3115_v57, 0.0 }
 0x269   : > { %v3693_v8 = vmax.f32 %v3056_v36, 0.0  ;;  %v3695_v30 = vmax.f32 %v3117_v62, 0.0  ;;  %v4008_v37 = vfloor.f32 %v7713_v20  ;;  %v4269_v11 = vmin.f32 %v7725_v48, 127.0 }
 0x26a   : > { %5551 = vmatmul.mubr.msk.bf16.gmra.mrb[172].mxu0 %vm4438_vm2, %v7721_v3  ;;  %v4271_v42 = vmin.f32 %v7734_v28, 127.0  ;;  %v7750_v22 = vmax.f32 %v3058_v27, 0.0  ;;  %v3910_v5 = vceil.f32 %v7736_v58  ;;  %v4030_v40 = vfloor.f32 %v7736_v58 }
 0x26b   : > { %5553 = vmatmul.mubr.msk.bf16.gmra.mrb[172].mxu1 %vm4438_vm2, %v7721_v3  ;;  %v3912_v7 = vceil.f32 %v7741_v45  ;;  %vm3813_vm10 = vcmp.lt.f32.partialorder %v3693_v8, 0.0  ;;  %4654 = vmatprep.mubr.bf16.mxu0 %v8512_v33  ;;  %vm3744_vm11 = vcmp.lt.f32.partialorder %v7684_v15, 0.0  ;;  %vm3768_vm6 = vcmp.lt.f32.partialorder %v7713_v20, 0.0 }
 0x26c   : > { %4705 = vmatprep.mubr.bf16.mxu1 %v8512_v33  ;;  %v3933_v19 = vceil.f32 %v3693_v8  ;;  %v4053_v31 = vfloor.f32 %v3693_v8  ;;  %vm3815_vm12 = vcmp.lt.f32.partialorder %v3695_v30, 0.0  ;;  %v3935_v54 = vceil.f32 %v3695_v30 }
 0x26d   : > { %v4032_v60 = vfloor.f32 %v7741_v45  ;;  %v4055_v17 = vfloor.f32 %v3695_v30  ;;  %v3934_v2 = vceil.f32 %v7750_v22  ;;  %v4054_v43 = vfloor.f32 %v7750_v22 }
 0x26e   : > { %vm3790_vm0 = vcmp.lt.f32.partialorder %v7736_v58, 0.0  ;;  %v7763_v13 = vsel %vm3813_vm10, %v3933_v19, %v4053_v31  ;;  %vm3814_vm13 = vcmp.lt.f32.partialorder %v7750_v22, 0.0  ;;  %v3119_v55 = vadd.f32 %v7630_v18, %v7491_v61 }
 0x26f   : > { %v3062_v26 = vadd.f32 %v7640_v41, %v7493_v4  ;;  %v3123_v9 = vadd.f32 %v7649_v34, %v7493_v4  ;;  %vm3792_vm14 = vcmp.lt.f32.partialorder %v7741_v45, 0.0  ;;  %v4293_v10 = vmin.f32 %v7763_v13, 127.0 }
 0x270   : > { %v4175_v46 = vsel %vm3815_vm12, %v3935_v54, %v4055_v17  ;;  %v3064_v12 = vadd.f32 %v7642_v51, %v7493_v4  ;;  %v3125_v57 = vadd.f32 %v7651_v14, %v7493_v4  ;;  %v3696_v62 = vmax.f32 %v3119_v55, 0.0 }
 0x271   : > { %v4295_v36 = vmin.f32 %v4175_v46, 127.0  ;;  %v3717_v18 = vmax.f32 %v3062_v26, 0.0  ;;  %v3719_v27 = vmax.f32 %v3123_v9, 0.0  ;;  %v4102_v34 = vsel %vm3742_vm7, %v3862_v32, %v3982_v24 }
 0x272   : > { %v3718_v8 = vmax.f32 %v3064_v12, 0.0  ;;  %v3720_v41 = vmax.f32 %v3125_v57, 0.0  ;;  %v4126_v51 = vsel %vm3766_vm8, %v3886_v39, %v4006_v52  ;;  %vm3816_vm15 = vcmp.lt.f32.partialorder %v3696_v62, 0.0  ;;  %v3163_v52 = vpop.f32.mrb[120].mxu0  ;;  %v3224_v46 = vpop.f32.mrb[120].mxu1 }
 0x273   : > { %v3936_v14 = vceil.f32 %v3696_v62  ;;  %v4056_v30 = vfloor.f32 %v3696_v62  ;;  %vm3837_vm1 = vcmp.lt.f32.partialorder %v3717_v18, 0.0  ;;  %v3957_v19 = vceil.f32 %v3717_v18 }
 0x274   : > { %v4077_v31 = vfloor.f32 %v3717_v18  ;;  %vm3839_vm3 = vcmp.lt.f32.partialorder %v3719_v27, 0.0  ;;  %v3959_v54 = vceil.f32 %v3719_v27  ;;  %v4079_v17 = vfloor.f32 %v3719_v27 }
 0x275   : > { %vm3838_vm4 = vcmp.lt.f32.partialorder %v3718_v8, 0.0  ;;  %v3958_v13 = vceil.f32 %v3718_v8  ;;  %v4078_v55 = vfloor.f32 %v3718_v8  ;;  %vm3840_vm5 = vcmp.lt.f32.partialorder %v3720_v41, 0.0 }
 0x276   : > { %v4197_v26 = vsel %vm3837_vm1, %v3957_v19, %v4077_v31  ;;  %v3960_v35 = vceil.f32 %v3720_v41  ;;  %v4080_v32 = vfloor.f32 %v3720_v41  ;;  %v4199_v9 = vsel %vm3839_vm3, %v3959_v54, %v4079_v17 }
 0x277   : > { %v4317_v24 = vmin.f32 %v4197_v26, 127.0  ;;  %v4222_v63 = vmin.f32 %v4102_v34, 127.0  ;;  %v4246_v39 = vmin.f32 %v4126_v51, 127.0  ;;  %v4319_v12 = vmin.f32 %v4199_v9, 127.0  ;;  %v3165_v34 = vpop.f32.mrb[121].mxu0  ;;  %v3226_v51 = vpop.f32.mrb[121].mxu1 }
 0x278   : > { %v4104_v57 = vsel %vm3744_vm11, %v3864_v56, %v3984_v59  ;;  %v4128_v18 = vsel %vm3768_vm6, %v3888_v23, %v4008_v37  ;;  %v4341_v27 = vpack.c.bf16 %v4245_v53, %v4221_v1  ;;  %v3167_v56 = vpop.f32.mrb[122].mxu0  ;;  %v3228_v59 = vpop.f32.mrb[122].mxu1  ;;  %v4343_v20 = vpack.c.bf16 %v4247_v44, %v4223_v6 }
 0x279   : > { %v7804_v19 = vpack.c.bf16 %v4317_v24, %v4317_v24  ;;  %v4342_v31 = vpack.c.bf16 %v4246_v39, %v4222_v63  ;;  %v4224_v54 = vmin.f32 %v4104_v57, 127.0  ;;  %v4248_v15 = vmin.f32 %v4128_v18, 127.0  ;;  %v7818_v1 = vpop.f32.mrb[123].mxu0  ;;  %v7820_v53 = vpop.f32.mrb[123].mxu1 }
 0x27a   : > { %v4391_v17 = vpack.c.bf16 %v4319_v12, %v4319_v12  ;;  %v4150_v0 = vsel %vm3790_vm0, %v3910_v5, %v4030_v40  ;;  %v4174_v49 = vsel %vm3814_vm13, %v3934_v2, %v4054_v43  ;;  %v4152_v6 = vsel %vm3792_vm14, %v3912_v7, %v4032_v60 }
 0x27b   : > { %4622 = vmatprep.subr.bf16.mxu0 %v4342_v31  ;;  %v4344_v23 = vpack.c.bf16 %v4248_v15, %v4224_v54  ;;  %v4270_v29 = vmin.f32 %v4150_v0, 127.0  ;;  %v4294_v37 = vmin.f32 %v4174_v49, 127.0  ;;  %v4176_v16 = vsel %vm3816_vm15, %v3936_v14, %v4056_v30  ;;  %v3173_v8 = vpop.f32.mrb[124].mxu0 }
 0x27c   : > { %4623 = vmatpush1.bf16.msra.mxu0 %v4341_v27  ;;  %v4272_v44 = vmin.f32 %v4152_v6, 127.0  ;;  %v4365_v58 = vpack.c.bf16 %v4293_v10, %v4269_v11  ;;  %v4367_v22 = vpack.c.bf16 %v4295_v36, %v4271_v42  ;;  %v4296_v40 = vmin.f32 %v4176_v16, 127.0  ;;  %v3234_v11 = vpop.f32.mrb[124].mxu1  ;;  %v3175_v26 = vpop.f32.mrb[125].mxu0 }
 0x27d   : > { %4673 = vmatprep.subr.bf16.mxu1 %v4344_v23  ;;  %v4366_v5 = vpack.c.bf16 %v4294_v37, %v4270_v29  ;;  %v4198_v2 = vsel %vm3838_vm4, %v3958_v13, %v4078_v55  ;;  %v4200_v43 = vsel %vm3840_vm5, %v3960_v35, %v4080_v32  ;;  %v3164_v62 = vadd.f32 %v3163_v52, %v7422_v25  ;;  %v7840_v41 = vpop.f32.mrb[125].mxu1  ;;  %v7849_v39 = vpop.f32.mrb[126].mxu0 }
 0x27e   : > { %4674 = vmatpush1.bf16.msra.mxu1 %v4343_v20  ;;  %v4318_v45 = vmin.f32 %v4198_v2, 127.0  ;;  %v4320_v7 = vmin.f32 %v4200_v43, 127.0  ;;  %v4368_v60 = vpack.c.bf16 %v4296_v40, %v4272_v44  ;;  %v3225_v48 = vadd.f32 %v3224_v46, %v7422_v25  ;;  %v7844_v35 = vpop.f32.mrb[126].mxu1  ;;  %v7854_v18 = vpop.f32.mrb[127].mxu0 }
 0x27f   : > { %4624 = vmatprep.subr.bf16.mxu0 %v4366_v5  ;;  %v4461_v10 = vand.u32 %v7635_v21, %v7804_v19  ;;  %v3168_v36 = vadd.f32 %v3167_v56, %v7456_v38  ;;  %v4467_v14 = vand.u32 %v7635_v21, %v4391_v17  ;;  %v3625_v30 = vmax.f32 %v3164_v62, 0.0  ;;  %v7851_v52 = vpop.f32.mrb[127].mxu1 }
 0x280   : > { %4625 = vmatpush1.bf16.msra.mxu0 %v4365_v58  ;;  %v4390_v28 = vpack.c.bf16 %v4318_v45, %v4318_v45  ;;  %v4392_v42 = vpack.c.bf16 %v4320_v7, %v4320_v7  ;;  %4675 = vmatprep.subr.bf16.mxu1 %v4368_v60  ;;  %v3627_v13 = vmax.f32 %v3225_v48, 0.0  ;;  %v3166_v55 = vadd.f32 %v3165_v34, %v7422_v25 }
 0x281   : > { %v3227_v9 = vadd.f32 %v3226_v51, %v7422_v25  ;;  %v3649_v63 = vmax.f32 %v3168_v36, 0.0  ;;  %vm3745_vm7 = vcmp.lt.f32.partialorder %v3625_v30, 0.0  ;;  %v3865_v46 = vceil.f32 %v3625_v30 }
 0x282   : > { %4676 = vmatpush1.bf16.msra.mxu1 %v4367_v22  ;;  %v4464_v32 = vand.u32 %v7635_v21, %v4390_v28  ;;  %v4470_v24 = vand.u32 %v7635_v21, %v4392_v42  ;;  %v3985_v12 = vfloor.f32 %v3625_v30  ;;  %v3229_v57 = vadd.f32 %v3228_v59, %v7456_v38 }
 0x283   : > { %vm3747_vm8 = vcmp.lt.f32.partialorder %v3627_v13, 0.0  ;;  %v3867_v27 = vceil.f32 %v3627_v13  ;;  %v3987_v34 = vfloor.f32 %v3627_v13  ;;  %v7858_v19 = vmax.f32 %v3166_v55, 0.0  ;;  %v7864_v17 = vpop.f32.mrb[128].mxu1  ;;  %v7874_v29 = vpop.f32.mrb[128].mxu0 }
 0x284   : > { %4626 = vmatprep.subr.bf16.mxu0 %v4464_v32  ;;  %4677 = vmatprep.subr.bf16.mxu1 %v4470_v24  ;;  %v7856_v51 = vsel %vm3745_vm7, %v3865_v46, %v3985_v12  ;;  %v7860_v31 = vmax.f32 %v3227_v9, 0.0  ;;  %vm3769_vm9 = vcmp.lt.f32.partialorder %v3649_v63, 0.0  ;;  %v3889_v15 = vceil.f32 %v3649_v63  ;;  %v7876_v37 = vpop.f32.mrb[129].mxu1 }
 0x285   : > { %4627 = vmatpush1.bf16.msra.mxu0 %v4461_v10  ;;  %v7862_v54 = vsel %vm3747_vm8, %v3867_v27, %v3987_v34  ;;  %v4009_v56 = vfloor.f32 %v3649_v63  ;;  %v3651_v59 = vmax.f32 %v3229_v57, 0.0  ;;  %v3170_v20 = vadd.f32 %v7818_v1, %v7456_v38  ;;  %v3185_v1 = vpop.f32.mrb[129].mxu0 }
 0x286   : > { %4678 = vmatpush1.bf16.msra.mxu1 %v4467_v14  ;;  %v3231_v0 = vadd.f32 %v7820_v53, %v7456_v38  ;;  %v3174_v49 = vadd.f32 %v3173_v8, %v7466_v47  ;;  %v3235_v23 = vadd.f32 %v3234_v11, %v7466_v47  ;;  %v3248_v53 = vpop.f32.mrb[130].mxu1  ;;  %v3866_v58 = vceil.f32 %v7858_v19  ;;  %v3187_v2 = vpop.f32.mrb[130].mxu0 }
 0x287   : > { %v7880_v6 = vsel %vm3769_vm9, %v3889_v15, %v4009_v56  ;;  %vm3771_vm10 = vcmp.lt.f32.partialorder %v3651_v59, 0.0  ;;  %v3891_v16 = vceil.f32 %v3651_v59  ;;  %v4011_v44 = vfloor.f32 %v3651_v59  ;;  %v3249_v43 = vpop.f32.mrb[131].mxu1  ;;  %v3188_v48 = vpop.f32.mrb[131].mxu0 }
 0x288   : > { %5554 = vmatmul.mubr.msk.bf16.vlgmr.msra.gmra.mrb[176].mxu0 %vm4438_vm2, %v7678_v50  ;;  %v3986_v22 = vfloor.f32 %v7858_v19  ;;  %v3868_v5 = vceil.f32 %v7860_v31  ;;  %v3673_v40 = vmax.f32 %v3174_v49, 0.0  ;;  %v7889_v7 = vmax.f32 %v3170_v20, 0.0 }
 0x289   : > { %5556 = vmatmul.mubr.msk.bf16.vlgmr.msra.gmra.mrb[176].mxu1 %vm4438_vm2, %v7678_v50  ;;  %4664 = vmatprep.mubr.bf16.mxu0 %v8512_v33  ;;  %v7887_v45 = vsel %vm3771_vm10, %v3891_v16, %v4011_v44  ;;  %v3675_v60 = vmax.f32 %v3235_v23, 0.0  ;;  %v3176_v62 = vadd.f32 %v3175_v26, %v7466_v47  ;;  %v4225_v11 = vmin.f32 %v7856_v51, 127.0 }
 0x28a   : > { %4715 = vmatprep.mubr.bf16.mxu1 %v8512_v33  ;;  %v4227_v28 = vmin.f32 %v7862_v54, 127.0  ;;  %v3988_v42 = vfloor.f32 %v7860_v31  ;;  %v4249_v10 = vmin.f32 %v7880_v6, 127.0  ;;  %v4251_v36 = vmin.f32 %v7887_v45, 127.0 }
 0x28b   : > { %v7897_v8 = vmax.f32 %v3231_v0, 0.0  ;;  %vm3793_vm11 = vcmp.lt.f32.partialorder %v3673_v40, 0.0  ;;  %v3237_v14 = vadd.f32 %v7840_v41, %v7466_v47  ;;  %v3913_v30 = vceil.f32 %v3673_v40 }
 0x28c   : > { %v4033_v13 = vfloor.f32 %v3673_v40  ;;  %vm3795_vm6 = vcmp.lt.f32.partialorder %v3675_v60, 0.0  ;;  %v3915_v55 = vceil.f32 %v3675_v60  ;;  %vm3746_vm12 = vcmp.lt.f32.partialorder %v7858_v19, 0.0 }
 0x28d   : > { %v3890_v26 = vceil.f32 %v7889_v7  ;;  %v4035_v32 = vfloor.f32 %v3675_v60  ;;  %v7903_v24 = vmax.f32 %v3176_v62, 0.0  ;;  %v3178_v9 = vadd.f32 %v7849_v39, %v7491_v61 }
 0x28e   : > { %v7909_v63 = vsel %vm3793_vm11, %v3913_v30, %v4033_v13  ;;  %v3239_v41 = vadd.f32 %v7844_v35, %v7491_v61  ;;  %v3180_v46 = vadd.f32 %v7854_v18, %v7491_v61  ;;  %v3241_v12 = vadd.f32 %v7851_v52, %v7491_v61 }
 0x28f   : > { %v4010_v57 = vfloor.f32 %v7889_v7  ;;  %v3892_v27 = vceil.f32 %v7897_v8  ;;  %v4012_v39 = vfloor.f32 %v7897_v8  ;;  %v7923_v34 = vsel %vm3795_vm6, %v3915_v55, %v4035_v32 }
 0x290   : > { %5555 = vmatmul.mubr.msk.bf16.gmra.mrb[180].mxu0 %vm4438_vm2, %v7721_v3  ;;  %vm3770_vm0 = vcmp.lt.f32.partialorder %v7889_v7, 0.0  ;;  %v4273_v35 = vmin.f32 %v7909_v63, 127.0  ;;  %v3914_v18 = vceil.f32 %v7903_v24  ;;  %v7930_v15 = vmax.f32 %v3237_v14, 0.0 }
 0x291   : > { %5557 = vmatmul.mubr.msk.bf16.gmra.mrb[180].mxu1 %vm4438_vm2, %v7721_v3  ;;  %4756 = vmatprep.mubr.bf16.mxu0 %v8512_v33  ;;  %v4034_v56 = vfloor.f32 %v7903_v24  ;;  %v3697_v59 = vmax.f32 %v3178_v9, 0.0  ;;  %v3699_v20 = vmax.f32 %v3239_v41, 0.0  ;;  %v7934_v0 = vmax.f32 %v3180_v46, 0.0 }
 0x292   : > { %4807 = vmatprep.mubr.bf16.mxu1 %v8512_v33  ;;  %vm3748_vm13 = vcmp.lt.f32.partialorder %v7860_v31, 0.0  ;;  %vm3772_vm14 = vcmp.lt.f32.partialorder %v7897_v8, 0.0  ;;  %v7938_v49 = vmax.f32 %v3241_v12, 0.0  ;;  %v3184_v23 = vadd.f32 %v7874_v29, %v7493_v4 }
 0x293   : > { %v3245_v16 = vadd.f32 %v7864_v17, %v7493_v4  ;;  %v3186_v44 = vadd.f32 %v3185_v1, %v7493_v4  ;;  %vm3817_vm15 = vcmp.lt.f32.partialorder %v3697_v59, 0.0  ;;  %v3937_v53 = vceil.f32 %v3697_v59 }
 0x294   : > { %v4057_v40 = vfloor.f32 %v3697_v59  ;;  %vm3819_vm1 = vcmp.lt.f32.partialorder %v3699_v20, 0.0  ;;  %vm3794_vm3 = vcmp.lt.f32.partialorder %v7903_v24, 0.0  ;;  %v3916_v2 = vceil.f32 %v7930_v15 }
 0x295   : > { %v4036_v43 = vfloor.f32 %v7930_v15  ;;  %v3939_v60 = vceil.f32 %v3699_v20  ;;  %v4059_v62 = vfloor.f32 %v3699_v20  ;;  %vm3796_vm4 = vcmp.lt.f32.partialorder %v7930_v15, 0.0 }
 0x296   : > { %v4177_v29 = vsel %vm3817_vm15, %v3937_v53, %v4057_v40  ;;  %vm3818_vm5 = vcmp.lt.f32.partialorder %v7934_v0, 0.0  ;;  %v3938_v17 = vceil.f32 %v7934_v0  ;;  %v4058_v1 = vfloor.f32 %v7934_v0 }
 0x297   : > { %v4297_v48 = vmin.f32 %v4177_v29, 127.0  ;;  %v4179_v14 = vsel %vm3819_vm1, %v3939_v60, %v4059_v62  ;;  %vm3820_vm7 = vcmp.lt.f32.partialorder %v7938_v49, 0.0  ;;  %v3940_v30 = vceil.f32 %v7938_v49 }
 0x298   : > { %v3721_v13 = vmax.f32 %v3184_v23, 0.0  ;;  %v4060_v55 = vfloor.f32 %v7938_v49  ;;  %v3723_v32 = vmax.f32 %v3245_v16, 0.0  ;;  %v3722_v9 = vmax.f32 %v3186_v44, 0.0 }
 0x299   : > { %v3247_v41 = vadd.f32 %v7876_v37, %v7493_v4  ;;  %v4106_v59 = vsel %vm3746_vm12, %v3866_v58, %v3986_v22  ;;  %v4299_v20 = vmin.f32 %v4179_v14, 127.0  ;;  %v4130_v62 = vsel %vm3770_vm0, %v3890_v26, %v4010_v57 }
 0x29a   : > { %vm3841_vm8 = vcmp.lt.f32.partialorder %v3721_v13, 0.0  ;;  %v3961_v46 = vceil.f32 %v3721_v13  ;;  %v4081_v12 = vfloor.f32 %v3721_v13  ;;  %vm3843_vm9 = vcmp.lt.f32.partialorder %v3723_v32, 0.0 }
 0x29b   : > { %v3963_v23 = vceil.f32 %v3723_v32  ;;  %v4083_v53 = vfloor.f32 %v3723_v32  ;;  %vm3842_vm10 = vcmp.lt.f32.partialorder %v3722_v9, 0.0  ;;  %v3962_v16 = vceil.f32 %v3722_v9 }
 0x29c   : > { %v4201_v40 = vsel %vm3841_vm8, %v3961_v46, %v4081_v12  ;;  %v3724_v44 = vmax.f32 %v3247_v41, 0.0  ;;  %v4226_v29 = vmin.f32 %v4106_v59, 127.0  ;;  %v4082_v52 = vfloor.f32 %v3722_v9 }
 0x29d   : > { %v4321_v60 = vmin.f32 %v4201_v40, 127.0  ;;  %v4203_v37 = vsel %vm3843_vm9, %v3963_v23, %v4083_v53  ;;  %v4250_v22 = vmin.f32 %v4130_v62, 127.0  ;;  %v4108_v14 = vsel %vm3748_vm13, %v3868_v5, %v3988_v42 }
 0x29e   : > { %v4323_v13 = vmin.f32 %v4203_v37, 127.0  ;;  %vm3844_vm11 = vcmp.lt.f32.partialorder %v3724_v44, 0.0  ;;  %v3964_v19 = vceil.f32 %v3724_v44  ;;  %v4084_v58 = vfloor.f32 %v3724_v44 }
 0x29f   : > { %v4132_v7 = vsel %vm3772_vm14, %v3892_v27, %v4012_v39  ;;  %v4393_v26 = vpack.c.bf16 %v4321_v60, %v4321_v60  ;;  %v4228_v57 = vmin.f32 %v4108_v14, 127.0  ;;  %v4345_v41 = vpack.c.bf16 %v4249_v10, %v4225_v11 }
 0x2a0   : > { %v4252_v32 = vmin.f32 %v4132_v7, 127.0  ;;  %v4346_v46 = vpack.c.bf16 %v4250_v22, %v4226_v29  ;;  %v4347_v31 = vpack.c.bf16 %v4251_v36, %v4227_v28  ;;  %v4154_v5 = vsel %vm3794_vm3, %v3914_v18, %v4034_v56 }
 0x2a1   : > { %v4178_v42 = vsel %vm3818_vm5, %v3938_v17, %v4058_v1  ;;  %v4274_v8 = vmin.f32 %v4154_v5, 127.0  ;;  %v4156_v11 = vsel %vm3796_vm4, %v3916_v2, %v4036_v43  ;;  %v4180_v54 = vsel %vm3820_vm7, %v3940_v30, %v4060_v55 }
 0x2a2   : > { %v4348_v51 = vpack.c.bf16 %v4252_v32, %v4228_v57  ;;  %v4298_v6 = vmin.f32 %v4178_v42, 127.0  ;;  %4724 = vmatprep.subr.bf16.mxu0 %v4346_v46  ;;  %v4276_v45 = vmin.f32 %v4156_v11, 127.0  ;;  %v4369_v28 = vpack.c.bf16 %v4297_v48, %v4273_v35 }
 0x2a3   : > { %v8672_v10 = vmin.f32 %v7923_v34, 127.0  ;;  %4725 = vmatpush1.bf16.msra.mxu0 %v4345_v41  ;;  %v4300_v27 = vmin.f32 %v4180_v54, 127.0  ;;  %v4202_v39 = vsel %vm3842_vm10, %v3962_v16, %v4082_v52  ;;  %v4204_v18 = vsel %vm3844_vm11, %v3964_v19, %v4084_v58 }
 0x2a4   : > { %4775 = vmatprep.subr.bf16.mxu1 %v4348_v51  ;;  %v4370_v24 = vpack.c.bf16 %v4298_v6, %v4274_v8  ;;  %v4395_v15 = vpack.c.bf16 %v4323_v13, %v4323_v13  ;;  %v4322_v56 = vmin.f32 %v4202_v39, 127.0  ;;  %v4324_v0 = vmin.f32 %v4204_v18, 127.0 }
 0x2a5   : > { %v4371_v36 = vpack.c.bf16 %v4299_v20, %v8672_v10  ;;  %4776 = vmatpush1.bf16.msra.mxu1 %v4347_v31  ;;  %v4372_v49 = vpack.c.bf16 %v4300_v27, %v4276_v45  ;;  %v4473_v34 = vand.u32 %v7635_v21, %v4393_v26 }
 0x2a6   : > { %4726 = vmatprep.subr.bf16.mxu0 %v4370_v24  ;;  %v4394_v2 = vpack.c.bf16 %v4322_v56, %v4322_v56  ;;  %v4396_v63 = vpack.c.bf16 %v4324_v0, %v4324_v0  ;;  %v3285_v52 = vpop.f32.mrb[132].mxu0  ;;  %v4479_v17 = vand.u32 %v7635_v21, %v4395_v15 }
 0x2a7   : > { %4777 = vmatprep.subr.bf16.mxu1 %v4372_v49  ;;  %4727 = vmatpush1.bf16.msra.mxu0 %v4369_v28  ;;  %v3286_v1 = vadd.f32 %v3285_v52, %v7422_v25  ;;  %v3287_v48 = vpop.f32.mrb[133].mxu0 }
 0x2a8   : > { %v4476_v35 = vand.u32 %v7635_v21, %v4394_v2  ;;  %v4482_v43 = vand.u32 %v7635_v21, %v4396_v63  ;;  %v3288_v30 = vadd.f32 %v3287_v48, %v7422_v25  ;;  %v3289_v55 = vpop.f32.mrb[134].mxu0  ;;  %v3346_v12 = vpop.f32.mrb[132].mxu1 }
 0x2a9   : > { %4778 = vmatpush1.bf16.msra.mxu1 %v4371_v36  ;;  %v3629_v9 = vmax.f32 %v3286_v1, 0.0  ;;  %v3290_v59 = vadd.f32 %v3289_v55, %v7456_v38  ;;  %v3291_v20 = vpop.f32.mrb[135].mxu0  ;;  %v3347_v23 = vadd.f32 %v3346_v12, %v7422_v25  ;;  %v3348_v40 = vpop.f32.mrb[133].mxu1 }
 0x2aa   : > { %4728 = vmatprep.subr.bf16.mxu0 %v4476_v35  ;;  %4779 = vmatprep.subr.bf16.mxu1 %v4482_v43  ;;  %v8013_v53 = vmax.f32 %v3288_v30, 0.0  ;;  %v3349_v60 = vadd.f32 %v3348_v40, %v7422_v25  ;;  %v3350_v37 = vpop.f32.mrb[134].mxu1  ;;  %v3292_v29 = vadd.f32 %v3291_v20, %v7456_v38 }
 0x2ab   : > { %4729 = vmatpush1.bf16.msra.mxu0 %v4473_v34  ;;  %vm3749_vm6 = vcmp.lt.f32.partialorder %v3629_v9, 0.0  ;;  %v3869_v16 = vceil.f32 %v3629_v9  ;;  %v3989_v44 = vfloor.f32 %v3629_v9  ;;  %v3631_v62 = vmax.f32 %v3347_v23, 0.0  ;;  %v3352_v13 = vpop.f32.mrb[135].mxu1 }
 0x2ac   : > { %v8021_v58 = vmax.f32 %v3349_v60, 0.0  ;;  %v3653_v22 = vmax.f32 %v3290_v59, 0.0  ;;  %v3351_v14 = vadd.f32 %v3350_v37, %v7456_v38  ;;  %v3870_v57 = vceil.f32 %v8013_v53 }
 0x2ad   : > { %4780 = vmatpush1.bf16.msra.mxu1 %v4479_v17  ;;  %v8019_v19 = vsel %vm3749_vm6, %v3869_v16, %v3989_v44  ;;  %vm3751_vm12 = vcmp.lt.f32.partialorder %v3631_v62, 0.0  ;;  %v3871_v7 = vceil.f32 %v3631_v62  ;;  %v3991_v26 = vfloor.f32 %v3631_v62 }
 0x2ae   : > { %5558 = vmatmul.mubr.msk.bf16.vlgmr.msra.gmra.mrb[184].mxu0 %vm4438_vm2, %v7678_v50  ;;  %v3295_v32 = vpop.f32.mrb[136].mxu0  ;;  %v4229_v41 = vmin.f32 %v8019_v19, 127.0  ;;  %v3990_v46 = vfloor.f32 %v8013_v53  ;;  %v3872_v31 = vceil.f32 %v8021_v58  ;;  %vm3773_vm0 = vcmp.lt.f32.partialorder %v3653_v22, 0.0 }
 0x2af   : > { %4766 = vmatprep.mubr.bf16.mxu0 %v8512_v33  ;;  %v3297_v5 = vpop.f32.mrb[137].mxu0  ;;  %v8032_v42 = vsel %vm3751_vm12, %v3871_v7, %v3991_v26  ;;  %v4013_v51 = vfloor.f32 %v3653_v22  ;;  %v3655_v8 = vmax.f32 %v3351_v14, 0.0  ;;  %v3992_v11 = vfloor.f32 %v8021_v58 }
 0x2b0   : > { %5560 = vmatmul.mubr.msk.bf16.vlgmr.msra.gmra.mrb[184].mxu1 %vm4438_vm2, %v7678_v50  ;;  %v3893_v50 = vceil.f32 %v3653_v22  ;;  %v3299_v6 = vpop.f32.mrb[138].mxu0  ;;  %v8035_v54 = vmax.f32 %v3292_v29, 0.0  ;;  %v3353_v45 = vadd.f32 %v3352_v13, %v7456_v38  ;;  %v3296_v28 = vadd.f32 %v3295_v32, %v7466_v47  ;;  %v3356_v10 = vpop.f32.mrb[136].mxu1 }
 0x2b1   : > { %4817 = vmatprep.mubr.bf16.mxu1 %v8512_v33  ;;  %v3301_v36 = vpop.f32.mrb[139].mxu0  ;;  %vm3750_vm13 = vcmp.lt.f32.partialorder %v8013_v53, 0.0  ;;  %vm3775_vm14 = vcmp.lt.f32.partialorder %v3655_v8, 0.0  ;;  %v3895_v27 = vceil.f32 %v3655_v8  ;;  %v4015_v39 = vfloor.f32 %v3655_v8  ;;  %v3358_v18 = vpop.f32.mrb[137].mxu1 }
 0x2b2   : > { %v8040_v24 = vsel %vm3773_vm0, %v3893_v50, %v4013_v51  ;;  %v4231_v15 = vmin.f32 %v8032_v42, 127.0  ;;  %vm3752_vm15 = vcmp.lt.f32.partialorder %v8021_v58, 0.0  ;;  %vm3774_vm1 = vcmp.lt.f32.partialorder %v8035_v54, 0.0  ;;  %v3360_v49 = vpop.f32.mrb[138].mxu1 }
 0x2b3   : > { %v4253_v56 = vmin.f32 %v8040_v24, 127.0  ;;  %v3894_v0 = vceil.f32 %v8035_v54  ;;  %v8047_v2 = vsel %vm3775_vm14, %v3895_v27, %v4015_v39  ;;  %v8049_v63 = vmax.f32 %v3353_v45, 0.0  ;;  %v3362_v43 = vpop.f32.mrb[139].mxu1 }
 0x2b4   : > { %v3677_v34 = vmax.f32 %v3296_v28, 0.0  ;;  %v3357_v35 = vadd.f32 %v3356_v10, %v7466_v47  ;;  %v4014_v52 = vfloor.f32 %v8035_v54  ;;  %v3298_v17 = vadd.f32 %v3297_v5, %v7466_v47 }
 0x2b5   : > { %v3359_v1 = vadd.f32 %v3358_v18, %v7466_v47  ;;  %v3300_v48 = vadd.f32 %v3299_v6, %v7491_v61  ;;  %v4255_v30 = vmin.f32 %v8047_v2, 127.0  ;;  %vm3776_vm3 = vcmp.lt.f32.partialorder %v8049_v63, 0.0 }
 0x2b6   : > { %5559 = vmatmul.mubr.msk.bf16.gmra.mrb[188].mxu0 %vm4438_vm2, %v7721_v3  ;;  %v3896_v55 = vceil.f32 %v8049_v63  ;;  %vm3797_vm4 = vcmp.lt.f32.partialorder %v3677_v34, 0.0  ;;  %v3305_v9 = vpop.f32.mrb[140].mxu0  ;;  %v3917_v12 = vceil.f32 %v3677_v34  ;;  %v4037_v59 = vfloor.f32 %v3677_v34 }
 0x2b7   : > { %4858 = vmatprep.mubr.bf16.mxu0 %v8512_v33  ;;  %v3679_v20 = vmax.f32 %v3357_v35, 0.0  ;;  %v8065_v23 = vmax.f32 %v3298_v17, 0.0  ;;  %v3307_v40 = vpop.f32.mrb[141].mxu0  ;;  %v8067_v16 = vmax.f32 %v3359_v1, 0.0  ;;  %v3361_v44 = vadd.f32 %v3360_v49, %v7491_v61 }
 0x2b8   : > { %5561 = vmatmul.mubr.msk.bf16.gmra.mrb[188].mxu1 %vm4438_vm2, %v7721_v3  ;;  %v3701_v3 = vmax.f32 %v3300_v48, 0.0  ;;  %v3302_v60 = vadd.f32 %v3301_v36, %v7491_v61  ;;  %v3309_v37 = vpop.f32.mrb[142].mxu0  ;;  %v8071_v62 = vsel %vm3797_vm4, %v3917_v12, %v4037_v59  ;;  %v3366_v22 = vpop.f32.mrb[140].mxu1  ;;  %v4016_v7 = vfloor.f32 %v8049_v63 }
 0x2b9   : > { %4909 = vmatprep.mubr.bf16.mxu1 %v8512_v33  ;;  %vm3799_vm5 = vcmp.lt.f32.partialorder %v3679_v20, 0.0  ;;  %v3919_v29 = vceil.f32 %v3679_v20  ;;  %v4039_v13 = vfloor.f32 %v3679_v20  ;;  %v3310_v14 = vpop.f32.mrb[143].mxu0  ;;  %v4277_v26 = vmin.f32 %v8071_v62, 127.0  ;;  %v3368_v5 = vpop.f32.mrb[141].mxu1 }
 0x2ba   : > { %vm3798_vm7 = vcmp.lt.f32.partialorder %v8065_v23, 0.0  ;;  %v3918_v32 = vceil.f32 %v8065_v23  ;;  %v4038_v51 = vfloor.f32 %v8065_v23  ;;  %v3920_v8 = vceil.f32 %v8067_v16  ;;  %v3370_v45 = vpop.f32.mrb[142].mxu1 }
 0x2bb   : > { %v8077_v50 = vsel %vm3799_vm5, %v3919_v29, %v4039_v13  ;;  %v4040_v6 = vfloor.f32 %v8067_v16  ;;  %vm3821_vm8 = vcmp.lt.f32.partialorder %v3701_v3, 0.0  ;;  %v3941_v10 = vceil.f32 %v3701_v3  ;;  %v3371_v27 = vpop.f32.mrb[143].mxu1 }
 0x2bc   : > { %v4279_v28 = vmin.f32 %v8077_v50, 127.0  ;;  %v4061_v36 = vfloor.f32 %v3701_v3  ;;  %v3703_v39 = vmax.f32 %v3361_v44, 0.0  ;;  %v3702_v18 = vmax.f32 %v3302_v60, 0.0 }
 0x2bd   : > { %v3363_v49 = vadd.f32 %v3362_v43, %v7491_v61  ;;  %v4110_v34 = vsel %vm3750_vm13, %v3870_v57, %v3990_v46  ;;  %v4134_v17 = vsel %vm3774_vm1, %v3894_v0, %v4014_v52  ;;  %v4112_v48 = vsel %vm3752_vm15, %v3872_v31, %v3992_v11 }
 0x2be   : > { %v4181_v35 = vsel %vm3821_vm8, %v3941_v10, %v4061_v36  ;;  %v4230_v1 = vmin.f32 %v4110_v34, 127.0  ;;  %vm3823_vm9 = vcmp.lt.f32.partialorder %v3703_v39, 0.0  ;;  %v3943_v12 = vceil.f32 %v3703_v39 }
 0x2bf   : > { %v4301_v43 = vmin.f32 %v4181_v35, 127.0  ;;  %v4063_v59 = vfloor.f32 %v3703_v39  ;;  %vm3800_vm10 = vcmp.lt.f32.partialorder %v8067_v16, 0.0  ;;  %vm3822_vm11 = vcmp.lt.f32.partialorder %v3702_v18, 0.0 }
 0x2c0   : > { %v3942_v53 = vceil.f32 %v3702_v18  ;;  %v4062_v57 = vfloor.f32 %v3702_v18  ;;  %v3704_v46 = vmax.f32 %v3363_v49, 0.0  ;;  %v4254_v0 = vmin.f32 %v4134_v17, 127.0 }
 0x2c1   : > { %v4183_v54 = vsel %vm3823_vm9, %v3943_v12, %v4063_v59  ;;  %v4136_v52 = vsel %vm3776_vm3, %v3896_v55, %v4016_v7  ;;  %v4232_v20 = vmin.f32 %v4112_v48, 127.0  ;;  %v3306_v60 = vadd.f32 %v3305_v9, %v7493_v4 }
 0x2c2   : > { %v4303_v3 = vmin.f32 %v4183_v54, 127.0  ;;  %vm3824_vm6 = vcmp.lt.f32.partialorder %v3704_v46, 0.0  ;;  %v3944_v58 = vceil.f32 %v3704_v46  ;;  %v4064_v31 = vfloor.f32 %v3704_v46  ;;  %v8135_v46 = vld [vmem:[%s8503_s4] sm:$0xff]  }
 0x2c3   : > { %v4350_v11 = vpack.c.bf16 %v4254_v0, %v4230_v1  ;;  %v4256_v44 = vmin.f32 %v4136_v52, 127.0  ;;  %v3367_v37 = vadd.f32 %v3366_v22, %v7493_v4  ;;  %v4349_v29 = vpack.c.bf16 %v4253_v56, %v4229_v41 }
 0x2c4   : > { %v4351_v63 = vpack.c.bf16 %v4255_v30, %v4231_v15  ;;  %v3308_v55 = vadd.f32 %v3307_v40, %v7493_v4  ;;  %v3369_v13 = vadd.f32 %v3368_v5, %v7493_v4  ;;  %v3725_v7 = vmax.f32 %v3306_v60, 0.0 }
 0x2c5   : > { %4826 = vmatprep.subr.bf16.mxu0 %v4350_v11  ;;  %v4352_v14 = vpack.c.bf16 %v4256_v44, %v4232_v20  ;;  %v3727_v9 = vmax.f32 %v3367_v37, 0.0  ;;  %v4158_v22 = vsel %vm3798_vm7, %v3918_v32, %v4038_v51  ;;  %v4182_v41 = vsel %vm3822_vm11, %v3942_v53, %v4062_v57 }
 0x2c6   : > { %4827 = vmatpush1.bf16.msra.mxu0 %v4349_v29  ;;  %v3726_v19 = vmax.f32 %v3308_v55, 0.0  ;;  %v3728_v24 = vmax.f32 %v3369_v13, 0.0  ;;  %v4278_v42 = vmin.f32 %v4158_v22, 127.0  ;;  %vm3845_vm12 = vcmp.lt.f32.partialorder %v3725_v7, 0.0 }
 0x2c7   : > { %4877 = vmatprep.subr.bf16.mxu1 %v4352_v14  ;;  %v3965_v15 = vceil.f32 %v3725_v7  ;;  %v4085_v56 = vfloor.f32 %v3725_v7  ;;  %vm3847_vm0 = vcmp.lt.f32.partialorder %v3727_v9, 0.0  ;;  %v3967_v2 = vceil.f32 %v3727_v9  ;;  %v8150_v13 = vld [vmem:[%s8503_s4 + $0x8] ss:$0 sps:$4 sm:$0x33]  }
 0x2c8   : > { %v4087_v30 = vfloor.f32 %v3727_v9  ;;  %4878 = vmatpush1.bf16.msra.mxu1 %v4351_v63  ;;  %vm3846_vm13 = vcmp.lt.f32.partialorder %v3726_v19, 0.0  ;;  %v3966_v40 = vceil.f32 %v3726_v19  ;;  %v4086_v45 = vfloor.f32 %v3726_v19 }
 0x2c9   : > { %v4205_v5 = vsel %vm3845_vm12, %v3965_v15, %v4085_v56  ;;  %vm3848_vm14 = vcmp.lt.f32.partialorder %v3728_v24, 0.0  ;;  %v3968_v23 = vceil.f32 %v3728_v24  ;;  %v4088_v10 = vfloor.f32 %v3728_v24 }
 0x2ca   : > { %v4325_v32 = vmin.f32 %v4205_v5, 127.0  ;;  %v4207_v51 = vsel %vm3847_vm0, %v3967_v2, %v4087_v30  ;;  %v4302_v36 = vmin.f32 %v4182_v41, 127.0  ;;  %v4160_v39 = vsel %vm3800_vm10, %v3920_v8, %v4040_v6 }
 0x2cb   : > { %v4327_v27 = vmin.f32 %v4207_v51, 127.0  ;;  %v4184_v18 = vsel %vm3824_vm6, %v3944_v58, %v4064_v31  ;;  %v4373_v49 = vpack.c.bf16 %v4301_v43, %v4277_v26  ;;  %v4280_v35 = vmin.f32 %v4160_v39, 127.0 }
 0x2cc   : > { %v4374_v34 = vpack.c.bf16 %v4302_v36, %v4278_v42  ;;  %v4304_v17 = vmin.f32 %v4184_v18, 127.0  ;;  %v4375_v1 = vpack.c.bf16 %v4303_v3, %v4279_v28  ;;  %v4206_v48 = vsel %vm3846_vm13, %v3966_v40, %v4086_v45 }
 0x2cd   : > { %v4208_v12 = vsel %vm3848_vm14, %v3968_v23, %v4088_v10  ;;  %v4326_v53 = vmin.f32 %v4206_v48, 127.0  ;;  %v4397_v16 = vpack.c.bf16 %v4325_v32, %v4325_v32  ;;  %v4399_v8 = vpack.c.bf16 %v4327_v27, %v4327_v27 }
 0x2ce   : > { %4828 = vmatprep.subr.bf16.mxu0 %v4374_v34  ;;  %v4376_v59 = vpack.c.bf16 %v4304_v17, %v4280_v35  ;;  %v4328_v57 = vmin.f32 %v4208_v12, 127.0 }
 0x2cf   : > { %4829 = vmatpush1.bf16.msra.mxu0 %v4373_v49  ;;  %v4398_v6 = vpack.c.bf16 %v4326_v53, %v4326_v53  ;;  %v4485_v50 = vand.u32 %v7635_v21, %v4397_v16  ;;  %v4491_v28 = vand.u32 %v7635_v21, %v4399_v8 }
 0x2d0   : > { %4879 = vmatprep.subr.bf16.mxu1 %v4376_v59  ;;  %v4400_v62 = vpack.c.bf16 %v4328_v57, %v4328_v57 }
 0x2d1   : > { %4880 = vmatpush1.bf16.msra.mxu1 %v4375_v1  ;;  %v4488_v26 = vand.u32 %v7635_v21, %v4398_v6 }
 0x2d2   : > { %v4494_v43 = vand.u32 %v7635_v21, %v4400_v62 }
 0x2d3   : > { %4830 = vmatprep.subr.bf16.mxu0 %v4488_v26 }
 0x2d4   : > { %4881 = vmatprep.subr.bf16.mxu1 %v4494_v43  ;;  %4831 = vmatpush1.bf16.msra.mxu0 %v4485_v50 }
 0x2d5   : > { %4882 = vmatpush1.bf16.msra.mxu1 %v4491_v28 }
 0x2d7   : > { %5562 = vmatmul.mubr.msk.bf16.vlgmr.msra.gmra.mrb[192].mxu0 %vm4438_vm2, %v8135_v46 }
 0x2d8   : > { %5564 = vmatmul.mubr.msk.bf16.vlgmr.msra.gmra.mrb[192].mxu1 %vm4438_vm2, %v8135_v46  ;;  %4868 = vmatprep.mubr.bf16.mxu0 %v8512_v33 }
 0x2d9   : > { %4919 = vmatprep.mubr.bf16.mxu1 %v8512_v33 }
 0x2de   : > { %v3407_v54 = vpop.f32.mrb[144].mxu0  ;;  %v3468_v0 = vpop.f32.mrb[144].mxu1 }
 0x2df   : > { %v3408_v52 = vadd.f32 %v3407_v54, %v7422_v25  ;;  %v3469_v20 = vadd.f32 %v3468_v0, %v7422_v25  ;;  %v3409_v3 = vpop.f32.mrb[145].mxu0  ;;  %v3470_v58 = vpop.f32.mrb[145].mxu1  ;;  %5563 = vmatmul.mubr.msk.bf16.gmra.mrb[196].mxu0 %vm4438_vm2, %v8150_v13 }
 0x2e0   : > { %v3410_v31 = vadd.f32 %v3409_v3, %v7422_v25  ;;  %v3471_v11 = vadd.f32 %v3470_v58, %v7422_v25  ;;  %v3411_v44 = vpop.f32.mrb[146].mxu0  ;;  %v3472_v60 = vpop.f32.mrb[146].mxu1  ;;  %5565 = vmatmul.mubr.msk.bf16.gmra.mrb[196].mxu1 %vm4438_vm2, %v8150_v13  ;;  %4960 = vmatprep.mubr.bf16.mxu0 %v8512_v33 }
 0x2e1   : > { %v3633_v37 = vmax.f32 %v3408_v52, 0.0  ;;  %v3635_v29 = vmax.f32 %v3469_v20, 0.0  ;;  %v3413_v63 = vpop.f32.mrb[147].mxu0  ;;  %v3474_v55 = vpop.f32.mrb[147].mxu1  ;;  %v3412_v9 = vadd.f32 %v3411_v44, %v7456_v38  ;;  %v3473_v22 = vadd.f32 %v3472_v60, %v7456_v38  ;;  %5011 = vmatprep.mubr.bf16.mxu1 %v8512_v33 }
 0x2e2   : > { %v8156_v14 = vmax.f32 %v3410_v31, 0.0  ;;  %v8158_v7 = vmax.f32 %v3471_v11, 0.0  ;;  %v3414_v41 = vadd.f32 %v3413_v63, %v7456_v38  ;;  %v3475_v56 = vadd.f32 %v3474_v55, %v7456_v38 }
 0x2e3   : > { %vm3753_vm15 = vcmp.lt.f32.partialorder %v3633_v37, 0.0  ;;  %v3873_v19 = vceil.f32 %v3633_v37  ;;  %v3993_v24 = vfloor.f32 %v3633_v37  ;;  %vm3755_vm1 = vcmp.lt.f32.partialorder %v3635_v29, 0.0 }
 0x2e4   : > { %v3875_v42 = vceil.f32 %v3635_v29  ;;  %v3995_v15 = vfloor.f32 %v3635_v29  ;;  %v3874_v30 = vceil.f32 %v8156_v14  ;;  %v3994_v40 = vfloor.f32 %v8156_v14 }
 0x2e5   : > { %v8166_v2 = vsel %vm3753_vm15, %v3873_v19, %v3993_v24  ;;  %v3657_v5 = vmax.f32 %v3412_v9, 0.0  ;;  %v3876_v32 = vceil.f32 %v8158_v7  ;;  %v3659_v51 = vmax.f32 %v3473_v22, 0.0 }
 0x2e6   : > { %v3478_v45 = vpop.f32.mrb[148].mxu1  ;;  %v8170_v23 = vsel %vm3755_vm1, %v3875_v42, %v3995_v15  ;;  %v8173_v10 = vmax.f32 %v3414_v41, 0.0  ;;  %v8176_v48 = vmax.f32 %v3475_v56, 0.0  ;;  %v4233_v53 = vmin.f32 %v8166_v2, 127.0 }
 0x2e7   : > { %v3480_v27 = vpop.f32.mrb[149].mxu1  ;;  %vm3777_vm3 = vcmp.lt.f32.partialorder %v3657_v5, 0.0  ;;  %v3897_v39 = vceil.f32 %v3657_v5  ;;  %v4017_v18 = vfloor.f32 %v3657_v5  ;;  %vm3779_vm4 = vcmp.lt.f32.partialorder %v3659_v51, 0.0 }
 0x2e8   : > { %v3417_v36 = vpop.f32.mrb[148].mxu0  ;;  %v3482_v35 = vpop.f32.mrb[150].mxu1  ;;  %v3899_v17 = vceil.f32 %v3659_v51  ;;  %v4019_v1 = vfloor.f32 %v3659_v51  ;;  %v4235_v57 = vmin.f32 %v8170_v23, 127.0  ;;  %vm3754_vm5 = vcmp.lt.f32.partialorder %v8156_v14, 0.0 }
 0x2e9   : > { %v3418_v49 = vadd.f32 %v3417_v36, %v7466_v47  ;;  %v3419_v34 = vpop.f32.mrb[149].mxu0  ;;  %v3484_v59 = vpop.f32.mrb[151].mxu1  ;;  %v3996_v16 = vfloor.f32 %v8158_v7  ;;  %v8183_v8 = vsel %vm3777_vm3, %v3897_v39, %v4017_v18  ;;  %vm3778_vm7 = vcmp.lt.f32.partialorder %v8173_v10, 0.0 }
 0x2ea   : > { %v3421_v12 = vpop.f32.mrb[150].mxu0  ;;  %v4257_v62 = vmin.f32 %v8183_v8, 127.0  ;;  %v3898_v26 = vceil.f32 %v8173_v10  ;;  %v4018_v43 = vfloor.f32 %v8173_v10  ;;  %v8190_v50 = vsel %vm3779_vm4, %v3899_v17, %v4019_v1 }
 0x2eb   : > { %v3423_v6 = vpop.f32.mrb[151].mxu0  ;;  %v3681_v28 = vmax.f32 %v3418_v49, 0.0  ;;  %v3479_v54 = vadd.f32 %v3478_v45, %v7466_v47  ;;  %v3420_v0 = vadd.f32 %v3419_v34, %v7466_v47  ;;  %vm3756_vm8 = vcmp.lt.f32.partialorder %v8158_v7, 0.0 }
 0x2ec   : > { %vm3780_vm9 = vcmp.lt.f32.partialorder %v8176_v48, 0.0  ;;  %v3481_v52 = vadd.f32 %v3480_v27, %v7466_v47  ;;  %v3422_v20 = vadd.f32 %v3421_v12, %v7491_v61  ;;  %v3483_v3 = vadd.f32 %v3482_v35, %v7491_v61 }
 0x2ed   : > { %v3424_v58 = vadd.f32 %v3423_v6, %v7491_v61  ;;  %vm3801_vm10 = vcmp.lt.f32.partialorder %v3681_v28, 0.0  ;;  %v3921_v31 = vceil.f32 %v3681_v28  ;;  %v4041_v11 = vfloor.f32 %v3681_v28 }
 0x2ee   : > { %v3683_v44 = vmax.f32 %v3479_v54, 0.0  ;;  %v3488_v60 = vpop.f32.mrb[152].mxu1  ;;  %v8200_v37 = vmax.f32 %v3420_v0, 0.0  ;;  %v8202_v29 = vmax.f32 %v3481_v52, 0.0  ;;  %v3705_v63 = vmax.f32 %v3422_v20, 0.0 }
 0x2ef   : > { %v3707_v55 = vmax.f32 %v3483_v3, 0.0  ;;  %v3490_v22 = vpop.f32.mrb[153].mxu1  ;;  %v8204_v19 = vsel %vm3801_vm10, %v3921_v31, %v4041_v11  ;;  %v4259_v56 = vmin.f32 %v8190_v50, 127.0  ;;  %v3900_v5 = vceil.f32 %v8176_v48 }
 0x2f0   : > { %v3427_v9 = vpop.f32.mrb[152].mxu0  ;;  %vm3803_vm11 = vcmp.lt.f32.partialorder %v3683_v44, 0.0  ;;  %v3923_v24 = vceil.f32 %v3683_v44  ;;  %v4043_v41 = vfloor.f32 %v3683_v44  ;;  %v3492_v15 = vpop.f32.mrb[154].mxu1  ;;  %v4020_v45 = vfloor.f32 %v8176_v48 }
 0x2f1   : > { %v3429_v42 = vpop.f32.mrb[153].mxu0  ;;  %v4281_v51 = vmin.f32 %v8204_v19, 127.0  ;;  %v3493_v27 = vpop.f32.mrb[155].mxu1  ;;  %vm3802_vm6 = vcmp.lt.f32.partialorder %v8200_v37, 0.0  ;;  %v3922_v18 = vceil.f32 %v8200_v37  ;;  %v4042_v49 = vfloor.f32 %v8200_v37 }
 0x2f2   : > { %v3431_v36 = vpop.f32.mrb[154].mxu0  ;;  %v8210_v39 = vsel %vm3803_vm11, %v3923_v24, %v4043_v41  ;;  %v3924_v34 = vceil.f32 %v8202_v29  ;;  %v4044_v17 = vfloor.f32 %v8202_v29  ;;  %vm3825_vm12 = vcmp.lt.f32.partialorder %v3705_v63, 0.0 }
 0x2f3   : > { %v3432_v35 = vpop.f32.mrb[155].mxu0  ;;  %v3945_v1 = vceil.f32 %v3705_v63  ;;  %v4065_v12 = vfloor.f32 %v3705_v63  ;;  %vm3804_vm0 = vcmp.lt.f32.partialorder %v8202_v29, 0.0  ;;  %vm3827_vm13 = vcmp.lt.f32.partialorder %v3707_v55, 0.0 }
 0x2f4   : > { %v3947_v6 = vceil.f32 %v3707_v55  ;;  %v4067_v50 = vfloor.f32 %v3707_v55  ;;  %v3706_v28 = vmax.f32 %v3424_v58, 0.0  ;;  %v3485_v0 = vadd.f32 %v3484_v59, %v7491_v61 }
 0x2f5   : > { %v4185_v54 = vsel %vm3825_vm12, %v3945_v1, %v4065_v12  ;;  %v4114_v52 = vsel %vm3754_vm5, %v3874_v30, %v3994_v40  ;;  %v4138_v20 = vsel %vm3778_vm7, %v3898_v26, %v4018_v43  ;;  %v4283_v3 = vmin.f32 %v8210_v39, 127.0 }
 0x2f6   : > { %v4305_v31 = vmin.f32 %v4185_v54, 127.0  ;;  %v4187_v11 = vsel %vm3827_vm13, %v3947_v6, %v4067_v50  ;;  %vm3826_vm14 = vcmp.lt.f32.partialorder %v3706_v28, 0.0  ;;  %v3946_v58 = vceil.f32 %v3706_v28 }
 0x2f7   : > { %v4307_v44 = vmin.f32 %v4187_v11, 127.0  ;;  %v3708_v63 = vmax.f32 %v3485_v0, 0.0  ;;  %v4234_v55 = vmin.f32 %v4114_v52, 127.0  ;;  %v4258_v59 = vmin.f32 %v4138_v20, 127.0 }
 0x2f8   : > { %v4116_v14 = vsel %vm3756_vm8, %v3876_v32, %v3996_v16  ;;  %v4140_v30 = vsel %vm3780_vm9, %v3900_v5, %v4020_v45  ;;  %v3428_v40 = vadd.f32 %v3427_v9, %v7493_v4  ;;  %v4066_v10 = vfloor.f32 %v3706_v28 }
 0x2f9   : > { %vm3828_vm15 = vcmp.lt.f32.partialorder %v3708_v63, 0.0  ;;  %v3948_v26 = vceil.f32 %v3708_v63  ;;  %v4236_v43 = vmin.f32 %v4116_v14, 127.0  ;;  %v4354_v24 = vpack.c.bf16 %v4258_v59, %v4234_v55 }
 0x2fa   : > { %v4260_v41 = vmin.f32 %v4140_v30, 127.0  ;;  %v3729_v15 = vmax.f32 %v3428_v40, 0.0  ;;  %v3489_v36 = vadd.f32 %v3488_v60, %v7493_v4  ;;  %v4353_v7 = vpack.c.bf16 %v4257_v62, %v4233_v53 }
 0x2fb   : > { %v4355_v32 = vpack.c.bf16 %v4259_v56, %v4235_v57  ;;  %v3430_v48 = vadd.f32 %v3429_v42, %v7493_v4  ;;  %v3491_v16 = vadd.f32 %v3490_v22, %v7493_v4  ;;  %4928 = vmatprep.subr.bf16.mxu0 %v4354_v24  ;;  %v4162_v2 = vsel %vm3802_vm6, %v3922_v18, %v4042_v49 }
 0x2fc   : > { %v4356_v9 = vpack.c.bf16 %v4260_v41, %v4236_v43  ;;  %vm3849_vm1 = vcmp.lt.f32.partialorder %v3729_v15, 0.0  ;;  %v3969_v5 = vceil.f32 %v3729_v15  ;;  %v4089_v45 = vfloor.f32 %v3729_v15  ;;  %4929 = vmatpush1.bf16.msra.mxu0 %v4353_v7 }
 0x2fd   : > { %v3731_v27 = vmax.f32 %v3489_v36, 0.0  ;;  %v3730_v60 = vmax.f32 %v3430_v48, 0.0  ;;  %v3732_v39 = vmax.f32 %v3491_v16, 0.0  ;;  %v4068_v53 = vfloor.f32 %v3708_v63 }
 0x2fe   : > { %4979 = vmatprep.subr.bf16.mxu1 %v4356_v9  ;;  %v4209_v23 = vsel %vm3849_vm1, %v3969_v5, %v4089_v45  ;;  %v4186_v57 = vsel %vm3826_vm14, %v3946_v58, %v4066_v10  ;;  %v4282_v8 = vmin.f32 %v4162_v2, 127.0  ;;  %v4164_v42 = vsel %vm3804_vm0, %v3924_v34, %v4044_v17 }
 0x2ff   : > { %vm3851_vm3 = vcmp.lt.f32.partialorder %v3731_v27, 0.0  ;;  %v3971_v62 = vceil.f32 %v3731_v27  ;;  %v4091_v22 = vfloor.f32 %v3731_v27  ;;  %4980 = vmatpush1.bf16.msra.mxu1 %v4355_v32  ;;  %v4329_v56 = vmin.f32 %v4209_v23, 127.0 }
 0x300   : > { %vm3850_vm4 = vcmp.lt.f32.partialorder %v3730_v60, 0.0  ;;  %v3970_v35 = vceil.f32 %v3730_v60  ;;  %v4090_v1 = vfloor.f32 %v3730_v60  ;;  %vm3852_vm5 = vcmp.lt.f32.partialorder %v3732_v39, 0.0 }
 0x301   : > { %v4211_v12 = vsel %vm3851_vm3, %v3971_v62, %v4091_v22  ;;  %v3972_v37 = vceil.f32 %v3732_v39  ;;  %v4092_v18 = vfloor.f32 %v3732_v39  ;;  %v4306_v6 = vmin.f32 %v4186_v57, 127.0 }
 0x302   : > { %v4331_v49 = vmin.f32 %v4211_v12, 127.0  ;;  %v4188_v50 = vsel %vm3828_vm15, %v3948_v26, %v4068_v53  ;;  %v4284_v28 = vmin.f32 %v4164_v42, 127.0  ;;  %v4377_v0 = vpack.c.bf16 %v4305_v31, %v4281_v51 }
 0x303   : > { %v4308_v54 = vmin.f32 %v4188_v50, 127.0  ;;  %v4379_v52 = vpack.c.bf16 %v4307_v44, %v4283_v3  ;;  %v4210_v29 = vsel %vm3850_vm4, %v3970_v35, %v4090_v1  ;;  %v4378_v34 = vpack.c.bf16 %v4306_v6, %v4282_v8 }
 0x304   : > { %v4330_v17 = vmin.f32 %v4210_v29, 127.0  ;;  %v4212_v20 = vsel %vm3852_vm5, %v3972_v37, %v4092_v18  ;;  %v4401_v11 = vpack.c.bf16 %v4329_v56, %v4329_v56  ;;  %v4403_v59 = vpack.c.bf16 %v4331_v49, %v4331_v49 }
 0x305   : > { %v4380_v58 = vpack.c.bf16 %v4308_v54, %v4284_v28  ;;  %v4332_v55 = vmin.f32 %v4212_v20, 127.0  ;;  %4930 = vmatprep.subr.bf16.mxu0 %v4378_v34 }
 0x306   : > { %v4402_v14 = vpack.c.bf16 %v4330_v17, %v4330_v17  ;;  %4931 = vmatpush1.bf16.msra.mxu0 %v4377_v0  ;;  %v4497_v3 = vand.u32 %v7635_v21, %v4401_v11  ;;  %v4503_v44 = vand.u32 %v7635_v21, %v4403_v59 }
 0x307   : > { %4981 = vmatprep.subr.bf16.mxu1 %v4380_v58  ;;  %v4404_v63 = vpack.c.bf16 %v4332_v55, %v4332_v55 }
 0x308   : > { %4982 = vmatpush1.bf16.msra.mxu1 %v4379_v52  ;;  %v4500_v30 = vand.u32 %v7635_v21, %v4402_v14 }
 0x309   : > { %v4506_v19 = vand.u32 %v7635_v21, %v4404_v63 }
 0x30a   : > { %v3529_v51 = vpop.f32.mrb[156].mxu0  ;;  %4932 = vmatprep.subr.bf16.mxu0 %v4500_v30 }
 0x30b   : > { %v3530_v31 = vadd.f32 %v3529_v51, %v7422_v25  ;;  %v3531_v40 = vpop.f32.mrb[157].mxu0  ;;  %4983 = vmatprep.subr.bf16.mxu1 %v4506_v19  ;;  %4933 = vmatpush1.bf16.msra.mxu0 %v4497_v3 }
 0x30c   : > { %v3590_v10 = vpop.f32.mrb[156].mxu1  ;;  %v3532_v26 = vadd.f32 %v3531_v40, %v7422_v25  ;;  %v3533_v43 = vpop.f32.mrb[158].mxu0  ;;  %4984 = vmatpush1.bf16.msra.mxu1 %v4503_v44 }
 0x30d   : > { %v3637_v24 = vmax.f32 %v3530_v31, 0.0  ;;  %v3591_v41 = vadd.f32 %v3590_v10, %v7422_v25  ;;  %v3592_v15 = vpop.f32.mrb[157].mxu1  ;;  %v3535_v36 = vpop.f32.mrb[159].mxu0  ;;  %v3534_v48 = vadd.f32 %v3533_v43, %v7456_v38 }
 0x30e   : > { %v8261_v7 = vmax.f32 %v3532_v26, 0.0  ;;  %v3593_v32 = vadd.f32 %v3592_v15, %v7422_v25  ;;  %v3594_v16 = vpop.f32.mrb[158].mxu1  ;;  %5566 = vmatmul.mubr.msk.bf16.vlgmr.msra.gmra.mrb[200].mxu0 %vm4438_vm2, %v8135_v46  ;;  %v3536_v60 = vadd.f32 %v3535_v36, %v7456_v38 }
 0x30f   : > { %vm3757_vm7 = vcmp.lt.f32.partialorder %v3637_v24, 0.0  ;;  %v3877_v9 = vceil.f32 %v3637_v24  ;;  %v3997_v5 = vfloor.f32 %v3637_v24  ;;  %v3639_v45 = vmax.f32 %v3591_v41, 0.0  ;;  %v3596_v27 = vpop.f32.mrb[159].mxu1  ;;  %5568 = vmatmul.mubr.msk.bf16.vlgmr.msra.gmra.mrb[200].mxu1 %vm4438_vm2, %v8135_v46  ;;  %4970 = vmatprep.mubr.bf16.mxu0 %v8512_v33 }
 0x310   : > { %5021 = vmatprep.mubr.bf16.mxu1 %v8512_v33  ;;  %v3878_v53 = vceil.f32 %v8261_v7  ;;  %v3998_v23 = vfloor.f32 %v8261_v7  ;;  %v8276_v57 = vmax.f32 %v3593_v32, 0.0  ;;  %v3661_v42 = vmax.f32 %v3534_v48, 0.0 }
 0x311   : > { %v8271_v39 = vsel %vm3757_vm7, %v3877_v9, %v3997_v5  ;;  %vm3759_vm8 = vcmp.lt.f32.partialorder %v3639_v45, 0.0  ;;  %v3879_v25 = vceil.f32 %v3639_v45  ;;  %v3999_v2 = vfloor.f32 %v3639_v45 }
 0x312   : > { %v3539_v8 = vpop.f32.mrb[160].mxu0  ;;  %v4237_v62 = vmin.f32 %v8271_v39, 127.0  ;;  %v3595_v56 = vadd.f32 %v3594_v16, %v7456_v38  ;;  %v8282_v1 = vmax.f32 %v3536_v60, 0.0  ;;  %v3597_v12 = vadd.f32 %v3596_v27, %v7456_v38 }
 0x313   : > { %v8279_v22 = vsel %vm3759_vm8, %v3879_v25, %v3999_v2  ;;  %v3541_v35 = vpop.f32.mrb[161].mxu0  ;;  %v3540_v37 = vadd.f32 %v3539_v8, %v7466_v47  ;;  %vm3758_vm9 = vcmp.lt.f32.partialorder %v8261_v7, 0.0  ;;  %vm3781_vm10 = vcmp.lt.f32.partialorder %v3661_v42, 0.0 }
 0x314   : > { %v3600_v18 = vpop.f32.mrb[160].mxu1  ;;  %v3542_v49 = vadd.f32 %v3541_v35, %v7466_v47  ;;  %v3543_v6 = vpop.f32.mrb[162].mxu0  ;;  %v3901_v50 = vceil.f32 %v3661_v42  ;;  %v4021_v28 = vfloor.f32 %v3661_v42  ;;  %v3663_v54 = vmax.f32 %v3595_v56, 0.0 }
 0x315   : > { %v3602_v0 = vpop.f32.mrb[161].mxu1  ;;  %v3545_v52 = vpop.f32.mrb[163].mxu0  ;;  %v4239_v29 = vmin.f32 %v8279_v22, 127.0  ;;  %v3880_v34 = vceil.f32 %v8276_v57  ;;  %v4000_v38 = vfloor.f32 %v8276_v57  ;;  %v8291_v17 = vmax.f32 %v3597_v12, 0.0 }
 0x316   : > { %v3604_v20 = vpop.f32.mrb[162].mxu1  ;;  %v8293_v11 = vsel %vm3781_vm10, %v3901_v50, %v4021_v28  ;;  %vm3783_vm11 = vcmp.lt.f32.partialorder %v3663_v54, 0.0  ;;  %v3903_v58 = vceil.f32 %v3663_v54  ;;  %v4023_v55 = vfloor.f32 %v3663_v54  ;;  %5567 = vmatmul.mubr.msk.bf16.gmra.mrb[204].mxu0 %vm4438_vm2, %v8150_v13 }
 0x317   : > { %v3606_v59 = vpop.f32.mrb[163].mxu1  ;;  %vm3760_vm6 = vcmp.lt.f32.partialorder %v8276_v57, 0.0  ;;  %v4261_v14 = vmin.f32 %v8293_v11, 127.0  ;;  %vm3782_vm12 = vcmp.lt.f32.partialorder %v8282_v1, 0.0  ;;  %v3902_v63 = vceil.f32 %v8282_v1  ;;  %5569 = vmatmul.mubr.msk.bf16.gmra.mrb[204].mxu1 %vm4438_vm2, %v8150_v13  ;;  %5062 = vmatprep.mubr.bf16.mxu0 %v8512_v33 }
 0x318   : > { %v4022_v30 = vfloor.f32 %v8282_v1  ;;  %v8305_v19 = vsel %vm3783_vm11, %v3903_v58, %v4023_v55  ;;  %v3685_v51 = vmax.f32 %v3540_v37, 0.0  ;;  %v3601_v3 = vadd.f32 %v3600_v18, %v7466_v47  ;;  %5113 = vmatprep.mubr.bf16.mxu1 %v8512_v33 }
 0x319   : > { %v8308_v31 = vmax.f32 %v3542_v49, 0.0  ;;  %v3904_v44 = vceil.f32 %v8291_v17  ;;  %v3603_v40 = vadd.f32 %v3602_v0, %v7466_v47  ;;  %v3544_v10 = vadd.f32 %v3543_v6, %v7491_v61 }
 0x31a   : > { %v3605_v26 = vadd.f32 %v3604_v20, %v7491_v61  ;;  %v3549_v43 = vpop.f32.mrb[164].mxu0  ;;  %vm3784_vm0 = vcmp.lt.f32.partialorder %v8291_v17, 0.0  ;;  %vm3805_vm13 = vcmp.lt.f32.partialorder %v3685_v51, 0.0  ;;  %v3925_v24 = vceil.f32 %v3685_v51 }
 0x31b   : > { %v4045_v41 = vfloor.f32 %v3685_v51  ;;  %v3687_v15 = vmax.f32 %v3601_v3, 0.0  ;;  %v3551_v36 = vpop.f32.mrb[165].mxu0  ;;  %v4263_v32 = vmin.f32 %v8305_v19, 127.0  ;;  %v4024_v48 = vfloor.f32 %v8291_v17 }
 0x31c   : > { %v3926_v16 = vceil.f32 %v8308_v31  ;;  %v8319_v9 = vmax.f32 %v3603_v40, 0.0  ;;  %v3610_v47 = vpop.f32.mrb[164].mxu1  ;;  %v3553_v5 = vpop.f32.mrb[166].mxu0  ;;  %vm3806_vm15 = vcmp.lt.f32.partialorder %v8308_v31, 0.0  ;;  %v4046_v42 = vfloor.f32 %v8308_v31 }
 0x31d   : > { %v8321_v45 = vsel %vm3805_vm13, %v3925_v24, %v4045_v41  ;;  %vm3807_vm14 = vcmp.lt.f32.partialorder %v3687_v15, 0.0  ;;  %v3927_v27 = vceil.f32 %v3687_v15  ;;  %v4047_v60 = vfloor.f32 %v3687_v15  ;;  %v3612_v25 = vpop.f32.mrb[165].mxu1  ;;  %v3554_v2 = vpop.f32.mrb[167].mxu0 }
 0x31e   : > { %v4285_v8 = vmin.f32 %v8321_v45, 127.0  ;;  %v3928_v56 = vceil.f32 %v8319_v9  ;;  %v4048_v35 = vfloor.f32 %v8319_v9  ;;  %v3614_v12 = vpop.f32.mrb[166].mxu1  ;;  %v3709_v18 = vmax.f32 %v3544_v10, 0.0 }
 0x31f   : > { %v8328_v37 = vsel %vm3807_vm14, %v3927_v27, %v4047_v60  ;;  %v3711_v49 = vmax.f32 %v3605_v26, 0.0  ;;  %v3546_v6 = vadd.f32 %v3545_v52, %v7491_v61  ;;  %v3615_v50 = vpop.f32.mrb[167].mxu1  ;;  %v3607_v54 = vadd.f32 %v3606_v59, %v7491_v61 }
 0x320   : > { %v4287_v28 = vmin.f32 %v8328_v37, 127.0  ;;  %v4118_v0 = vsel %vm3758_vm9, %v3878_v53, %v3998_v23  ;;  %v4142_v20 = vsel %vm3782_vm12, %v3902_v63, %v4022_v30  ;;  %vm3829_vm1 = vcmp.lt.f32.partialorder %v3709_v18, 0.0 }
 0x321   : > { %v3949_v58 = vceil.f32 %v3709_v18  ;;  %v4069_v55 = vfloor.f32 %v3709_v18  ;;  %vm3831_vm3 = vcmp.lt.f32.partialorder %v3711_v49, 0.0  ;;  %v3951_v52 = vceil.f32 %v3711_v49 }
 0x322   : > { %v4071_v19 = vfloor.f32 %v3711_v49  ;;  %v3710_v51 = vmax.f32 %v3546_v6, 0.0  ;;  %v3712_v3 = vmax.f32 %v3607_v54, 0.0  ;;  %v4238_v61 = vmin.f32 %v4118_v0, 127.0 }
 0x323   : > { %v4189_v40 = vsel %vm3829_vm1, %v3949_v58, %v4069_v55  ;;  %v4262_v59 = vmin.f32 %v4142_v20, 127.0  ;;  %v4120_v7 = vsel %vm3760_vm6, %v3880_v34, %v4000_v38  ;;  %vm3808_vm4 = vcmp.lt.f32.partialorder %v8319_v9, 0.0 }
 0x324   : > { %v4309_v53 = vmin.f32 %v4189_v40, 127.0  ;;  %v4191_v23 = vsel %vm3831_vm3, %v3951_v52, %v4071_v19  ;;  %vm3830_vm5 = vcmp.lt.f32.partialorder %v3710_v51, 0.0  ;;  %v3950_v1 = vceil.f32 %v3710_v51 }
 0x325   : > { %v4311_v63 = vmin.f32 %v4191_v23, 127.0  ;;  %v4070_v30 = vfloor.f32 %v3710_v51  ;;  %vm3832_vm7 = vcmp.lt.f32.partialorder %v3712_v3, 0.0  ;;  %v3952_v10 = vceil.f32 %v3712_v3 }
 0x326   : > { %v4072_v26 = vfloor.f32 %v3712_v3  ;;  %v4358_v24 = vpack.c.bf16 %v4262_v59, %v4238_v61  ;;  %v4144_v41 = vsel %vm3784_vm0, %v3904_v44, %v4024_v48  ;;  %v4240_v15 = vmin.f32 %v4120_v7, 127.0  ;;  %v8378_v3 = vpop.permute.xlu0 %4417 }
 0x327   : > { %v4264_v5 = vmin.f32 %v4144_v41, 127.0  ;;  %v3550_v57 = vadd.f32 %v3549_v43, %v7493_v4  ;;  %v3611_v34 = vadd.f32 %v3610_v47, %v7493_v4  ;;  %v4357_v38 = vpack.c.bf16 %v4261_v14, %v4237_v62 }
 0x328   : > { %5030 = vmatprep.subr.bf16.mxu0 %v4358_v24  ;;  %v4359_v27 = vpack.c.bf16 %v4263_v32, %v4239_v29  ;;  %v3552_v60 = vadd.f32 %v3551_v36, %v7493_v4  ;;  %v3613_v17 = vadd.f32 %v3612_v25, %v7493_v4  ;;  %v4166_v44 = vsel %vm3806_vm15, %v3926_v16, %v4046_v42  ;;  %v8363_v42 = vpop.permute.xlu1 %4427 }
 0x329   : > { %v4360_v48 = vpack.c.bf16 %v4264_v5, %v4240_v15  ;;  %v3733_v43 = vmax.f32 %v3550_v57, 0.0  ;;  %v3735_v2 = vmax.f32 %v3611_v34, 0.0  ;;  %5031 = vmatpush1.bf16.msra.mxu0 %v4357_v38  ;;  %v4190_v39 = vsel %vm3830_vm5, %v3950_v1, %v4070_v30 }
 0x32a   : > { %v3734_v47 = vmax.f32 %v3552_v60, 0.0  ;;  %v3736_v11 = vmax.f32 %v3613_v17, 0.0  ;;  %v4286_v62 = vmin.f32 %v4166_v44, 127.0  ;;  %v4310_v14 = vmin.f32 %v4190_v39, 127.0 }
 0x32b   : > { %5081 = vmatprep.subr.bf16.mxu1 %v4360_v48  ;;  %vm3853_vm8 = vcmp.lt.f32.partialorder %v3733_v43, 0.0  ;;  %v3973_v22 = vceil.f32 %v3733_v43  ;;  %v4093_v29 = vfloor.f32 %v3733_v43  ;;  %vm3855_vm9 = vcmp.lt.f32.partialorder %v3735_v2, 0.0 }
 0x32c   : > { %v3975_v36 = vceil.f32 %v3735_v2  ;;  %v4095_v4 = vfloor.f32 %v3735_v2  ;;  %5082 = vmatpush1.bf16.msra.mxu1 %v4359_v27  ;;  %vm3854_vm10 = vcmp.lt.f32.partialorder %v3734_v47, 0.0  ;;  %v3974_v31 = vceil.f32 %v3734_v47  ;;  %v8380_v45 = vpop.permute.xlu1 %4422 }
 0x32d   : > { %v4213_v32 = vsel %vm3853_vm8, %v3973_v22, %v4093_v29  ;;  %v4094_v16 = vfloor.f32 %v3734_v47  ;;  %vm3856_vm11 = vcmp.lt.f32.partialorder %v3736_v11, 0.0  ;;  %v3976_v25 = vceil.f32 %v3736_v11 }
 0x32e   : > { %v4333_v12 = vmin.f32 %v4213_v32, 127.0  ;;  %v4215_v18 = vsel %vm3855_vm9, %v3975_v36, %v4095_v4  ;;  %v4096_v49 = vfloor.f32 %v3736_v11  ;;  %v4382_v6 = vpack.c.bf16 %v4310_v14, %v4286_v62 }
 0x32f   : > { %v4335_v50 = vmin.f32 %v4215_v18, 127.0  ;;  %v4168_v54 = vsel %vm3808_vm4, %v3928_v56, %v4048_v35  ;;  %v4192_v0 = vsel %vm3832_vm7, %v3952_v10, %v4072_v26  ;;  %v4381_v20 = vpack.c.bf16 %v4309_v53, %v4285_v8 }
 0x330   : > { %5032 = vmatprep.subr.bf16.mxu0 %v4382_v6  ;;  %v4288_v58 = vmin.f32 %v4168_v54, 127.0  ;;  %v4312_v55 = vmin.f32 %v4192_v0, 127.0  ;;  %v4383_v52 = vpack.c.bf16 %v4311_v63, %v4287_v28  ;;  %v4214_v19 = vsel %vm3854_vm10, %v3974_v31, %v4094_v16 }
 0x331   : > { %5033 = vmatpush1.bf16.msra.mxu0 %v4381_v20  ;;  %v4216_v51 = vsel %vm3856_vm11, %v3976_v25, %v4096_v49  ;;  %v4334_v61 = vmin.f32 %v4214_v19, 127.0  ;;  %v4405_v56 = vpack.c.bf16 %v4333_v12, %v4333_v12  ;;  %v4407_v35 = vpack.c.bf16 %v4335_v50, %v4335_v50 }
 0x332   : > { %v4384_v40 = vpack.c.bf16 %v4312_v55, %v4288_v58  ;;  %v4336_v9 = vmin.f32 %v4216_v51, 127.0  ;;  %vm5222_vm6 = vcmask 1043456   ;;  %vm5314_vm12 = vcmask 15360  }
 0x333   : > { %v4406_v8 = vpack.c.bf16 %v4334_v61, %v4334_v61  ;;  %v4509_v10 = vand.u32 %v7635_v21, %v4405_v56  ;;  %v4515_v26 = vand.u32 %v7635_v21, %v4407_v35  ;;  %vm5318_vm0 = vcmask 23552  }
 0x334   : > { %5083 = vmatprep.subr.bf16.mxu1 %v4384_v40  ;;  %v4408_v59 = vpack.c.bf16 %v4336_v9, %v4336_v9  ;;  %vm5321_vm13 = vcmask 19456  }
 0x335   : > { %5084 = vmatpush1.bf16.msra.mxu1 %v4383_v52  ;;  %v4554_v37 = vpop.f32.mrb[168].mxu0  ;;  %v4512_v7 = vand.u32 %v7635_v21, %v4406_v8 }
 0x336   : > { %v4605_v28 = vpop.f32.mrb[168].mxu1  ;;  %v4518_v53 = vand.u32 %v7635_v21, %v4408_v59  ;;  %v4555_v23 = vadd.f32 %v4554_v37, %v8378_v3  ;;  %v4556_v63 = vpop.f32.mrb[169].mxu0 }
 0x337   : > { %v4606_v1 = vadd.f32 %v4605_v28, %v8378_v3  ;;  %v4607_v30 = vpop.f32.mrb[169].mxu1  ;;  %v4557_v24 = vadd.f32 %v4556_v63, %v8378_v3  ;;  %v4558_v15 = vpop.f32.mrb[170].mxu0  ;;  %5034 = vmatprep.subr.bf16.mxu0 %v4512_v7 }
 0x338   : > { %v4608_v41 = vadd.f32 %v4607_v30, %v8378_v3  ;;  %v4609_v5 = vpop.f32.mrb[170].mxu1  ;;  %5085 = vmatprep.subr.bf16.mxu1 %v4518_v53  ;;  %v5132_v57 = vmax.f32 %v4555_v23, 0.0  ;;  %v4559_v38 = vadd.f32 %v4558_v15, %v8380_v45  ;;  %v4560_v60 = vpop.f32.mrb[171].mxu0  ;;  %5035 = vmatpush1.bf16.msra.mxu0 %v4509_v10 }
 0x339   : > { %v5134_v34 = vmax.f32 %v4606_v1, 0.0  ;;  %v4610_v27 = vadd.f32 %v4609_v5, %v8380_v45  ;;  %v4611_v17 = vpop.f32.mrb[171].mxu1  ;;  %5086 = vmatpush1.bf16.msra.mxu1 %v4515_v26  ;;  %v5133_v44 = vmax.f32 %v4557_v24, 0.0  ;;  %v4561_v48 = vadd.f32 %v4560_v60, %v8380_v45 }
 0x33a   : > { %v5135_v21 = vmax.f32 %v4608_v41, 0.0  ;;  %v4612_v43 = vadd.f32 %v4611_v17, %v8380_v45  ;;  %v5156_v39 = vmax.f32 %v4559_v38, 0.0 }
 0x33b   : > { %v5204_v2 = vmax.f32 %v5132_v57, %v5134_v34  ;;  %v5158_v47 = vmax.f32 %v4610_v27, 0.0  ;;  %v5157_v62 = vmax.f32 %v4561_v48, 0.0  ;;  %5570 = vmatmul.mubr.msk.bf16.vlgmr.msra.gmra.mrb[208].mxu0 %vm4438_vm2, %v8135_v46 }
 0x33c   : > { %v5205_v11 = vmax.f32 %v5133_v44, %v5135_v21  ;;  %v5159_v14 = vmax.f32 %v4612_v43, 0.0  ;;  %5572 = vmatmul.mubr.msk.bf16.vlgmr.msra.gmra.mrb[208].mxu1 %vm4438_vm2, %v8135_v46  ;;  %5072 = vmatprep.mubr.bf16.mxu0 %v8512_v33 }
 0x33d   : > { %v5213_v22 = vmax.f32 %v5156_v39, %v5158_v47  ;;  %5123 = vmatprep.mubr.bf16.mxu1 %v8512_v33  ;;  %v4564_v36 = vpop.f32.mrb[172].mxu0 }
 0x33e   : > { %v5214_v29 = vmax.f32 %v5157_v62, %v5159_v14  ;;  %v4615_v4 = vpop.f32.mrb[172].mxu1  ;;  %v4565_v31 = vadd.f32 %v4564_v36, %v8363_v42  ;;  %v4566_v16 = vpop.f32.mrb[173].mxu0 }
 0x33f   : > { %v4616_v32 = vadd.f32 %v4615_v4, %v8363_v42  ;;  %v4617_v25 = vpop.f32.mrb[173].mxu1  ;;  %v4567_v12 = vadd.f32 %v4566_v16, %v8363_v42  ;;  %v4568_v46 = vpop.f32.mrb[174].mxu0 }
 0x340   : > { %v4618_v18 = vadd.f32 %v4617_v25, %v8363_v42  ;;  %v4619_v49 = vpop.f32.mrb[174].mxu1  ;;  %v5180_v6 = vmax.f32 %v4565_v31, 0.0  ;;  %v4569_v54 = vpop.f32.mrb[175].mxu0 }
 0x341   : > { %v5182_v50 = vmax.f32 %v4616_v32, 0.0  ;;  %v4620_v33 = vpop.f32.mrb[175].mxu1  ;;  %v5181_v0 = vmax.f32 %v4567_v12, 0.0 }
 0x342   : > { %v5183_v20 = vmax.f32 %v4618_v18, 0.0  ;;  %v5223_v58 = vsel %vm5222_vm6, %v5180_v6, -inf }
 0x343   : > { %v5225_v55 = vsel %vm5222_vm6, %v5182_v50, -inf  ;;  %v5224_v19 = vsel %vm5222_vm6, %v5181_v0, -inf  ;;  %5571 = vmatmul.mubr.msk.bf16.gmra.mrb[212].mxu0 %vm4438_vm2, %v8150_v13 }
 0x344   : > { %v5226_v52 = vmax.f32 %v5223_v58, %v5225_v55  ;;  %v5227_v51 = vsel %vm5222_vm6, %v5183_v20, -inf  ;;  %5573 = vmatmul.mubr.msk.bf16.gmra.mrb[212].mxu1 %vm4438_vm2, %v8150_v13  ;;  %vm5310_vm2 = vcmask 7168  }
 0x345   : > { %v5228_v40 = vmax.f32 %v5224_v19, %v5227_v51 }
 0x35b   : > { %v4656_v61 = vpop.f32.mrb[176].mxu0 }
 0x35c   : > { %v4657_v9 = vadd.f32 %v4656_v61, %v8378_v3  ;;  %v4707_v56 = vpop.f32.mrb[176].mxu1  ;;  %v4658_v35 = vpop.f32.mrb[177].mxu0 }
 0x35d   : > { %v4708_v8 = vadd.f32 %v4707_v56, %v8378_v3  ;;  %v4659_v59 = vadd.f32 %v4658_v35, %v8378_v3  ;;  %v4709_v37 = vpop.f32.mrb[177].mxu1  ;;  %v4660_v28 = vpop.f32.mrb[178].mxu0 }
 0x35e   : > { %v5136_v7 = vmax.f32 %v4657_v9, 0.0  ;;  %v4710_v53 = vadd.f32 %v4709_v37, %v8378_v3  ;;  %v4661_v23 = vadd.f32 %v4660_v28, %v8380_v45  ;;  %v4711_v1 = vpop.f32.mrb[178].mxu1  ;;  %v4662_v63 = vpop.f32.mrb[179].mxu0 }
 0x35f   : > { %v5137_v13 = vmax.f32 %v4659_v59, 0.0  ;;  %v4712_v30 = vadd.f32 %v4711_v1, %v8380_v45  ;;  %v4663_v10 = vadd.f32 %v4662_v63, %v8380_v45  ;;  %v4713_v26 = vpop.f32.mrb[179].mxu1  ;;  %v5138_v41 = vmax.f32 %v4708_v8, 0.0 }
 0x360   : > { %v5206_v24 = vmax.f32 %v5204_v2, %v5136_v7  ;;  %v5160_v15 = vmax.f32 %v4661_v23, 0.0  ;;  %v4714_v5 = vadd.f32 %v4713_v26, %v8380_v45  ;;  %v5139_v34 = vmax.f32 %v4710_v53, 0.0 }
 0x361   : > { %v5207_v57 = vmax.f32 %v5205_v11, %v5137_v13  ;;  %v5161_v38 = vmax.f32 %v4663_v10, 0.0  ;;  %v5162_v17 = vmax.f32 %v4712_v30, 0.0 }
 0x362   : > { %v5208_v27 = vmax.f32 %v5206_v24, %v5138_v41  ;;  %v5215_v60 = vmax.f32 %v5213_v22, %v5160_v15  ;;  %v5163_v48 = vmax.f32 %v4714_v5, 0.0 }
 0x363   : > { %v5209_v44 = vmax.f32 %v5207_v57, %v5139_v34  ;;  %v5216_v21 = vmax.f32 %v5214_v29, %v5161_v38  ;;  %v4666_v43 = vpop.f32.mrb[180].mxu0 }
 0x364   : > { %v5217_v39 = vmax.f32 %v5215_v60, %v5162_v17  ;;  %v4667_v47 = vadd.f32 %v4666_v43, %v8363_v42  ;;  %v4717_v62 = vpop.f32.mrb[180].mxu1  ;;  %v4668_v14 = vpop.f32.mrb[181].mxu0 }
 0x365   : > { %v5218_v2 = vmax.f32 %v5216_v21, %v5163_v48  ;;  %v4718_v36 = vadd.f32 %v4717_v62, %v8363_v42  ;;  %v4669_v4 = vadd.f32 %v4668_v14, %v8363_v42  ;;  %v4719_v11 = vpop.f32.mrb[181].mxu1  ;;  %v5210_v31 = vmax.f32 %v5208_v27, %v5209_v44  ;;  %v4670_v32 = vpop.f32.mrb[182].mxu0 }
 0x366   : > { %v5184_v16 = vmax.f32 %v4667_v47, 0.0  ;;  %v4720_v22 = vadd.f32 %v4719_v11, %v8363_v42  ;;  %v4721_v25 = vpop.f32.mrb[182].mxu1  ;;  %v4671_v29 = vpop.f32.mrb[183].mxu0 }
 0x367   : > { %v5186_v12 = vmax.f32 %v4718_v36, 0.0  ;;  %v5185_v18 = vmax.f32 %v4669_v4, 0.0  ;;  %5211 = vmax.xlane.f32.xlu0 %v5210_v31  ;;  %v5219_v46 = vmax.f32 %v5217_v39, %v5218_v2  ;;  %v4722_v49 = vpop.f32.mrb[183].mxu1 }
 0x368   : > { %v5229_v6 = vsel %vm5222_vm6, %v5184_v16, -inf  ;;  %v5187_v50 = vmax.f32 %v4720_v22, 0.0 }
 0x369   : > { %v5230_v54 = vmax.f32 %v5226_v52, %v5229_v6  ;;  %v5231_v33 = vsel %vm5222_vm6, %v5185_v18, -inf  ;;  %5220 = vmax.xlane.f32.xlu1 %v5219_v46  ;;  %v5233_v0 = vsel %vm5222_vm6, %v5186_v12, -inf }
 0x36a   : > { %v5232_v20 = vmax.f32 %v5228_v40, %v5231_v33  ;;  %v5235_v58 = vsel %vm5222_vm6, %v5187_v50, -inf }
 0x36b   : > { %v5234_v55 = vmax.f32 %v5230_v54, %v5233_v0 }
 0x36c   : > { %v5236_v19 = vmax.f32 %v5232_v20, %v5235_v58 }
 0x36e   : > { %v5237_v51 = vmax.f32 %v5234_v55, %v5236_v19 }
 0x370   : > { %5238 = vmax.xlane.f32.xlu0 %v5237_v51 }
 0x381   : > { %v4758_v61 = vpop.f32.mrb[184].mxu0 }
 0x382   : > { %v4759_v9 = vadd.f32 %v4758_v61, %v8378_v3  ;;  %v4760_v35 = vpop.f32.mrb[185].mxu0 }
 0x383   : > { %v4809_v56 = vpop.f32.mrb[184].mxu1  ;;  %v4761_v52 = vadd.f32 %v4760_v35, %v8378_v3  ;;  %v4762_v37 = vpop.f32.mrb[186].mxu0 }
 0x384   : > { %v4810_v8 = vadd.f32 %v4809_v56, %v8378_v3  ;;  %v4811_v59 = vpop.f32.mrb[185].mxu1  ;;  %v5140_v28 = vmax.f32 %v4759_v9, 0.0  ;;  %v4763_v7 = vadd.f32 %v4762_v37, %v8380_v45  ;;  %v4764_v23 = vpop.f32.mrb[187].mxu0 }
 0x385   : > { %v4812_v40 = vadd.f32 %v4811_v59, %v8378_v3  ;;  %v4813_v53 = vpop.f32.mrb[186].mxu1  ;;  %v5141_v63 = vmax.f32 %v4761_v52, 0.0  ;;  %v4765_v30 = vadd.f32 %v4764_v23, %v8380_v45 }
 0x386   : > { %v5142_v1 = vmax.f32 %v4810_v8, 0.0  ;;  %v4814_v13 = vadd.f32 %v4813_v53, %v8380_v45  ;;  %v4815_v10 = vpop.f32.mrb[187].mxu1  ;;  %v5164_v24 = vmax.f32 %v4763_v7, 0.0 }
 0x387   : > { %v5143_v26 = vmax.f32 %v4812_v40, 0.0  ;;  %v4816_v41 = vadd.f32 %v4815_v10, %v8380_v45  ;;  %v5165_v57 = vmax.f32 %v4765_v30, 0.0 }
 0x388   : > { %v5240_v15 = vmax.f32 %v5140_v28, %v5142_v1  ;;  %v5166_v5 = vmax.f32 %v4814_v13, 0.0 }
 0x389   : > { %v5241_v34 = vmax.f32 %v5141_v63, %v5143_v26  ;;  %v5167_v38 = vmax.f32 %v4816_v41, 0.0  ;;  %v4768_v60 = vpop.f32.mrb[188].mxu0 }
 0x38a   : > { %v5249_v27 = vmax.f32 %v5164_v24, %v5166_v5  ;;  %v4769_v44 = vadd.f32 %v4768_v60, %v8363_v42  ;;  %v4770_v48 = vpop.f32.mrb[189].mxu0 }
 0x38b   : > { %v5250_v17 = vmax.f32 %v5165_v57, %v5167_v38  ;;  %v4819_v21 = vpop.f32.mrb[188].mxu1  ;;  %v4771_v39 = vadd.f32 %v4770_v48, %v8363_v42  ;;  %v4772_v62 = vpop.f32.mrb[190].mxu0 }
 0x38c   : > { %v4820_v43 = vadd.f32 %v4819_v21, %v8363_v42  ;;  %v4821_v47 = vpop.f32.mrb[189].mxu1  ;;  %v5188_v14 = vmax.f32 %v4769_v44, 0.0  ;;  %v4773_v4 = vpop.f32.mrb[191].mxu0 }
 0x38d   : > { %v4822_v2 = vadd.f32 %v4821_v47, %v8363_v42  ;;  %v4823_v36 = vpop.f32.mrb[190].mxu1  ;;  %v5189_v31 = vmax.f32 %v4771_v39, 0.0 }
 0x38e   : > { %v5190_v11 = vmax.f32 %v4820_v43, 0.0  ;;  %v4824_v32 = vpop.f32.mrb[191].mxu1  ;;  %v5258_v16 = vsel %vm5222_vm6, %v5188_v14, -inf }
 0x38f   : > { %v5191_v22 = vmax.f32 %v4822_v2, 0.0  ;;  %v5259_v29 = vsel %vm5222_vm6, %v5189_v31, -inf }
 0x390   : > { %v5260_v25 = vsel %vm5222_vm6, %v5190_v11, -inf }
 0x391   : > { %v5261_v12 = vmax.f32 %v5258_v16, %v5260_v25  ;;  %v5262_v18 = vsel %vm5222_vm6, %v5191_v22, -inf }
 0x392   : > { %v5263_v46 = vmax.f32 %v5259_v29, %v5262_v18 }
 0x3aa   : > { %v4860_v49 = vpop.f32.mrb[192].mxu0 }
 0x3ab   : > { %v4911_v6 = vpop.f32.mrb[192].mxu1  ;;  %v4861_v50 = vadd.f32 %v4860_v49, %v8378_v3  ;;  %v4862_v33 = vpop.f32.mrb[193].mxu0 }
 0x3ac   : > { %v4912_v54 = vadd.f32 %v4911_v6, %v8378_v3  ;;  %v4913_v0 = vpop.f32.mrb[193].mxu1  ;;  %v4863_v20 = vadd.f32 %v4862_v33, %v8378_v3  ;;  %v4864_v55 = vpop.f32.mrb[194].mxu0 }
 0x3ad   : > { %v4914_v58 = vadd.f32 %v4913_v0, %v8378_v3  ;;  %v4915_v19 = vpop.f32.mrb[194].mxu1  ;;  %v5144_v51 = vmax.f32 %v4861_v50, 0.0  ;;  %v4865_v61 = vadd.f32 %v4864_v55, %v8380_v45  ;;  %v4866_v56 = vpop.f32.mrb[195].mxu0 }
 0x3ae   : > { %v4916_v9 = vadd.f32 %v4915_v19, %v8380_v45  ;;  %v4917_v35 = vpop.f32.mrb[195].mxu1  ;;  %v5145_v8 = vmax.f32 %v4863_v20, 0.0  ;;  %v4867_v52 = vadd.f32 %v4866_v56, %v8380_v45  ;;  %v5146_v28 = vmax.f32 %v4912_v54, 0.0 }
 0x3af   : > { %v4918_v59 = vadd.f32 %v4917_v35, %v8380_v45  ;;  %v5242_v37 = vmax.f32 %v5240_v15, %v5144_v51  ;;  %v5168_v40 = vmax.f32 %v4865_v61, 0.0  ;;  %v5147_v53 = vmax.f32 %v4914_v58, 0.0 }
 0x3b0   : > { %v5243_v7 = vmax.f32 %v5241_v34, %v5145_v8  ;;  %v5169_v23 = vmax.f32 %v4867_v52, 0.0  ;;  %v5170_v13 = vmax.f32 %v4916_v9, 0.0 }
 0x3b1   : > { %v5244_v1 = vmax.f32 %v5242_v37, %v5146_v28  ;;  %v5251_v63 = vmax.f32 %v5249_v27, %v5168_v40  ;;  %v5171_v26 = vmax.f32 %v4918_v59, 0.0 }
 0x3b2   : > { %v5245_v30 = vmax.f32 %v5243_v7, %v5147_v53  ;;  %v5252_v10 = vmax.f32 %v5250_v17, %v5169_v23  ;;  %v4870_v24 = vpop.f32.mrb[196].mxu0 }
 0x3b3   : > { %v4921_v41 = vpop.f32.mrb[196].mxu1  ;;  %v5253_v5 = vmax.f32 %v5251_v63, %v5170_v13  ;;  %v4871_v57 = vadd.f32 %v4870_v24, %v8363_v42  ;;  %v4872_v60 = vpop.f32.mrb[197].mxu0 }
 0x3b4   : > { %v4922_v38 = vadd.f32 %v4921_v41, %v8363_v42  ;;  %v4923_v15 = vpop.f32.mrb[197].mxu1  ;;  %v5254_v44 = vmax.f32 %v5252_v10, %v5171_v26  ;;  %v4873_v34 = vadd.f32 %v4872_v60, %v8363_v42  ;;  %v5246_v48 = vmax.f32 %v5244_v1, %v5245_v30  ;;  %v4874_v27 = vpop.f32.mrb[198].mxu0 }
 0x3b5   : > { %v4924_v21 = vadd.f32 %v4923_v15, %v8363_v42  ;;  %v4925_v43 = vpop.f32.mrb[198].mxu1  ;;  %v5192_v39 = vmax.f32 %v4871_v57, 0.0  ;;  %v4875_v47 = vpop.f32.mrb[199].mxu0 }
 0x3b6   : > { %v5194_v17 = vmax.f32 %v4922_v38, 0.0  ;;  %v4926_v62 = vpop.f32.mrb[199].mxu1  ;;  %v5193_v14 = vmax.f32 %v4873_v34, 0.0  ;;  %5247 = vmax.xlane.f32.xlu0 %v5246_v48  ;;  %v5255_v36 = vmax.f32 %v5253_v5, %v5254_v44 }
 0x3b7   : > { %v5195_v2 = vmax.f32 %v4924_v21, 0.0  ;;  %v5264_v4 = vsel %vm5222_vm6, %v5192_v39, -inf }
 0x3b8   : > { %v5265_v11 = vmax.f32 %v5261_v12, %v5264_v4  ;;  %v5266_v31 = vsel %vm5222_vm6, %v5193_v14, -inf  ;;  %5256 = vmax.xlane.f32.xlu1 %v5255_v36  ;;  %v5268_v32 = vsel %vm5222_vm6, %v5194_v17, -inf }
 0x3b9   : > { %v5267_v16 = vmax.f32 %v5263_v46, %v5266_v31  ;;  %v5270_v22 = vsel %vm5222_vm6, %v5195_v2, -inf }
 0x3ba   : > { %v5269_v25 = vmax.f32 %v5265_v11, %v5268_v32 }
 0x3bb   : > { %v5271_v29 = vmax.f32 %v5267_v16, %v5270_v22 }
 0x3bd   : > { %v5272_v18 = vmax.f32 %v5269_v25, %v5271_v29 }
 0x3bf   : > { %5273 = vmax.xlane.f32.xlu0 %v5272_v18 }
 0x3e1   : > { %v4962_v49 = vpop.f32.mrb[200].mxu0 }
 0x3e2   : > { %v4963_v6 = vadd.f32 %v4962_v49, %v8378_v3  ;;  %v5013_v50 = vpop.f32.mrb[200].mxu1  ;;  %v4964_v54 = vpop.f32.mrb[201].mxu0 }
 0x3e3   : > { %v5014_v33 = vadd.f32 %v5013_v50, %v8378_v3  ;;  %v4965_v12 = vadd.f32 %v4964_v54, %v8378_v3  ;;  %v5015_v0 = vpop.f32.mrb[201].mxu1  ;;  %v4966_v20 = vpop.f32.mrb[202].mxu0 }
 0x3e4   : > { %v5148_v58 = vmax.f32 %v4963_v6, 0.0  ;;  %v5016_v46 = vadd.f32 %v5015_v0, %v8378_v3  ;;  %v4967_v55 = vadd.f32 %v4966_v20, %v8380_v45  ;;  %v5017_v19 = vpop.f32.mrb[202].mxu1  ;;  %v4968_v51 = vpop.f32.mrb[203].mxu0 }
 0x3e5   : > { %v5150_v61 = vmax.f32 %v5014_v33, 0.0  ;;  %v5149_v9 = vmax.f32 %v4965_v12, 0.0  ;;  %v5018_v56 = vadd.f32 %v5017_v19, %v8380_v45  ;;  %v4969_v35 = vadd.f32 %v4968_v51, %v8380_v45  ;;  %v5019_v8 = vpop.f32.mrb[203].mxu1 }
 0x3e6   : > { %v5151_v52 = vmax.f32 %v5016_v46, 0.0  ;;  %v5172_v59 = vmax.f32 %v4967_v55, 0.0  ;;  %v5020_v37 = vadd.f32 %v5019_v8, %v8380_v45 }
 0x3e7   : > { %v5275_v28 = vmax.f32 %v5148_v58, %v5150_v61  ;;  %v5174_v40 = vmax.f32 %v5018_v56, 0.0  ;;  %v5173_v7 = vmax.f32 %v4969_v35, 0.0 }
 0x3e8   : > { %v5276_v53 = vmax.f32 %v5149_v9, %v5151_v52  ;;  %v5175_v23 = vmax.f32 %v5020_v37, 0.0 }
 0x3e9   : > { %v5284_v1 = vmax.f32 %v5172_v59, %v5174_v40  ;;  %v4972_v63 = vpop.f32.mrb[204].mxu0 }
 0x3ea   : > { %v5285_v13 = vmax.f32 %v5173_v7, %v5175_v23  ;;  %v4973_v30 = vadd.f32 %v4972_v63, %v8363_v42  ;;  %v5023_v10 = vpop.f32.mrb[204].mxu1  ;;  %v4974_v26 = vpop.f32.mrb[205].mxu0 }
 0x3eb   : > { %v5024_v24 = vadd.f32 %v5023_v10, %v8363_v42  ;;  %v4975_v41 = vadd.f32 %v4974_v26, %v8363_v42  ;;  %v5025_v5 = vpop.f32.mrb[205].mxu1  ;;  %v4976_v57 = vpop.f32.mrb[206].mxu0 }
 0x3ec   : > { %v5196_v38 = vmax.f32 %v4973_v30, 0.0  ;;  %v5026_v60 = vadd.f32 %v5025_v5, %v8363_v42  ;;  %v4977_v15 = vpop.f32.mrb[207].mxu0  ;;  %v5027_v44 = vpop.f32.mrb[206].mxu1 }
 0x3ed   : > { %v5198_v34 = vmax.f32 %v5024_v24, 0.0  ;;  %v5197_v21 = vmax.f32 %v4975_v41, 0.0  ;;  %v5028_v48 = vpop.f32.mrb[207].mxu1 }
 0x3ee   : > { %v5293_v27 = vsel %vm5222_vm6, %v5196_v38, -inf  ;;  %v5199_v43 = vmax.f32 %v5026_v60, 0.0 }
 0x3ef   : > { %v5295_v39 = vsel %vm5222_vm6, %v5198_v34, -inf  ;;  %v5294_v17 = vsel %vm5222_vm6, %v5197_v21, -inf }
 0x3f0   : > { %v5296_v47 = vmax.f32 %v5293_v27, %v5295_v39  ;;  %v5297_v62 = vsel %vm5222_vm6, %v5199_v43, -inf }
 0x3f1   : > { %v5298_v14 = vmax.f32 %v5294_v17, %v5297_v62 }
 0x3f4   : > { %v5212_v39 = vpop.xlane.xlu0 %5211 }
 0x3f6   : > { %v5221_v62 = vpop.xlane.xlu1 %5220 }
 0x3fd   : > { %v5239_v17 = vpop.xlane.xlu0 %5238 }
 0x40e   : > { %v5064_v2 = vpop.f32.mrb[208].mxu0 }
 0x40f   : > { %v5115_v36 = vpop.f32.mrb[208].mxu1  ;;  %v5065_v4 = vadd.f32 %v5064_v2, %v8378_v3  ;;  %v5066_v31 = vpop.f32.mrb[209].mxu0 }
 0x410   : > { %v5116_v11 = vadd.f32 %v5115_v36, %v8378_v3  ;;  %v5117_v32 = vpop.f32.mrb[209].mxu1  ;;  %v5067_v16 = vadd.f32 %v5066_v31, %v8378_v3  ;;  %v5068_v25 = vpop.f32.mrb[210].mxu0 }
 0x411   : > { %v5118_v22 = vadd.f32 %v5117_v32, %v8378_v3  ;;  %v5119_v29 = vpop.f32.mrb[210].mxu1  ;;  %v5152_v18 = vmax.f32 %v5065_v4, 0.0  ;;  %v5069_v49 = vadd.f32 %v5068_v25, %v8380_v45  ;;  %v5070_v50 = vpop.f32.mrb[211].mxu0 }
 0x412   : > { %v5120_v6 = vadd.f32 %v5119_v29, %v8380_v45  ;;  %v5121_v54 = vpop.f32.mrb[211].mxu1  ;;  %v5153_v33 = vmax.f32 %v5067_v16, 0.0  ;;  %v5071_v12 = vadd.f32 %v5070_v50, %v8380_v45  ;;  %v5154_v58 = vmax.f32 %v5116_v11, 0.0 }
 0x413   : > { %v5122_v0 = vadd.f32 %v5121_v54, %v8380_v45  ;;  %v5277_v20 = vmax.f32 %v5275_v28, %v5152_v18  ;;  %v5176_v46 = vmax.f32 %v5069_v49, 0.0  ;;  %v5155_v19 = vmax.f32 %v5118_v22, 0.0 }
 0x414   : > { %v5278_v55 = vmax.f32 %v5276_v53, %v5153_v33  ;;  %v5177_v3 = vmax.f32 %v5071_v12, 0.0  ;;  %v5178_v9 = vmax.f32 %v5120_v6, 0.0 }
 0x415   : > { %v5279_v51 = vmax.f32 %v5277_v20, %v5154_v58  ;;  %v5286_v61 = vmax.f32 %v5284_v1, %v5176_v46  ;;  %v5179_v8 = vmax.f32 %v5122_v0, 0.0 }
 0x416   : > { %v5280_v56 = vmax.f32 %v5278_v55, %v5155_v19  ;;  %v5287_v35 = vmax.f32 %v5285_v13, %v5177_v3  ;;  %v5074_v52 = vpop.f32.mrb[212].mxu0 }
 0x417   : > { %v5125_v59 = vpop.f32.mrb[212].mxu1  ;;  %v5288_v37 = vmax.f32 %v5286_v61, %v5178_v9  ;;  %v5075_v40 = vadd.f32 %v5074_v52, %v8363_v42  ;;  %v5076_v45 = vpop.f32.mrb[213].mxu0 }
 0x418   : > { %v5126_v7 = vadd.f32 %v5125_v59, %v8363_v42  ;;  %v5127_v28 = vpop.f32.mrb[213].mxu1  ;;  %v5289_v23 = vmax.f32 %v5287_v35, %v5179_v8  ;;  %v5077_v53 = vadd.f32 %v5076_v45, %v8363_v42  ;;  %v5078_v30 = vpop.f32.mrb[214].mxu0  ;;  %v5281_v10 = vmax.f32 %v5279_v51, %v5280_v56 }
 0x419   : > { %v5128_v63 = vadd.f32 %v5127_v28, %v8363_v42  ;;  %v5129_v1 = vpop.f32.mrb[214].mxu1  ;;  %v5200_v26 = vmax.f32 %v5075_v40, 0.0  ;;  %v5079_v24 = vpop.f32.mrb[215].mxu0 }
 0x41a   : > { %v5202_v13 = vmax.f32 %v5126_v7, 0.0  ;;  %v5130_v41 = vpop.f32.mrb[215].mxu1  ;;  %v5201_v5 = vmax.f32 %v5077_v53, 0.0  ;;  %5282 = vmax.xlane.f32.xlu1 %v5281_v10  ;;  %v5290_v38 = vmax.f32 %v5288_v37, %v5289_v23 }
 0x41b   : > { %v5203_v57 = vmax.f32 %v5128_v63, 0.0  ;;  %v5299_v60 = vsel %vm5222_vm6, %v5200_v26, -inf }
 0x41c   : > { %v5300_v15 = vmax.f32 %v5296_v47, %v5299_v60  ;;  %v5301_v44 = vsel %vm5222_vm6, %v5201_v5, -inf  ;;  %5291 = vmax.xlane.f32.xlu0 %v5290_v38  ;;  %v5303_v42 = vsel %vm5222_vm6, %v5202_v13, -inf }
 0x41d   : > { %v5302_v34 = vmax.f32 %v5298_v14, %v5301_v44  ;;  %v5305_v21 = vsel %vm5222_vm6, %v5203_v57, -inf }
 0x41e   : > { %v5304_v48 = vmax.f32 %v5300_v15, %v5303_v42 }
 0x41f   : > { %v5306_v27 = vmax.f32 %v5302_v34, %v5305_v21 }
 0x421   : > { %v5307_v43 = vmax.f32 %v5304_v48, %v5306_v27 }
 0x423   : > { %5308 = vmax.xlane.f32.xlu1 %v5307_v43 }
 0x443   : > { %v5248_v2 = vpop.xlane.xlu0 %5247 }
 0x444   : > { %v5311_v14 = vsel %vm5310_vm2, %v5212_v39, %v5248_v2 }
 0x445   : > { %v5257_v36 = vpop.xlane.xlu1 %5256 }
 0x446   : > { %v5312_v31 = vsel %vm5310_vm2, %v5221_v62, %v5257_v36 }
 0x44c   : > { %v5274_v47 = vpop.xlane.xlu0 %5273 }
 0x44d   : > { %v5313_v22 = vsel %vm5310_vm2, %v5239_v17, %v5274_v47 }
 0x4a7   : > { %v5283_v4 = vpop.xlane.xlu1 %5282 }
 0x4a8   : > { %v5315_v11 = vsel %vm5314_vm12, %v5311_v14, %v5283_v4 }
 0x4a9   : > { %5319 = vst.msk [vmem:[%s251_s12] sm:$0xff] %vm5318_vm0, %v5315_v11  ;;  %v5292_v32 = vpop.xlane.xlu0 %5291 }
 0x4aa   : > { %v5316_v16 = vsel %vm5314_vm12, %v5312_v31, %v5292_v32 }
 0x4ab   : > { %5320 = vst.msk [vmem:[%s251_s12 + $0x8] sm:$0xff] %vm5318_vm0, %v5316_v16 }
 0x4b0   : > { %v5309_v25 = vpop.xlane.xlu1 %5308 }
 0x4b1   : > { %v5317_v29 = vsel %vm5314_vm12, %v5313_v22, %v5309_v25 }
 0x4b2   : > { %5322 = vst.msk [vmem:[%s251_s12 + $0x10] sm:$0xf] %vm5321_vm13, %v5317_v29 }
 0x4b3 PF: > { %s16_s21 = sadd.s32 1, %s5612_s21  }
 0x4b4   : > { %p13_p4 = scmp.ge.s32.totalorder %s16_s21, 4  }
 0x4b6   :  { %15 = sbr.rel (!%p13_p4) target bundleno = 1 (0x1), region = 74 }

</bundles_post_ra>
